<compile_context>
chip_gen: v6e
topology: v6e:2x2x1
jax: 0.10.0
libtpu: 0.0.40
codegen_flags: <defaults>
</compile_context>

<pallas_src>
import math
import jax
import jax.numpy as jnp
from jax import lax
from jax.experimental import pallas as pl
from jax.experimental.pallas import tpu as pltpu  # noqa: F401  (TPU params if scaled up)

# ---------------- small, self-consistent ViT config (scaled-down module defaults) ----------------
IMAGE_SIZE = 16
PATCH = 4
EMBED_DIM = 32
IN_CH = 3
LAYERS = 2
HEADS = 4
HEAD_DIM = EMBED_DIM // HEADS
MLP_HIDDEN = 64
NUM_CLASSES = 3
BATCH = 2
NUM_PATCHES = (IMAGE_SIZE // PATCH) ** 2          # 16
SEQ = NUM_PATCHES + 1                             # 17
PATCH_DIM = IN_CH * PATCH * PATCH                 # 48
LN_EPS = 1e-5
NEG_INF = -1e30

assert NUM_PATCHES & (NUM_PATCHES - 1) == 0, "in-kernel image-id mask uses a shift"
LOG2_NP = NUM_PATCHES.bit_length() - 1

# Token layout (CLS-first, sublane padded):
#   rows [0, BATCH)                        : CLS token of image b
#   rows [BATCH, BATCH + BATCH*NUM_PATCHES): patches of image b (contiguous, pos order)
#   rows [.., T_PAD)                       : zero padding (own "image" id >= BATCH; never read)
TOKENS = BATCH * SEQ                              # 34
T_PAD = ((TOKENS + 7) // 8) * 8                   # 40
CLS_ROWS = 8                                      # sublane-aligned slice covering the B CLS rows

# ---------------- packed-slab layout (all static Python ints) ----------------
W_VEC = max(EMBED_DIM, MLP_HIDDEN)                # 64
W_MAT = max(EMBED_DIM, MLP_HIDDEN)                # 64
HEAD_PAD = W_MAT                                  # classifier logits padded to 64 lanes

V_ADD = 0                                         # (T_PAD, D) additive term: pos + patch_b / cls
V_LAYER = V_ADD + T_PAD
V_PER_LAYER = 10                                  # g1,b1,bq,bk,bv,bo,g2,b2,bm1,bm2
V_CLS_G = V_LAYER + LAYERS * V_PER_LAYER
V_CLS_B = V_CLS_G + 1
V_HEAD_B = V_CLS_B + 1
V_HMASK = V_HEAD_B + 1                            # HEADS rows of 0/1 head lane masks
V_TOTAL = ((V_HMASK + HEADS + 7) // 8) * 8

M_PATCH = 0                                       # (PATCH_DIM, D) patch-embed weight
M_LAYER = M_PATCH + PATCH_DIM
M_PER_LAYER = 5 * EMBED_DIM + MLP_HIDDEN          # Wq,Wk,Wv,Wo,W1 (D rows each) + W2 (MLP rows)
M_HEAD = M_LAYER + LAYERS * M_PER_LAYER           # (D, NUM_CLASSES padded) classifier weight
M_TOTAL = M_HEAD + EMBED_DIM

# GELU: tanh approximation per perf review (EUP tanh, cheapest on the VPU-bound path).
# NOTE: differs from torch.nn.GELU()'s exact erf by ~1e-3; set False for ~1e-6 match.
USE_TANH_GELU = True


# ---------------- in-kernel helpers ----------------
def _erf(x):
    # Abramowitz & Stegun 7.1.26, |err| < 1.5e-7 (exact-GELU fallback path).
    a1, a2, a3, a4, a5 = 0.254829592, -0.284496736, 1.421413741, -1.453152027, 1.061405429
    p = 0.3275911
    s = jnp.sign(x)
    ax = jnp.abs(x)
    t = 1.0 / (1.0 + p * ax)
    poly = ((((a5 * t + a4) * t + a3) * t + a2) * t + a1) * t
    return s * (1.0 - poly * jnp.exp(-ax * ax))


def _gelu(x):
    if USE_TANH_GELU:
        c = math.sqrt(2.0 / math.pi)
        return 0.5 * x * (1.0 + jnp.tanh(c * (x + 0.044715 * x * x * x)))
    return 0.5 * x * (1.0 + _erf(x * (1.0 / math.sqrt(2.0))))


def _layernorm(x, gamma, beta):
    mu = jnp.mean(x, axis=-1, keepdims=True)
    var = jnp.mean((x - mu) ** 2, axis=-1, keepdims=True)
    return (x - mu) * lax.rsqrt(var + LN_EPS) * gamma + beta


# ---------------- fully fused ViT forward kernel ----------------
def vit_fused_kernel(patches_ref, wvec_ref, wmat_ref, out_ref):
    f32 = jnp.float32

    def vec(row, width=EMBED_DIM):            # (1, width) row of the vector slab
        return wvec_ref[row:row + 1, :width]

    def mat(row, nrows, width=EMBED_DIM):     # (nrows, width) row-block of the matrix slab
        return wmat_ref[row:row + nrows, :width]

    # ---- patch embedding + (pos emb / cls token / conv bias) additive term ----
    x = jnp.dot(patches_ref[...], mat(M_PATCH, PATCH_DIM), preferred_element_type=f32)
    x = x + wvec_ref[V_ADD:V_ADD + T_PAD, :EMBED_DIM]
    # embedding_dropout (p=0.1) is identity in eval mode.

    # ---- block-diagonal attention bias generated in-kernel from iota ----
    # token -> image id: CLS rows 0..B-1 map to their image, patch rows via a shift
    # (NUM_PATCHES is a power of 2); padding rows get image id >= BATCH, so they only
    # attend among themselves (finite softmax) and never influence real rows.
    ri = lax.broadcasted_iota(jnp.int32, (T_PAD, T_PAD), 0)
    ci = lax.broadcasted_iota(jnp.int32, (T_PAD, T_PAD), 1)

    def img_of(idx):
        return jnp.where(idx < BATCH, idx,
                         jnp.right_shift(jnp.maximum(idx - BATCH, 0), LOG2_NP))

    attn_bias = jnp.where(img_of(ri) == img_of(ci),
                          jnp.float32(0.0), jnp.float32(NEG_INF))

    head_masks = [vec(V_HMASK + h) for h in range(HEADS)]     # (1, D) 0/1 lane masks
    scale = 1.0 / math.sqrt(HEAD_DIM)

    for l in range(LAYERS):
        vb = V_LAYER + l * V_PER_LAYER
        mb = M_LAYER + l * M_PER_LAYER
        g1, b1 = vec(vb + 0), vec(vb + 1)
        bq, bk, bv = vec(vb + 2), vec(vb + 3), vec(vb + 4)
        bo = vec(vb + 5)
        g2, b2 = vec(vb + 6), vec(vb + 7)
        bm1, bm2 = vec(vb + 8, MLP_HIDDEN), vec(vb + 9)

        # ---- pre-LN multi-head self-attention + residual ----
        xn = _layernorm(x, g1, b1)
        q = jnp.dot(xn, mat(mb + 0 * EMBED_DIM, EMBED_DIM), preferred_element_type=f32) + bq
        k = jnp.dot(xn, mat(mb + 1 * EMBED_DIM, EMBED_DIM), preferred_element_type=f32) + bk
        v = jnp.dot(xn, mat(mb + 2 * EMBED_DIM, EMBED_DIM), preferred_element_type=f32) + bv

        ctx = jnp.zeros((T_PAD, EMBED_DIM), f32)
        for h in range(HEADS):
            m = head_masks[h]
            # Masking q's lanes restricts the contraction to this head's dims, and
            # masking the p@V result keeps only this head's context columns — no
            # lane-unaligned activation slicing anywhere (attn_dropout = 0).
            s = lax.dot_general(q * m, k, (((1,), (1,)), ((), ())),
                                preferred_element_type=f32) * scale + attn_bias
            s = s - jnp.max(s, axis=-1, keepdims=True)
            p = jnp.exp(s)
            p = p / jnp.sum(p, axis=-1, keepdims=True)        # exact softmax (matches torch)
            ctx = ctx + jnp.dot(p, v, preferred_element_type=f32) * m
        x = x + jnp.dot(ctx, mat(mb + 3 * EMBED_DIM, EMBED_DIM),
                        preferred_element_type=f32) + bo

        # ---- pre-LN MLP (Linear -> GELU -> Linear) + residual; mlp_dropout is eval-identity ----
        xn2 = _layernorm(x, g2, b2)
        h1 = jnp.dot(xn2, mat(mb + 4 * EMBED_DIM, EMBED_DIM, MLP_HIDDEN),
                     preferred_element_type=f32) + bm1
        h1 = _gelu(h1)
        x = x + jnp.dot(h1, mat(mb + 5 * EMBED_DIM, MLP_HIDDEN),
                        preferred_element_type=f32) + bm2

    # ---- classifier head on the CLS rows only (rows 0..B-1, sublane-padded to 8) ----
    xc = _layernorm(x[:CLS_ROWS, :], vec(V_CLS_G), vec(V_CLS_B))
    out_ref[...] = jnp.dot(xc, mat(M_HEAD, EMBED_DIM, HEAD_PAD),
                           preferred_element_type=f32) + vec(V_HEAD_B, HEAD_PAD)


# ---------------- parameters ----------------
def init_params(key):
    keys = iter(jax.random.split(key, 64))

    def nrm(shape, scale=0.02):
        return scale * jax.random.normal(next(keys), shape, dtype=jnp.float32)

    params = {
        "cls_token": nrm((1, 1, EMBED_DIM), 1.0),              # torch.randn
        "pos_emb": nrm((1, SEQ, EMBED_DIM), 1.0),              # torch.randn
        "patch_w": nrm((PATCH_DIM, EMBED_DIM)),                # conv weight, flattened (c,ph,pw) x D
        "patch_b": jnp.zeros((1, EMBED_DIM), jnp.float32),
        "cls_g": jnp.ones((1, EMBED_DIM), jnp.float32),
        "cls_b": jnp.zeros((1, EMBED_DIM), jnp.float32),
        "head_w": nrm((EMBED_DIM, NUM_CLASSES)),
        "head_b": jnp.zeros((1, NUM_CLASSES), jnp.float32),
    }
    layers = []
    for _ in range(LAYERS):
        layers.append((
            jnp.ones((1, EMBED_DIM), jnp.float32),             # ln1 gamma
            jnp.zeros((1, EMBED_DIM), jnp.float32),            # ln1 beta
            nrm((EMBED_DIM, 3 * EMBED_DIM)),                   # in_proj weight^T
            jnp.zeros((1, 3 * EMBED_DIM), jnp.float32),        # in_proj bias
            nrm((EMBED_DIM, EMBED_DIM)),                       # out_proj weight^T
            jnp.zeros((1, EMBED_DIM), jnp.float32),            # out_proj bias
            jnp.ones((1, EMBED_DIM), jnp.float32),             # ln2 gamma
            jnp.zeros((1, EMBED_DIM), jnp.float32),            # ln2 beta
            nrm((EMBED_DIM, MLP_HIDDEN)),                      # mlp fc1 weight^T
            jnp.zeros((1, MLP_HIDDEN), jnp.float32),           # mlp fc1 bias
            nrm((MLP_HIDDEN, EMBED_DIM)),                      # mlp fc2 weight^T
            jnp.zeros((1, EMBED_DIM), jnp.float32),            # mlp fc2 bias
        ))
    params["layers"] = layers
    return params


def pack_params(params):
    """Fold every parameter (plus the pos/cls/patch-bias additive term and per-head
    lane masks) into two slabs. Called ONCE at init — nothing here is per-forward."""
    f32 = jnp.float32
    D = EMBED_DIM
    wvec = jnp.zeros((V_TOTAL, W_VEC), f32)
    wmat = jnp.zeros((M_TOTAL, W_MAT), f32)

    # Per-token additive term: CLS rows get pos[0] + cls_token; patch rows get pos[1+p] + patch_b.
    pos = params["pos_emb"][0]                                  # (SEQ, D)
    add = jnp.zeros((T_PAD, D), f32)
    add = add.at[:BATCH, :].set(pos[0] + params["cls_token"][0, 0])
    add = add.at[BATCH:BATCH + BATCH * NUM_PATCHES, :].set(
        jnp.tile(pos[1:] + params["patch_b"], (BATCH, 1)))
    wvec = wvec.at[V_ADD:V_ADD + T_PAD, :D].set(add)

    # Per-head 0/1 lane masks over the embedding dim.
    lane = jnp.arange(D)
    hmask = (lane[None, :] // HEAD_DIM == jnp.arange(HEADS)[:, None]).astype(f32)
    wvec = wvec.at[V_HMASK:V_HMASK + HEADS, :D].set(hmask)

    wvec = wvec.at[V_CLS_G, :D].set(params["cls_g"][0])
    wvec = wvec.at[V_CLS_B, :D].set(params["cls_b"][0])
    wvec = wvec.at[V_HEAD_B, :NUM_CLASSES].set(params["head_b"][0])

    wmat = wmat.at[M_PATCH:M_PATCH + PATCH_DIM, :D].set(params["patch_w"])
    wmat = wmat.at[M_HEAD:M_HEAD + D, :NUM_CLASSES].set(params["head_w"])

    for l, lp in enumerate(params["layers"]):
        (g1, b1, wqkv, bqkv, wo, bo, g2, b2, w1, bm1, w2, bm2) = lp
        vb = V_LAYER + l * V_PER_LAYER
        mb = M_LAYER + l * M_PER_LAYER
        wvec = wvec.at[vb + 0, :D].set(g1[0])
        wvec = wvec.at[vb + 1, :D].set(b1[0])
        wvec = wvec.at[vb + 2, :D].set(bqkv[0, 0:D])
        wvec = wvec.at[vb + 3, :D].set(bqkv[0, D:2 * D])
        wvec = wvec.at[vb + 4, :D].set(bqkv[0, 2 * D:3 * D])
        wvec = wvec.at[vb + 5, :D].set(bo[0])
        wvec = wvec.at[vb + 6, :D].set(g2[0])
        wvec = wvec.at[vb + 7, :D].set(b2[0])
        wvec = wvec.at[vb + 8, :MLP_HIDDEN].set(bm1[0])
        wvec = wvec.at[vb + 9, :D].set(bm2[0])

        wmat = wmat.at[mb + 0 * D:mb + 1 * D, :D].set(wqkv[:, 0:D])          # Wq
        wmat = wmat.at[mb + 1 * D:mb + 2 * D, :D].set(wqkv[:, D:2 * D])      # Wk
        wmat = wmat.at[mb + 2 * D:mb + 3 * D, :D].set(wqkv[:, 2 * D:3 * D])  # Wv
        wmat = wmat.at[mb + 3 * D:mb + 4 * D, :D].set(wo)                    # Wo
        wmat = wmat.at[mb + 4 * D:mb + 5 * D, :MLP_HIDDEN].set(w1)           # W1
        wmat = wmat.at[mb + 5 * D:mb + 5 * D + MLP_HIDDEN, :D].set(w2)       # W2

    return wvec, wmat


# ---------------- cost estimate (advisory for XLA scheduling around the call) ----------------
_FLOPS = (2 * T_PAD * PATCH_DIM * EMBED_DIM
          + LAYERS * (3 * 2 * T_PAD * EMBED_DIM * EMBED_DIM
                      + HEADS * 4 * T_PAD * T_PAD * EMBED_DIM
                      + 2 * T_PAD * EMBED_DIM * EMBED_DIM
                      + 4 * T_PAD * EMBED_DIM * MLP_HIDDEN)
          + 2 * CLS_ROWS * EMBED_DIM * HEAD_PAD)
_TRANSC = LAYERS * (HEADS * T_PAD * T_PAD + T_PAD * MLP_HIDDEN)
_BYTES = 4 * (T_PAD * PATCH_DIM + V_TOTAL * W_VEC + M_TOTAL * W_MAT + CLS_ROWS * HEAD_PAD)
_COST = pl.CostEstimate(flops=_FLOPS, transcendentals=_TRANSC, bytes_accessed=_BYTES)


# ---------------- full forward (one pallas_call + minimal per-call glue) ----------------
def vit_forward(x, wvec, wmat):
    B, C, H, W = x.shape
    Hp, Wp = H // PATCH, W // PATCH
    # Conv2d(kernel=stride=PATCH) == unfold (c, ph, pw)-ordered patches; the matmul is in-kernel.
    p = x.reshape(B, C, Hp, PATCH, Wp, PATCH)
    p = p.transpose(0, 2, 4, 1, 3, 5).reshape(B * Hp * Wp, PATCH_DIM)
    patches = jnp.zeros((T_PAD, PATCH_DIM), jnp.float32)
    patches = patches.at[BATCH:BATCH + B * Hp * Wp, :].set(p)   # CLS + pad rows stay zero

    out = pl.pallas_call(
        vit_fused_kernel,
        out_shape=jax.ShapeDtypeStruct((CLS_ROWS, HEAD_PAD), jnp.float32),
        cost_estimate=_COST,
    )(patches, wvec, wmat)

    # CLS logits: plain static slice (no gather).
    return out[:B, :NUM_CLASSES]


if __name__ == "__main__":
    key = jax.random.PRNGKey(0)
    kx, kp = jax.random.split(key)
    x = jax.random.normal(kx, (BATCH, IN_CH, IMAGE_SIZE, IMAGE_SIZE), dtype=jnp.float32)
    params = init_params(kp)
    wvec, wmat = pack_params(params)      # one-time packing, hoisted out of the forward path

    fwd = jax.jit(vit_forward)
    out = fwd(x, wvec, wmat)
    jax.block_until_ready(out)
    assert out.shape == (BATCH, NUM_CLASSES) and out.dtype == jnp.float32
    assert bool(jnp.all(jnp.isfinite(out)))
    print("KERNEL_OK")
</pallas_src>

<mosaic_0001>
module attributes {stable_mosaic.version = 11 : i64} {
  func.func @vit_fused_kernel(%arg0: memref<40x48xf32, #tpu.memory_space<vmem>>, %arg1: memref<72x64xf32, #tpu.memory_space<vmem>>, %arg2: memref<528x64xf32, #tpu.memory_space<vmem>>, %arg3: memref<8x64xf32, #tpu.memory_space<vmem>>) attributes {dimension_semantics = [], scalar_prefetch = 0 : i64, scratch_operands = 0 : i64, tpu.core_type = #tpu.core_type<tc>} {
    %c0 = arith.constant 0 : index
    %c0_0 = arith.constant 0 : index
    %0 = vector.load %arg0[%c0, %c0_0] : memref<40x48xf32, #tpu.memory_space<vmem>>, vector<40x48xf32>
    %c0_1 = arith.constant 0 : index
    %c0_2 = arith.constant 0 : index
    %1 = vector.load %arg2[%c0_1, %c0_2] : memref<528x64xf32, #tpu.memory_space<vmem>>, vector<48x32xf32>
    %cst = arith.constant dense<0.000000e+00> : vector<40x32xf32>
    %2 = tpu.matmul %0, %1, %cst {dimension_numbers = #tpu.dot_dimension_numbers<[1], [0], [0], [1], [0, 0, 1, 1], [], []>} : vector<40x48xf32>, vector<48x32xf32>, vector<40x32xf32> -> vector<40x32xf32>
    %c0_3 = arith.constant 0 : index
    %c0_4 = arith.constant 0 : index
    %3 = vector.load %arg1[%c0_3, %c0_4] : memref<72x64xf32, #tpu.memory_space<vmem>>, vector<40x32xf32>
    %4 = arith.addf %2, %3 : vector<40x32xf32>
    %5 = tpu.iota {dimensions = array<i32: 0>} : vector<40x40xi32>
    %6 = tpu.iota {dimensions = array<i32: 1>} : vector<40x40xi32>
    %c2_i32 = arith.constant 2 : i32
    %7 = vector.broadcast %c2_i32 : i32 to vector<40x40xi32>
    %8 = arith.cmpi slt, %5, %7 : vector<40x40xi32>
    %c2_i32_5 = arith.constant 2 : i32
    %9 = vector.broadcast %c2_i32_5 : i32 to vector<40x40xi32>
    %10 = arith.subi %5, %9 : vector<40x40xi32>
    %c0_i32 = arith.constant 0 : i32
    %11 = vector.broadcast %c0_i32 : i32 to vector<40x40xi32>
    %12 = arith.maxsi %10, %11 : vector<40x40xi32>
    %c4_i32 = arith.constant 4 : i32
    %13 = vector.broadcast %c4_i32 : i32 to vector<40x40xi32>
    %14 = arith.shrsi %12, %13 : vector<40x40xi32>
    %15 = arith.select %8, %5, %14 : vector<40x40xi1>, vector<40x40xi32>
    %c2_i32_6 = arith.constant 2 : i32
    %16 = vector.broadcast %c2_i32_6 : i32 to vector<40x40xi32>
    %17 = arith.cmpi slt, %6, %16 : vector<40x40xi32>
    %c2_i32_7 = arith.constant 2 : i32
    %18 = vector.broadcast %c2_i32_7 : i32 to vector<40x40xi32>
    %19 = arith.subi %6, %18 : vector<40x40xi32>
    %c0_i32_8 = arith.constant 0 : i32
    %20 = vector.broadcast %c0_i32_8 : i32 to vector<40x40xi32>
    %21 = arith.maxsi %19, %20 : vector<40x40xi32>
    %c4_i32_9 = arith.constant 4 : i32
    %22 = vector.broadcast %c4_i32_9 : i32 to vector<40x40xi32>
    %23 = arith.shrsi %21, %22 : vector<40x40xi32>
    %24 = arith.select %17, %6, %23 : vector<40x40xi1>, vector<40x40xi32>
    %25 = arith.cmpi eq, %15, %24 : vector<40x40xi32>
    %cst_10 = arith.constant 0.000000e+00 : f32
    %cst_11 = arith.constant -1.000000e+30 : f32
    %26 = vector.broadcast %cst_10 : f32 to vector<40x40xf32>
    %27 = vector.broadcast %cst_11 : f32 to vector<40x40xf32>
    %28 = arith.select %25, %26, %27 : vector<40x40xi1>, vector<40x40xf32>
    %c63 = arith.constant 63 : index
    %c0_12 = arith.constant 0 : index
    %29 = vector.load %arg1[%c63, %c0_12] : memref<72x64xf32, #tpu.memory_space<vmem>>, vector<1x32xf32>
    %c64 = arith.constant 64 : index
    %c0_13 = arith.constant 0 : index
    %30 = vector.load %arg1[%c64, %c0_13] : memref<72x64xf32, #tpu.memory_space<vmem>>, vector<1x32xf32>
    %c65 = arith.constant 65 : index
    %c0_14 = arith.constant 0 : index
    %31 = vector.load %arg1[%c65, %c0_14] : memref<72x64xf32, #tpu.memory_space<vmem>>, vector<1x32xf32>
    %c66 = arith.constant 66 : index
    %c0_15 = arith.constant 0 : index
    %32 = vector.load %arg1[%c66, %c0_15] : memref<72x64xf32, #tpu.memory_space<vmem>>, vector<1x32xf32>
    %c40 = arith.constant 40 : index
    %c0_16 = arith.constant 0 : index
    %33 = vector.load %arg1[%c40, %c0_16] : memref<72x64xf32, #tpu.memory_space<vmem>>, vector<1x32xf32>
    %c41 = arith.constant 41 : index
    %c0_17 = arith.constant 0 : index
    %34 = vector.load %arg1[%c41, %c0_17] : memref<72x64xf32, #tpu.memory_space<vmem>>, vector<1x32xf32>
    %c42 = arith.constant 42 : index
    %c0_18 = arith.constant 0 : index
    %35 = vector.load %arg1[%c42, %c0_18] : memref<72x64xf32, #tpu.memory_space<vmem>>, vector<1x32xf32>
    %c43 = arith.constant 43 : index
    %c0_19 = arith.constant 0 : index
    %36 = vector.load %arg1[%c43, %c0_19] : memref<72x64xf32, #tpu.memory_space<vmem>>, vector<1x32xf32>
    %c44 = arith.constant 44 : index
    %c0_20 = arith.constant 0 : index
    %37 = vector.load %arg1[%c44, %c0_20] : memref<72x64xf32, #tpu.memory_space<vmem>>, vector<1x32xf32>
    %c45 = arith.constant 45 : index
    %c0_21 = arith.constant 0 : index
    %38 = vector.load %arg1[%c45, %c0_21] : memref<72x64xf32, #tpu.memory_space<vmem>>, vector<1x32xf32>
    %c46 = arith.constant 46 : index
    %c0_22 = arith.constant 0 : index
    %39 = vector.load %arg1[%c46, %c0_22] : memref<72x64xf32, #tpu.memory_space<vmem>>, vector<1x32xf32>
    %c47 = arith.constant 47 : index
    %c0_23 = arith.constant 0 : index
    %40 = vector.load %arg1[%c47, %c0_23] : memref<72x64xf32, #tpu.memory_space<vmem>>, vector<1x32xf32>
    %c48 = arith.constant 48 : index
    %c0_24 = arith.constant 0 : index
    %41 = vector.load %arg1[%c48, %c0_24] : memref<72x64xf32, #tpu.memory_space<vmem>>, vector<1x64xf32>
    %c49 = arith.constant 49 : index
    %c0_25 = arith.constant 0 : index
    %42 = vector.load %arg1[%c49, %c0_25] : memref<72x64xf32, #tpu.memory_space<vmem>>, vector<1x32xf32>
    %cst_26 = arith.constant dense<0.000000e+00> : vector<40xf32>
    %43 = vector.multi_reduction <add>, %4, %cst_26 [1] : vector<40x32xf32> to vector<40xf32>
    %44 = vector.shape_cast %43 : vector<40xf32> to vector<40x1xf32>
    %cst_27 = arith.constant 3.200000e+01 : f32
    %45 = vector.broadcast %cst_27 : f32 to vector<40x1xf32>
    %46 = arith.divf %44, %45 : vector<40x1xf32>
    %47 = vector.broadcast %46 : vector<40x1xf32> to vector<40x32xf32>
    %48 = arith.subf %4, %47 : vector<40x32xf32>
    %49 = arith.mulf %48, %48 : vector<40x32xf32>
    %cst_28 = arith.constant dense<0.000000e+00> : vector<40xf32>
    %50 = vector.multi_reduction <add>, %49, %cst_28 [1] : vector<40x32xf32> to vector<40xf32>
    %51 = vector.shape_cast %50 : vector<40xf32> to vector<40x1xf32>
    %cst_29 = arith.constant 3.200000e+01 : f32
    %52 = vector.broadcast %cst_29 : f32 to vector<40x1xf32>
    %53 = arith.divf %51, %52 : vector<40x1xf32>
    %54 = vector.broadcast %46 : vector<40x1xf32> to vector<40x32xf32>
    %55 = arith.subf %4, %54 : vector<40x32xf32>
    %cst_30 = arith.constant 9.99999974E-6 : f32
    %56 = vector.broadcast %cst_30 : f32 to vector<40x1xf32>
    %57 = arith.addf %53, %56 : vector<40x1xf32>
    %58 = math.rsqrt %57 : vector<40x1xf32>
    %59 = vector.broadcast %58 : vector<40x1xf32> to vector<40x32xf32>
    %60 = arith.mulf %55, %59 : vector<40x32xf32>
    %61 = vector.broadcast %33 : vector<1x32xf32> to vector<40x32xf32>
    %62 = arith.mulf %60, %61 : vector<40x32xf32>
    %63 = vector.broadcast %34 : vector<1x32xf32> to vector<40x32xf32>
    %64 = arith.addf %62, %63 : vector<40x32xf32>
    %c48_31 = arith.constant 48 : index
    %c0_32 = arith.constant 0 : index
    %65 = vector.load %arg2[%c48_31, %c0_32] : memref<528x64xf32, #tpu.memory_space<vmem>>, vector<32x32xf32>
    %cst_33 = arith.constant dense<0.000000e+00> : vector<40x32xf32>
    %66 = tpu.matmul %64, %65, %cst_33 {dimension_numbers = #tpu.dot_dimension_numbers<[1], [0], [0], [1], [0, 0, 1, 1], [], []>} : vector<40x32xf32>, vector<32x32xf32>, vector<40x32xf32> -> vector<40x32xf32>
    %67 = vector.broadcast %35 : vector<1x32xf32> to vector<40x32xf32>
    %68 = arith.addf %66, %67 : vector<40x32xf32>
    %c80 = arith.constant 80 : index
    %c0_34 = arith.constant 0 : index
    %69 = vector.load %arg2[%c80, %c0_34] : memref<528x64xf32, #tpu.memory_space<vmem>>, vector<32x32xf32>
    %cst_35 = arith.constant dense<0.000000e+00> : vector<40x32xf32>
    %70 = tpu.matmul %64, %69, %cst_35 {dimension_numbers = #tpu.dot_dimension_numbers<[1], [0], [0], [1], [0, 0, 1, 1], [], []>} : vector<40x32xf32>, vector<32x32xf32>, vector<40x32xf32> -> vector<40x32xf32>
    %71 = vector.broadcast %36 : vector<1x32xf32> to vector<40x32xf32>
    %72 = arith.addf %70, %71 : vector<40x32xf32>
    %c112 = arith.constant 112 : index
    %c0_36 = arith.constant 0 : index
    %73 = vector.load %arg2[%c112, %c0_36] : memref<528x64xf32, #tpu.memory_space<vmem>>, vector<32x32xf32>
    %cst_37 = arith.constant dense<0.000000e+00> : vector<40x32xf32>
    %74 = tpu.matmul %64, %73, %cst_37 {dimension_numbers = #tpu.dot_dimension_numbers<[1], [0], [0], [1], [0, 0, 1, 1], [], []>} : vector<40x32xf32>, vector<32x32xf32>, vector<40x32xf32> -> vector<40x32xf32>
    %75 = vector.broadcast %37 : vector<1x32xf32> to vector<40x32xf32>
    %76 = arith.addf %74, %75 : vector<40x32xf32>
    %cst_38 = arith.constant 0.000000e+00 : f32
    %77 = vector.broadcast %cst_38 : f32 to vector<40x32xf32>
    %78 = vector.broadcast %29 : vector<1x32xf32> to vector<40x32xf32>
    %79 = arith.mulf %68, %78 : vector<40x32xf32>
    %cst_39 = arith.constant dense<0.000000e+00> : vector<40x40xf32>
    %80 = tpu.matmul %79, %72, %cst_39 {dimension_numbers = #tpu.dot_dimension_numbers<[1], [1], [0], [0], [0, 0, 1, 0], [], []>} : vector<40x32xf32>, vector<40x32xf32>, vector<40x40xf32> -> vector<40x40xf32>
    %cst_40 = arith.constant 0.353553385 : f32
    %81 = vector.broadcast %cst_40 : f32 to vector<40x40xf32>
    %82 = arith.mulf %80, %81 : vector<40x40xf32>
    %83 = arith.addf %82, %28 : vector<40x40xf32>
    %cst_41 = arith.constant dense<0xFF800000> : vector<40xf32>
    %84 = vector.multi_reduction <maximumf>, %83, %cst_41 [1] : vector<40x40xf32> to vector<40xf32>
    %85 = vector.shape_cast %84 : vector<40xf32> to vector<40x1xf32>
    %86 = vector.broadcast %85 : vector<40x1xf32> to vector<40x40xf32>
    %87 = arith.subf %83, %86 : vector<40x40xf32>
    %88 = math.exp %87 : vector<40x40xf32>
    %cst_42 = arith.constant dense<0.000000e+00> : vector<40xf32>
    %89 = vector.multi_reduction <add>, %88, %cst_42 [1] : vector<40x40xf32> to vector<40xf32>
    %90 = vector.shape_cast %89 : vector<40xf32> to vector<40x1xf32>
    %91 = vector.broadcast %90 : vector<40x1xf32> to vector<40x40xf32>
    %92 = arith.divf %88, %91 : vector<40x40xf32>
    %cst_43 = arith.constant dense<0.000000e+00> : vector<40x32xf32>
    %93 = tpu.matmul %92, %76, %cst_43 {dimension_numbers = #tpu.dot_dimension_numbers<[1], [0], [0], [1], [0, 0, 1, 1], [], []>} : vector<40x40xf32>, vector<40x32xf32>, vector<40x32xf32> -> vector<40x32xf32>
    %94 = vector.broadcast %29 : vector<1x32xf32> to vector<40x32xf32>
    %95 = arith.mulf %93, %94 : vector<40x32xf32>
    %96 = arith.addf %77, %95 : vector<40x32xf32>
    %97 = vector.broadcast %30 : vector<1x32xf32> to vector<40x32xf32>
    %98 = arith.mulf %68, %97 : vector<40x32xf32>
    %cst_44 = arith.constant dense<0.000000e+00> : vector<40x40xf32>
    %99 = tpu.matmul %98, %72, %cst_44 {dimension_numbers = #tpu.dot_dimension_numbers<[1], [1], [0], [0], [0, 0, 1, 0], [], []>} : vector<40x32xf32>, vector<40x32xf32>, vector<40x40xf32> -> vector<40x40xf32>
    %cst_45 = arith.constant 0.353553385 : f32
    %100 = vector.broadcast %cst_45 : f32 to vector<40x40xf32>
    %101 = arith.mulf %99, %100 : vector<40x40xf32>
    %102 = arith.addf %101, %28 : vector<40x40xf32>
    %cst_46 = arith.constant dense<0xFF800000> : vector<40xf32>
    %103 = vector.multi_reduction <maximumf>, %102, %cst_46 [1] : vector<40x40xf32> to vector<40xf32>
    %104 = vector.shape_cast %103 : vector<40xf32> to vector<40x1xf32>
    %105 = vector.broadcast %104 : vector<40x1xf32> to vector<40x40xf32>
    %106 = arith.subf %102, %105 : vector<40x40xf32>
    %107 = math.exp %106 : vector<40x40xf32>
    %cst_47 = arith.constant dense<0.000000e+00> : vector<40xf32>
    %108 = vector.multi_reduction <add>, %107, %cst_47 [1] : vector<40x40xf32> to vector<40xf32>
    %109 = vector.shape_cast %108 : vector<40xf32> to vector<40x1xf32>
    %110 = vector.broadcast %109 : vector<40x1xf32> to vector<40x40xf32>
    %111 = arith.divf %107, %110 : vector<40x40xf32>
    %cst_48 = arith.constant dense<0.000000e+00> : vector<40x32xf32>
    %112 = tpu.matmul %111, %76, %cst_48 {dimension_numbers = #tpu.dot_dimension_numbers<[1], [0], [0], [1], [0, 0, 1, 1], [], []>} : vector<40x40xf32>, vector<40x32xf32>, vector<40x32xf32> -> vector<40x32xf32>
    %113 = vector.broadcast %30 : vector<1x32xf32> to vector<40x32xf32>
    %114 = arith.mulf %112, %113 : vector<40x32xf32>
    %115 = arith.addf %96, %114 : vector<40x32xf32>
    %116 = vector.broadcast %31 : vector<1x32xf32> to vector<40x32xf32>
    %117 = arith.mulf %68, %116 : vector<40x32xf32>
    %cst_49 = arith.constant dense<0.000000e+00> : vector<40x40xf32>
    %118 = tpu.matmul %117, %72, %cst_49 {dimension_numbers = #tpu.dot_dimension_numbers<[1], [1], [0], [0], [0, 0, 1, 0], [], []>} : vector<40x32xf32>, vector<40x32xf32>, vector<40x40xf32> -> vector<40x40xf32>
    %cst_50 = arith.constant 0.353553385 : f32
    %119 = vector.broadcast %cst_50 : f32 to vector<40x40xf32>
    %120 = arith.mulf %118, %119 : vector<40x40xf32>
    %121 = arith.addf %120, %28 : vector<40x40xf32>
    %cst_51 = arith.constant dense<0xFF800000> : vector<40xf32>
    %122 = vector.multi_reduction <maximumf>, %121, %cst_51 [1] : vector<40x40xf32> to vector<40xf32>
    %123 = vector.shape_cast %122 : vector<40xf32> to vector<40x1xf32>
    %124 = vector.broadcast %123 : vector<40x1xf32> to vector<40x40xf32>
    %125 = arith.subf %121, %124 : vector<40x40xf32>
    %126 = math.exp %125 : vector<40x40xf32>
    %cst_52 = arith.constant dense<0.000000e+00> : vector<40xf32>
    %127 = vector.multi_reduction <add>, %126, %cst_52 [1] : vector<40x40xf32> to vector<40xf32>
    %128 = vector.shape_cast %127 : vector<40xf32> to vector<40x1xf32>
    %129 = vector.broadcast %128 : vector<40x1xf32> to vector<40x40xf32>
    %130 = arith.divf %126, %129 : vector<40x40xf32>
    %cst_53 = arith.constant dense<0.000000e+00> : vector<40x32xf32>
    %131 = tpu.matmul %130, %76, %cst_53 {dimension_numbers = #tpu.dot_dimension_numbers<[1], [0], [0], [1], [0, 0, 1, 1], [], []>} : vector<40x40xf32>, vector<40x32xf32>, vector<40x32xf32> -> vector<40x32xf32>
    %132 = vector.broadcast %31 : vector<1x32xf32> to vector<40x32xf32>
    %133 = arith.mulf %131, %132 : vector<40x32xf32>
    %134 = arith.addf %115, %133 : vector<40x32xf32>
    %135 = vector.broadcast %32 : vector<1x32xf32> to vector<40x32xf32>
    %136 = arith.mulf %68, %135 : vector<40x32xf32>
    %cst_54 = arith.constant dense<0.000000e+00> : vector<40x40xf32>
    %137 = tpu.matmul %136, %72, %cst_54 {dimension_numbers = #tpu.dot_dimension_numbers<[1], [1], [0], [0], [0, 0, 1, 0], [], []>} : vector<40x32xf32>, vector<40x32xf32>, vector<40x40xf32> -> vector<40x40xf32>
    %cst_55 = arith.constant 0.353553385 : f32
    %138 = vector.broadcast %cst_55 : f32 to vector<40x40xf32>
    %139 = arith.mulf %137, %138 : vector<40x40xf32>
    %140 = arith.addf %139, %28 : vector<40x40xf32>
    %cst_56 = arith.constant dense<0xFF800000> : vector<40xf32>
    %141 = vector.multi_reduction <maximumf>, %140, %cst_56 [1] : vector<40x40xf32> to vector<40xf32>
    %142 = vector.shape_cast %141 : vector<40xf32> to vector<40x1xf32>
    %143 = vector.broadcast %142 : vector<40x1xf32> to vector<40x40xf32>
    %144 = arith.subf %140, %143 : vector<40x40xf32>
    %145 = math.exp %144 : vector<40x40xf32>
    %cst_57 = arith.constant dense<0.000000e+00> : vector<40xf32>
    %146 = vector.multi_reduction <add>, %145, %cst_57 [1] : vector<40x40xf32> to vector<40xf32>
    %147 = vector.shape_cast %146 : vector<40xf32> to vector<40x1xf32>
    %148 = vector.broadcast %147 : vector<40x1xf32> to vector<40x40xf32>
    %149 = arith.divf %145, %148 : vector<40x40xf32>
    %cst_58 = arith.constant dense<0.000000e+00> : vector<40x32xf32>
    %150 = tpu.matmul %149, %76, %cst_58 {dimension_numbers = #tpu.dot_dimension_numbers<[1], [0], [0], [1], [0, 0, 1, 1], [], []>} : vector<40x40xf32>, vector<40x32xf32>, vector<40x32xf32> -> vector<40x32xf32>
    %151 = vector.broadcast %32 : vector<1x32xf32> to vector<40x32xf32>
    %152 = arith.mulf %150, %151 : vector<40x32xf32>
    %153 = arith.addf %134, %152 : vector<40x32xf32>
    %c144 = arith.constant 144 : index
    %c0_59 = arith.constant 0 : index
    %154 = vector.load %arg2[%c144, %c0_59] : memref<528x64xf32, #tpu.memory_space<vmem>>, vector<32x32xf32>
    %cst_60 = arith.constant dense<0.000000e+00> : vector<40x32xf32>
    %155 = tpu.matmul %153, %154, %cst_60 {dimension_numbers = #tpu.dot_dimension_numbers<[1], [0], [0], [1], [0, 0, 1, 1], [], []>} : vector<40x32xf32>, vector<32x32xf32>, vector<40x32xf32> -> vector<40x32xf32>
    %156 = arith.addf %4, %155 : vector<40x32xf32>
    %157 = vector.broadcast %38 : vector<1x32xf32> to vector<40x32xf32>
    %158 = arith.addf %156, %157 : vector<40x32xf32>
    %cst_61 = arith.constant dense<0.000000e+00> : vector<40xf32>
    %159 = vector.multi_reduction <add>, %158, %cst_61 [1] : vector<40x32xf32> to vector<40xf32>
    %160 = vector.shape_cast %159 : vector<40xf32> to vector<40x1xf32>
    %cst_62 = arith.constant 3.200000e+01 : f32
    %161 = vector.broadcast %cst_62 : f32 to vector<40x1xf32>
    %162 = arith.divf %160, %161 : vector<40x1xf32>
    %163 = vector.broadcast %162 : vector<40x1xf32> to vector<40x32xf32>
    %164 = arith.subf %158, %163 : vector<40x32xf32>
    %165 = arith.mulf %164, %164 : vector<40x32xf32>
    %cst_63 = arith.constant dense<0.000000e+00> : vector<40xf32>
    %166 = vector.multi_reduction <add>, %165, %cst_63 [1] : vector<40x32xf32> to vector<40xf32>
    %167 = vector.shape_cast %166 : vector<40xf32> to vector<40x1xf32>
    %cst_64 = arith.constant 3.200000e+01 : f32
    %168 = vector.broadcast %cst_64 : f32 to vector<40x1xf32>
    %169 = arith.divf %167, %168 : vector<40x1xf32>
    %170 = vector.broadcast %162 : vector<40x1xf32> to vector<40x32xf32>
    %171 = arith.subf %158, %170 : vector<40x32xf32>
    %cst_65 = arith.constant 9.99999974E-6 : f32
    %172 = vector.broadcast %cst_65 : f32 to vector<40x1xf32>
    %173 = arith.addf %169, %172 : vector<40x1xf32>
    %174 = math.rsqrt %173 : vector<40x1xf32>
    %175 = vector.broadcast %174 : vector<40x1xf32> to vector<40x32xf32>
    %176 = arith.mulf %171, %175 : vector<40x32xf32>
    %177 = vector.broadcast %39 : vector<1x32xf32> to vector<40x32xf32>
    %178 = arith.mulf %176, %177 : vector<40x32xf32>
    %179 = vector.broadcast %40 : vector<1x32xf32> to vector<40x32xf32>
    %180 = arith.addf %178, %179 : vector<40x32xf32>
    %c176 = arith.constant 176 : index
    %c0_66 = arith.constant 0 : index
    %181 = vector.load %arg2[%c176, %c0_66] : memref<528x64xf32, #tpu.memory_space<vmem>>, vector<32x64xf32>
    %cst_67 = arith.constant dense<0.000000e+00> : vector<40x64xf32>
    %182 = tpu.matmul %180, %181, %cst_67 {dimension_numbers = #tpu.dot_dimension_numbers<[1], [0], [0], [1], [0, 0, 1, 1], [], []>} : vector<40x32xf32>, vector<32x64xf32>, vector<40x64xf32> -> vector<40x64xf32>
    %183 = vector.broadcast %41 : vector<1x64xf32> to vector<40x64xf32>
    %184 = arith.addf %182, %183 : vector<40x64xf32>
    %cst_68 = arith.constant 5.000000e-01 : f32
    %185 = vector.broadcast %cst_68 : f32 to vector<40x64xf32>
    %186 = arith.mulf %185, %184 : vector<40x64xf32>
    %cst_69 = arith.constant 4.471500e-02 : f32
    %187 = vector.broadcast %cst_69 : f32 to vector<40x64xf32>
    %188 = arith.mulf %187, %184 : vector<40x64xf32>
    %189 = arith.mulf %188, %184 : vector<40x64xf32>
    %190 = arith.mulf %189, %184 : vector<40x64xf32>
    %191 = arith.addf %184, %190 : vector<40x64xf32>
    %cst_70 = arith.constant 0.797884583 : f32
    %192 = vector.broadcast %cst_70 : f32 to vector<40x64xf32>
    %193 = arith.mulf %192, %191 : vector<40x64xf32>
    %194 = math.tanh %193 : vector<40x64xf32>
    %cst_71 = arith.constant 1.000000e+00 : f32
    %195 = vector.broadcast %cst_71 : f32 to vector<40x64xf32>
    %196 = arith.addf %195, %194 : vector<40x64xf32>
    %197 = arith.mulf %186, %196 : vector<40x64xf32>
    %c208 = arith.constant 208 : index
    %c0_72 = arith.constant 0 : index
    %198 = vector.load %arg2[%c208, %c0_72] : memref<528x64xf32, #tpu.memory_space<vmem>>, vector<64x32xf32>
    %cst_73 = arith.constant dense<0.000000e+00> : vector<40x32xf32>
    %199 = tpu.matmul %197, %198, %cst_73 {dimension_numbers = #tpu.dot_dimension_numbers<[1], [0], [0], [1], [0, 0, 1, 1], [], []>} : vector<40x64xf32>, vector<64x32xf32>, vector<40x32xf32> -> vector<40x32xf32>
    %200 = arith.addf %158, %199 : vector<40x32xf32>
    %201 = vector.broadcast %42 : vector<1x32xf32> to vector<40x32xf32>
    %202 = arith.addf %200, %201 : vector<40x32xf32>
    %c50 = arith.constant 50 : index
    %c0_74 = arith.constant 0 : index
    %203 = vector.load %arg1[%c50, %c0_74] : memref<72x64xf32, #tpu.memory_space<vmem>>, vector<1x32xf32>
    %c51 = arith.constant 51 : index
    %c0_75 = arith.constant 0 : index
    %204 = vector.load %arg1[%c51, %c0_75] : memref<72x64xf32, #tpu.memory_space<vmem>>, vector<1x32xf32>
    %c52 = arith.constant 52 : index
    %c0_76 = arith.constant 0 : index
    %205 = vector.load %arg1[%c52, %c0_76] : memref<72x64xf32, #tpu.memory_space<vmem>>, vector<1x32xf32>
    %c53 = arith.constant 53 : index
    %c0_77 = arith.constant 0 : index
    %206 = vector.load %arg1[%c53, %c0_77] : memref<72x64xf32, #tpu.memory_space<vmem>>, vector<1x32xf32>
    %c54 = arith.constant 54 : index
    %c0_78 = arith.constant 0 : index
    %207 = vector.load %arg1[%c54, %c0_78] : memref<72x64xf32, #tpu.memory_space<vmem>>, vector<1x32xf32>
    %c55 = arith.constant 55 : index
    %c0_79 = arith.constant 0 : index
    %208 = vector.load %arg1[%c55, %c0_79] : memref<72x64xf32, #tpu.memory_space<vmem>>, vector<1x32xf32>
    %c56 = arith.constant 56 : index
    %c0_80 = arith.constant 0 : index
    %209 = vector.load %arg1[%c56, %c0_80] : memref<72x64xf32, #tpu.memory_space<vmem>>, vector<1x32xf32>
    %c57 = arith.constant 57 : index
    %c0_81 = arith.constant 0 : index
    %210 = vector.load %arg1[%c57, %c0_81] : memref<72x64xf32, #tpu.memory_space<vmem>>, vector<1x32xf32>
    %c58 = arith.constant 58 : index
    %c0_82 = arith.constant 0 : index
    %211 = vector.load %arg1[%c58, %c0_82] : memref<72x64xf32, #tpu.memory_space<vmem>>, vector<1x64xf32>
    %c59 = arith.constant 59 : index
    %c0_83 = arith.constant 0 : index
    %212 = vector.load %arg1[%c59, %c0_83] : memref<72x64xf32, #tpu.memory_space<vmem>>, vector<1x32xf32>
    %cst_84 = arith.constant dense<0.000000e+00> : vector<40xf32>
    %213 = vector.multi_reduction <add>, %202, %cst_84 [1] : vector<40x32xf32> to vector<40xf32>
    %214 = vector.shape_cast %213 : vector<40xf32> to vector<40x1xf32>
    %cst_85 = arith.constant 3.200000e+01 : f32
    %215 = vector.broadcast %cst_85 : f32 to vector<40x1xf32>
    %216 = arith.divf %214, %215 : vector<40x1xf32>
    %217 = vector.broadcast %216 : vector<40x1xf32> to vector<40x32xf32>
    %218 = arith.subf %202, %217 : vector<40x32xf32>
    %219 = arith.mulf %218, %218 : vector<40x32xf32>
    %cst_86 = arith.constant dense<0.000000e+00> : vector<40xf32>
    %220 = vector.multi_reduction <add>, %219, %cst_86 [1] : vector<40x32xf32> to vector<40xf32>
    %221 = vector.shape_cast %220 : vector<40xf32> to vector<40x1xf32>
    %cst_87 = arith.constant 3.200000e+01 : f32
    %222 = vector.broadcast %cst_87 : f32 to vector<40x1xf32>
    %223 = arith.divf %221, %222 : vector<40x1xf32>
    %224 = vector.broadcast %216 : vector<40x1xf32> to vector<40x32xf32>
    %225 = arith.subf %202, %224 : vector<40x32xf32>
    %cst_88 = arith.constant 9.99999974E-6 : f32
    %226 = vector.broadcast %cst_88 : f32 to vector<40x1xf32>
    %227 = arith.addf %223, %226 : vector<40x1xf32>
    %228 = math.rsqrt %227 : vector<40x1xf32>
    %229 = vector.broadcast %228 : vector<40x1xf32> to vector<40x32xf32>
    %230 = arith.mulf %225, %229 : vector<40x32xf32>
    %231 = vector.broadcast %203 : vector<1x32xf32> to vector<40x32xf32>
    %232 = arith.mulf %230, %231 : vector<40x32xf32>
    %233 = vector.broadcast %204 : vector<1x32xf32> to vector<40x32xf32>
    %234 = arith.addf %232, %233 : vector<40x32xf32>
    %c272 = arith.constant 272 : index
    %c0_89 = arith.constant 0 : index
    %235 = vector.load %arg2[%c272, %c0_89] : memref<528x64xf32, #tpu.memory_space<vmem>>, vector<32x32xf32>
    %cst_90 = arith.constant dense<0.000000e+00> : vector<40x32xf32>
    %236 = tpu.matmul %234, %235, %cst_90 {dimension_numbers = #tpu.dot_dimension_numbers<[1], [0], [0], [1], [0, 0, 1, 1], [], []>} : vector<40x32xf32>, vector<32x32xf32>, vector<40x32xf32> -> vector<40x32xf32>
    %237 = vector.broadcast %205 : vector<1x32xf32> to vector<40x32xf32>
    %238 = arith.addf %236, %237 : vector<40x32xf32>
    %c304 = arith.constant 304 : index
    %c0_91 = arith.constant 0 : index
    %239 = vector.load %arg2[%c304, %c0_91] : memref<528x64xf32, #tpu.memory_space<vmem>>, vector<32x32xf32>
    %cst_92 = arith.constant dense<0.000000e+00> : vector<40x32xf32>
    %240 = tpu.matmul %234, %239, %cst_92 {dimension_numbers = #tpu.dot_dimension_numbers<[1], [0], [0], [1], [0, 0, 1, 1], [], []>} : vector<40x32xf32>, vector<32x32xf32>, vector<40x32xf32> -> vector<40x32xf32>
    %241 = vector.broadcast %206 : vector<1x32xf32> to vector<40x32xf32>
    %242 = arith.addf %240, %241 : vector<40x32xf32>
    %c336 = arith.constant 336 : index
    %c0_93 = arith.constant 0 : index
    %243 = vector.load %arg2[%c336, %c0_93] : memref<528x64xf32, #tpu.memory_space<vmem>>, vector<32x32xf32>
    %cst_94 = arith.constant dense<0.000000e+00> : vector<40x32xf32>
    %244 = tpu.matmul %234, %243, %cst_94 {dimension_numbers = #tpu.dot_dimension_numbers<[1], [0], [0], [1], [0, 0, 1, 1], [], []>} : vector<40x32xf32>, vector<32x32xf32>, vector<40x32xf32> -> vector<40x32xf32>
    %245 = vector.broadcast %207 : vector<1x32xf32> to vector<40x32xf32>
    %246 = arith.addf %244, %245 : vector<40x32xf32>
    %cst_95 = arith.constant 0.000000e+00 : f32
    %247 = vector.broadcast %cst_95 : f32 to vector<40x32xf32>
    %248 = vector.broadcast %29 : vector<1x32xf32> to vector<40x32xf32>
    %249 = arith.mulf %238, %248 : vector<40x32xf32>
    %cst_96 = arith.constant dense<0.000000e+00> : vector<40x40xf32>
    %250 = tpu.matmul %249, %242, %cst_96 {dimension_numbers = #tpu.dot_dimension_numbers<[1], [1], [0], [0], [0, 0, 1, 0], [], []>} : vector<40x32xf32>, vector<40x32xf32>, vector<40x40xf32> -> vector<40x40xf32>
    %cst_97 = arith.constant 0.353553385 : f32
    %251 = vector.broadcast %cst_97 : f32 to vector<40x40xf32>
    %252 = arith.mulf %250, %251 : vector<40x40xf32>
    %253 = arith.addf %252, %28 : vector<40x40xf32>
    %cst_98 = arith.constant dense<0xFF800000> : vector<40xf32>
    %254 = vector.multi_reduction <maximumf>, %253, %cst_98 [1] : vector<40x40xf32> to vector<40xf32>
    %255 = vector.shape_cast %254 : vector<40xf32> to vector<40x1xf32>
    %256 = vector.broadcast %255 : vector<40x1xf32> to vector<40x40xf32>
    %257 = arith.subf %253, %256 : vector<40x40xf32>
    %258 = math.exp %257 : vector<40x40xf32>
    %cst_99 = arith.constant dense<0.000000e+00> : vector<40xf32>
    %259 = vector.multi_reduction <add>, %258, %cst_99 [1] : vector<40x40xf32> to vector<40xf32>
    %260 = vector.shape_cast %259 : vector<40xf32> to vector<40x1xf32>
    %261 = vector.broadcast %260 : vector<40x1xf32> to vector<40x40xf32>
    %262 = arith.divf %258, %261 : vector<40x40xf32>
    %cst_100 = arith.constant dense<0.000000e+00> : vector<40x32xf32>
    %263 = tpu.matmul %262, %246, %cst_100 {dimension_numbers = #tpu.dot_dimension_numbers<[1], [0], [0], [1], [0, 0, 1, 1], [], []>} : vector<40x40xf32>, vector<40x32xf32>, vector<40x32xf32> -> vector<40x32xf32>
    %264 = vector.broadcast %29 : vector<1x32xf32> to vector<40x32xf32>
    %265 = arith.mulf %263, %264 : vector<40x32xf32>
    %266 = arith.addf %247, %265 : vector<40x32xf32>
    %267 = vector.broadcast %30 : vector<1x32xf32> to vector<40x32xf32>
    %268 = arith.mulf %238, %267 : vector<40x32xf32>
    %cst_101 = arith.constant dense<0.000000e+00> : vector<40x40xf32>
    %269 = tpu.matmul %268, %242, %cst_101 {dimension_numbers = #tpu.dot_dimension_numbers<[1], [1], [0], [0], [0, 0, 1, 0], [], []>} : vector<40x32xf32>, vector<40x32xf32>, vector<40x40xf32> -> vector<40x40xf32>
    %cst_102 = arith.constant 0.353553385 : f32
    %270 = vector.broadcast %cst_102 : f32 to vector<40x40xf32>
    %271 = arith.mulf %269, %270 : vector<40x40xf32>
    %272 = arith.addf %271, %28 : vector<40x40xf32>
    %cst_103 = arith.constant dense<0xFF800000> : vector<40xf32>
    %273 = vector.multi_reduction <maximumf>, %272, %cst_103 [1] : vector<40x40xf32> to vector<40xf32>
    %274 = vector.shape_cast %273 : vector<40xf32> to vector<40x1xf32>
    %275 = vector.broadcast %274 : vector<40x1xf32> to vector<40x40xf32>
    %276 = arith.subf %272, %275 : vector<40x40xf32>
    %277 = math.exp %276 : vector<40x40xf32>
    %cst_104 = arith.constant dense<0.000000e+00> : vector<40xf32>
    %278 = vector.multi_reduction <add>, %277, %cst_104 [1] : vector<40x40xf32> to vector<40xf32>
    %279 = vector.shape_cast %278 : vector<40xf32> to vector<40x1xf32>
    %280 = vector.broadcast %279 : vector<40x1xf32> to vector<40x40xf32>
    %281 = arith.divf %277, %280 : vector<40x40xf32>
    %cst_105 = arith.constant dense<0.000000e+00> : vector<40x32xf32>
    %282 = tpu.matmul %281, %246, %cst_105 {dimension_numbers = #tpu.dot_dimension_numbers<[1], [0], [0], [1], [0, 0, 1, 1], [], []>} : vector<40x40xf32>, vector<40x32xf32>, vector<40x32xf32> -> vector<40x32xf32>
    %283 = vector.broadcast %30 : vector<1x32xf32> to vector<40x32xf32>
    %284 = arith.mulf %282, %283 : vector<40x32xf32>
    %285 = arith.addf %266, %284 : vector<40x32xf32>
    %286 = vector.broadcast %31 : vector<1x32xf32> to vector<40x32xf32>
    %287 = arith.mulf %238, %286 : vector<40x32xf32>
    %cst_106 = arith.constant dense<0.000000e+00> : vector<40x40xf32>
    %288 = tpu.matmul %287, %242, %cst_106 {dimension_numbers = #tpu.dot_dimension_numbers<[1], [1], [0], [0], [0, 0, 1, 0], [], []>} : vector<40x32xf32>, vector<40x32xf32>, vector<40x40xf32> -> vector<40x40xf32>
    %cst_107 = arith.constant 0.353553385 : f32
    %289 = vector.broadcast %cst_107 : f32 to vector<40x40xf32>
    %290 = arith.mulf %288, %289 : vector<40x40xf32>
    %291 = arith.addf %290, %28 : vector<40x40xf32>
    %cst_108 = arith.constant dense<0xFF800000> : vector<40xf32>
    %292 = vector.multi_reduction <maximumf>, %291, %cst_108 [1] : vector<40x40xf32> to vector<40xf32>
    %293 = vector.shape_cast %292 : vector<40xf32> to vector<40x1xf32>
    %294 = vector.broadcast %293 : vector<40x1xf32> to vector<40x40xf32>
    %295 = arith.subf %291, %294 : vector<40x40xf32>
    %296 = math.exp %295 : vector<40x40xf32>
    %cst_109 = arith.constant dense<0.000000e+00> : vector<40xf32>
    %297 = vector.multi_reduction <add>, %296, %cst_109 [1] : vector<40x40xf32> to vector<40xf32>
    %298 = vector.shape_cast %297 : vector<40xf32> to vector<40x1xf32>
    %299 = vector.broadcast %298 : vector<40x1xf32> to vector<40x40xf32>
    %300 = arith.divf %296, %299 : vector<40x40xf32>
    %cst_110 = arith.constant dense<0.000000e+00> : vector<40x32xf32>
    %301 = tpu.matmul %300, %246, %cst_110 {dimension_numbers = #tpu.dot_dimension_numbers<[1], [0], [0], [1], [0, 0, 1, 1], [], []>} : vector<40x40xf32>, vector<40x32xf32>, vector<40x32xf32> -> vector<40x32xf32>
    %302 = vector.broadcast %31 : vector<1x32xf32> to vector<40x32xf32>
    %303 = arith.mulf %301, %302 : vector<40x32xf32>
    %304 = arith.addf %285, %303 : vector<40x32xf32>
    %305 = vector.broadcast %32 : vector<1x32xf32> to vector<40x32xf32>
    %306 = arith.mulf %238, %305 : vector<40x32xf32>
    %cst_111 = arith.constant dense<0.000000e+00> : vector<40x40xf32>
    %307 = tpu.matmul %306, %242, %cst_111 {dimension_numbers = #tpu.dot_dimension_numbers<[1], [1], [0], [0], [0, 0, 1, 0], [], []>} : vector<40x32xf32>, vector<40x32xf32>, vector<40x40xf32> -> vector<40x40xf32>
    %cst_112 = arith.constant 0.353553385 : f32
    %308 = vector.broadcast %cst_112 : f32 to vector<40x40xf32>
    %309 = arith.mulf %307, %308 : vector<40x40xf32>
    %310 = arith.addf %309, %28 : vector<40x40xf32>
    %cst_113 = arith.constant dense<0xFF800000> : vector<40xf32>
    %311 = vector.multi_reduction <maximumf>, %310, %cst_113 [1] : vector<40x40xf32> to vector<40xf32>
    %312 = vector.shape_cast %311 : vector<40xf32> to vector<40x1xf32>
    %313 = vector.broadcast %312 : vector<40x1xf32> to vector<40x40xf32>
    %314 = arith.subf %310, %313 : vector<40x40xf32>
    %315 = math.exp %314 : vector<40x40xf32>
    %cst_114 = arith.constant dense<0.000000e+00> : vector<40xf32>
    %316 = vector.multi_reduction <add>, %315, %cst_114 [1] : vector<40x40xf32> to vector<40xf32>
    %317 = vector.shape_cast %316 : vector<40xf32> to vector<40x1xf32>
    %318 = vector.broadcast %317 : vector<40x1xf32> to vector<40x40xf32>
    %319 = arith.divf %315, %318 : vector<40x40xf32>
    %cst_115 = arith.constant dense<0.000000e+00> : vector<40x32xf32>
    %320 = tpu.matmul %319, %246, %cst_115 {dimension_numbers = #tpu.dot_dimension_numbers<[1], [0], [0], [1], [0, 0, 1, 1], [], []>} : vector<40x40xf32>, vector<40x32xf32>, vector<40x32xf32> -> vector<40x32xf32>
    %321 = vector.broadcast %32 : vector<1x32xf32> to vector<40x32xf32>
    %322 = arith.mulf %320, %321 : vector<40x32xf32>
    %323 = arith.addf %304, %322 : vector<40x32xf32>
    %c368 = arith.constant 368 : index
    %c0_116 = arith.constant 0 : index
    %324 = vector.load %arg2[%c368, %c0_116] : memref<528x64xf32, #tpu.memory_space<vmem>>, vector<32x32xf32>
    %cst_117 = arith.constant dense<0.000000e+00> : vector<40x32xf32>
    %325 = tpu.matmul %323, %324, %cst_117 {dimension_numbers = #tpu.dot_dimension_numbers<[1], [0], [0], [1], [0, 0, 1, 1], [], []>} : vector<40x32xf32>, vector<32x32xf32>, vector<40x32xf32> -> vector<40x32xf32>
    %326 = arith.addf %202, %325 : vector<40x32xf32>
    %327 = vector.broadcast %208 : vector<1x32xf32> to vector<40x32xf32>
    %328 = arith.addf %326, %327 : vector<40x32xf32>
    %cst_118 = arith.constant dense<0.000000e+00> : vector<40xf32>
    %329 = vector.multi_reduction <add>, %328, %cst_118 [1] : vector<40x32xf32> to vector<40xf32>
    %330 = vector.shape_cast %329 : vector<40xf32> to vector<40x1xf32>
    %cst_119 = arith.constant 3.200000e+01 : f32
    %331 = vector.broadcast %cst_119 : f32 to vector<40x1xf32>
    %332 = arith.divf %330, %331 : vector<40x1xf32>
    %333 = vector.broadcast %332 : vector<40x1xf32> to vector<40x32xf32>
    %334 = arith.subf %328, %333 : vector<40x32xf32>
    %335 = arith.mulf %334, %334 : vector<40x32xf32>
    %cst_120 = arith.constant dense<0.000000e+00> : vector<40xf32>
    %336 = vector.multi_reduction <add>, %335, %cst_120 [1] : vector<40x32xf32> to vector<40xf32>
    %337 = vector.shape_cast %336 : vector<40xf32> to vector<40x1xf32>
    %cst_121 = arith.constant 3.200000e+01 : f32
    %338 = vector.broadcast %cst_121 : f32 to vector<40x1xf32>
    %339 = arith.divf %337, %338 : vector<40x1xf32>
    %340 = vector.broadcast %332 : vector<40x1xf32> to vector<40x32xf32>
    %341 = arith.subf %328, %340 : vector<40x32xf32>
    %cst_122 = arith.constant 9.99999974E-6 : f32
    %342 = vector.broadcast %cst_122 : f32 to vector<40x1xf32>
    %343 = arith.addf %339, %342 : vector<40x1xf32>
    %344 = math.rsqrt %343 : vector<40x1xf32>
    %345 = vector.broadcast %344 : vector<40x1xf32> to vector<40x32xf32>
    %346 = arith.mulf %341, %345 : vector<40x32xf32>
    %347 = vector.broadcast %209 : vector<1x32xf32> to vector<40x32xf32>
    %348 = arith.mulf %346, %347 : vector<40x32xf32>
    %349 = vector.broadcast %210 : vector<1x32xf32> to vector<40x32xf32>
    %350 = arith.addf %348, %349 : vector<40x32xf32>
    %c400 = arith.constant 400 : index
    %c0_123 = arith.constant 0 : index
    %351 = vector.load %arg2[%c400, %c0_123] : memref<528x64xf32, #tpu.memory_space<vmem>>, vector<32x64xf32>
    %cst_124 = arith.constant dense<0.000000e+00> : vector<40x64xf32>
    %352 = tpu.matmul %350, %351, %cst_124 {dimension_numbers = #tpu.dot_dimension_numbers<[1], [0], [0], [1], [0, 0, 1, 1], [], []>} : vector<40x32xf32>, vector<32x64xf32>, vector<40x64xf32> -> vector<40x64xf32>
    %353 = vector.broadcast %211 : vector<1x64xf32> to vector<40x64xf32>
    %354 = arith.addf %352, %353 : vector<40x64xf32>
    %cst_125 = arith.constant 5.000000e-01 : f32
    %355 = vector.broadcast %cst_125 : f32 to vector<40x64xf32>
    %356 = arith.mulf %355, %354 : vector<40x64xf32>
    %cst_126 = arith.constant 4.471500e-02 : f32
    %357 = vector.broadcast %cst_126 : f32 to vector<40x64xf32>
    %358 = arith.mulf %357, %354 : vector<40x64xf32>
    %359 = arith.mulf %358, %354 : vector<40x64xf32>
    %360 = arith.mulf %359, %354 : vector<40x64xf32>
    %361 = arith.addf %354, %360 : vector<40x64xf32>
    %cst_127 = arith.constant 0.797884583 : f32
    %362 = vector.broadcast %cst_127 : f32 to vector<40x64xf32>
    %363 = arith.mulf %362, %361 : vector<40x64xf32>
    %364 = math.tanh %363 : vector<40x64xf32>
    %cst_128 = arith.constant 1.000000e+00 : f32
    %365 = vector.broadcast %cst_128 : f32 to vector<40x64xf32>
    %366 = arith.addf %365, %364 : vector<40x64xf32>
    %367 = arith.mulf %356, %366 : vector<40x64xf32>
    %c432 = arith.constant 432 : index
    %c0_129 = arith.constant 0 : index
    %368 = vector.load %arg2[%c432, %c0_129] : memref<528x64xf32, #tpu.memory_space<vmem>>, vector<64x32xf32>
    %cst_130 = arith.constant dense<0.000000e+00> : vector<40x32xf32>
    %369 = tpu.matmul %367, %368, %cst_130 {dimension_numbers = #tpu.dot_dimension_numbers<[1], [0], [0], [1], [0, 0, 1, 1], [], []>} : vector<40x64xf32>, vector<64x32xf32>, vector<40x32xf32> -> vector<40x32xf32>
    %370 = arith.addf %328, %369 : vector<40x32xf32>
    %371 = vector.broadcast %212 : vector<1x32xf32> to vector<40x32xf32>
    %372 = arith.addf %370, %371 : vector<40x32xf32>
    %373 = vector.extract_strided_slice %372 {offsets = [0, 0], sizes = [8, 32], strides = [1, 1]} : vector<40x32xf32> to vector<8x32xf32>
    %c60 = arith.constant 60 : index
    %c0_131 = arith.constant 0 : index
    %374 = vector.load %arg1[%c60, %c0_131] : memref<72x64xf32, #tpu.memory_space<vmem>>, vector<1x32xf32>
    %c61 = arith.constant 61 : index
    %c0_132 = arith.constant 0 : index
    %375 = vector.load %arg1[%c61, %c0_132] : memref<72x64xf32, #tpu.memory_space<vmem>>, vector<1x32xf32>
    %cst_133 = arith.constant dense<0.000000e+00> : vector<8xf32>
    %376 = vector.multi_reduction <add>, %373, %cst_133 [1] : vector<8x32xf32> to vector<8xf32>
    %377 = vector.shape_cast %376 : vector<8xf32> to vector<8x1xf32>
    %cst_134 = arith.constant 3.200000e+01 : f32
    %378 = vector.broadcast %cst_134 : f32 to vector<8x1xf32>
    %379 = arith.divf %377, %378 : vector<8x1xf32>
    %380 = vector.broadcast %379 : vector<8x1xf32> to vector<8x32xf32>
    %381 = arith.subf %373, %380 : vector<8x32xf32>
    %382 = arith.mulf %381, %381 : vector<8x32xf32>
    %cst_135 = arith.constant dense<0.000000e+00> : vector<8xf32>
    %383 = vector.multi_reduction <add>, %382, %cst_135 [1] : vector<8x32xf32> to vector<8xf32>
    %384 = vector.shape_cast %383 : vector<8xf32> to vector<8x1xf32>
    %cst_136 = arith.constant 3.200000e+01 : f32
    %385 = vector.broadcast %cst_136 : f32 to vector<8x1xf32>
    %386 = arith.divf %384, %385 : vector<8x1xf32>
    %387 = vector.broadcast %379 : vector<8x1xf32> to vector<8x32xf32>
    %388 = arith.subf %373, %387 : vector<8x32xf32>
    %cst_137 = arith.constant 9.99999974E-6 : f32
    %389 = vector.broadcast %cst_137 : f32 to vector<8x1xf32>
    %390 = arith.addf %386, %389 : vector<8x1xf32>
    %391 = math.rsqrt %390 : vector<8x1xf32>
    %392 = vector.broadcast %391 : vector<8x1xf32> to vector<8x32xf32>
    %393 = arith.mulf %388, %392 : vector<8x32xf32>
    %394 = vector.broadcast %374 : vector<1x32xf32> to vector<8x32xf32>
    %395 = arith.mulf %393, %394 : vector<8x32xf32>
    %396 = vector.broadcast %375 : vector<1x32xf32> to vector<8x32xf32>
    %397 = arith.addf %395, %396 : vector<8x32xf32>
    %c496 = arith.constant 496 : index
    %c0_138 = arith.constant 0 : index
    %398 = vector.load %arg2[%c496, %c0_138] : memref<528x64xf32, #tpu.memory_space<vmem>>, vector<32x64xf32>
    %cst_139 = arith.constant dense<0.000000e+00> : vector<8x64xf32>
    %399 = tpu.matmul %397, %398, %cst_139 {dimension_numbers = #tpu.dot_dimension_numbers<[1], [0], [0], [1], [0, 0, 1, 1], [], []>} : vector<8x32xf32>, vector<32x64xf32>, vector<8x64xf32> -> vector<8x64xf32>
    %c62 = arith.constant 62 : index
    %c0_140 = arith.constant 0 : index
    %400 = vector.load %arg1[%c62, %c0_140] : memref<72x64xf32, #tpu.memory_space<vmem>>, vector<1x64xf32>
    %401 = vector.broadcast %400 : vector<1x64xf32> to vector<8x64xf32>
    %402 = arith.addf %399, %401 : vector<8x64xf32>
    %c0_141 = arith.constant 0 : index
    %c0_142 = arith.constant 0 : index
    %403 = vector.load %arg3[%c0_141, %c0_142] : memref<8x64xf32, #tpu.memory_space<vmem>>, vector<8x64xf32>
    tpu.vector_store %arg3[%c0_141, %c0_142], %402 {strides = array<i32>} : memref<8x64xf32, #tpu.memory_space<vmem>>, vector<8x64xf32>,
    return
  }
}

</mosaic_0001>

<bundles_post_ra>
// kernel: vit_forward.1
= control target key start
LH: loop header
LB: loop body
LE: loop exit
PB: predicated region body
PF: predicated region fallthrough
CT: control target
= control target key end

     0   :  { %v5936_v0 = vmov 0.0   ;;  %vm5937_vm0 = vmmov 0   ;;  %vm30_vm1 = vcmask 392192   ;;  %vm204_vm2 = vcmask 261120   ;;  %s7848_s2 = inlined_call_operand.vmem [shape: f32[528,64], index: 2, kind: input, shape index: {}]   ;;  %s7849_s0 = inlined_call_operand.vmem [shape: f32[40,48], index: 0, kind: input, shape index: {}]   ;;  %s7850_s1 = inlined_call_operand.vmem [shape: f32[72,64], index: 1, kind: input, shape index: {}]   ;;  %s7851_s3 = inlined_call_operand.vmem [shape: f32[8,64], index: 3, kind: output, shape index: {}]  }
   0x1   :  { %4961 = vmatprep.subr.mxu0 %v5936_v0  ;;  %v24_v1 = vld [vmem:[%s7848_s2 + $0x28] sm:$0xff]  ;;  %v23_v2 = vld [vmem:[%s7848_s2 + $0x20] sm:$0xff]  ;;  %4973 = vmatprep.mubr.msk.f32.mxu0 %vm5937_vm0, %v5936_v0  ;;  %v22_v3 = vld [vmem:[%s7848_s2 + $0x18] sm:$0xff]  ;;  %vm737_vm9 = vcmask 326656   ;;  %vm2162_vm13 = vcmask 523264  }
   0x2   :  { %4962 = vmatpush3.msra.mxu0 %v24_v1  ;;  %4988 = vmatprep.subr.mxu1 %v5936_v0  ;;  %v21_v4 = vld [vmem:[%s7848_s2 + $0x10] sm:$0xff]  ;;  %v20_v5 = vld [vmem:[%s7848_s2 + $0x8] sm:$0xff]  ;;  %v19_v6 = vld [vmem:[%s7848_s2] sm:$0xff] }
   0x3   :  { %4963 = vmatprep.subr.mxu0 %v5936_v0  ;;  %4996 = vmatprep.mubr.msk.f32.mxu1 %vm5937_vm0, %v5936_v0  ;;  %v14_v7 = vld [vmem:[%s7849_s0] sm:$0xff]  ;;  %v15_v8 = vld [vmem:[%s7849_s0 + $0x8] sm:$0xff]  ;;  %v16_v9 = vld [vmem:[%s7849_s0 + $0x10] sm:$0xff] }
   0x4   :  { %4964 = vmatpush3.msra.mxu0 %v23_v2  ;;  %v17_v10 = vld [vmem:[%s7849_s0 + $0x18] sm:$0xff]  ;;  %v18_v11 = vld [vmem:[%s7849_s0 + $0x20] sm:$0xff]  ;;  %v26_v16 = vld [vmem:[%s7850_s1 + $0x8] sm:$0xff] }
   0x5   :  { %4965 = vmatprep.subr.mxu0 %v5936_v0  ;;  %v25_v12 = vld [vmem:[%s7850_s1] sm:$0xff]  ;;  %v27_v21 = vld [vmem:[%s7850_s1 + $0x10] sm:$0xff]  ;;  %v28_v26 = vld [vmem:[%s7850_s1 + $0x18] sm:$0xff] }
   0x6   :  { %4966 = vmatpush3.msra.mxu0 %v22_v3  ;;  %v29_v31 = vld [vmem:[%s7850_s1 + $0x20] sm:$0xff]  ;;  %v292_v62 = vld [vmem:[%s7848_s2 + $0x48] sm:$0xff]  ;;  %v290_v3 = vld [vmem:[%s7848_s2 + $0x38] sm:$0xff] }
   0x7   :  { %4967 = vmatprep.subr.mxu0 %v5936_v0  ;;  %v503_v63 = vld [vmem:[%s7848_s2 + $0x88] sm:$0xff]  ;;  %4989 = vmatpush3.msra.mxu1 %v292_v62  ;;  %v291_v1 = vld [vmem:[%s7848_s2 + $0x40] sm:$0xff] }
   0x8   :  { %4968 = vmatpush3.msra.mxu0 %v21_v4  ;;  %4990 = vmatprep.subr.mxu1 %v5936_v0  ;;  %v502_v2 = vld [vmem:[%s7848_s2 + $0x80] sm:$0xff]  ;;  %v501_v4 = vld [vmem:[%s7848_s2 + $0x78] sm:$0xff] }
   0x9   :  { %4969 = vmatprep.subr.mxu0 %v5936_v0  ;;  %4991 = vmatpush3.msra.mxu1 %v291_v1 }
   0xa   :  { %4970 = vmatpush3.msra.mxu0 %v20_v5  ;;  %4992 = vmatprep.subr.mxu1 %v5936_v0  ;;  %v289_v5 = vld [vmem:[%s7848_s2 + $0x30] sm:$0xff] }
   0xb   :  { %4971 = vmatprep.subr.mxu0 %v5936_v0  ;;  %4993 = vmatpush3.msra.mxu1 %v290_v3 }
   0xc   :  { %4972 = vmatpush3.msra.mxu0 %v19_v6  ;;  %v500_v6 = vld [vmem:[%s7848_s2 + $0x70] sm:$0xff]  ;;  %4994 = vmatprep.subr.mxu1 %v5936_v0 }
   0xd   :  { %4974 = vmatmul.mubr.msk.f32.vlgmr.msra.gmra.mxu0 %vm30_vm1, %v14_v7  ;;  %5034 = vmatprep.subr.mxu0 %v5936_v0 }
   0xe   :  { %4976 = vmatprep.mubr.msk.f32.mxu0 %vm5937_vm0, %v5936_v0  ;;  %5035 = vmatpush3.msra.mxu0 %v503_v63 }
   0xf   :  { %5036 = vmatprep.subr.mxu0 %v5936_v0  ;;  %4995 = vmatpush3.msra.mxu1 %v289_v5 }
  0x10   :  { %5037 = vmatpush3.msra.mxu0 %v502_v2  ;;  %5011 = vmatprep.subr.mxu1 %v5936_v0 }
  0x11   :  { %4977 = vmatmul.mubr.msk.f32.gmra.mxu0 %vm30_vm1, %v15_v8  ;;  %5038 = vmatprep.subr.mxu0 %v5936_v0 }
  0x12   :  { %4979 = vmatprep.mubr.msk.f32.mxu0 %vm5937_vm0, %v5936_v0  ;;  %5039 = vmatpush3.msra.mxu0 %v501_v4 }
  0x13   :  { %5040 = vmatprep.subr.mxu0 %v5936_v0 }
  0x14   :  { %5041 = vmatpush3.msra.mxu0 %v500_v6  ;;  %v4475_v6 = vld [vmem:[%s7850_s1 + $0x2c] ss:$0 sm:$0xff] }
  0x15   :  { %4980 = vmatmul.mubr.msk.f32.gmra.mxu0 %vm30_vm1, %v16_v9  ;;  %5082 = vmatprep.subr.mxu0 %v5936_v0 }
  0x16   :  { %4982 = vmatprep.mubr.msk.f32.mxu0 %vm5937_vm0, %v5936_v0 }
  0x19   :  { %4983 = vmatmul.mubr.msk.f32.gmra.mxu0 %vm30_vm1, %v17_v10 }
  0x1a   :  { %4985 = vmatprep.mubr.msk.f32.mxu0 %vm5937_vm0, %v5936_v0 }
  0x1d   :  { %4986 = vmatmul.mubr.msk.f32.gmra.mxu0 %vm30_vm1, %v18_v11 }
  0x1e   :  { %5042 = vmatprep.mubr.msk.f32.mxu0 %vm5937_vm0, %v5936_v0 }
  0xcd   :  { %v112_v13 = vpop.f32.mrf.mxu0 }
  0xce   :  { %v6022_v14 = vadd.f32 %v112_v13, %v25_v12 }
  0xcf   :  { %v4975_v15 = vpop.f32.mrf.mxu0 }
  0xd0   :  { %v205_v17 = vsel %vm204_vm2, %v6022_v14, 0.0 }
  0xd1   :  { %206 = vadd.xlane.f32.xlu0 %v205_v17  ;;  %v117_v18 = vpop.f32.mrf.mxu0 }
  0xd2   :  { %v6029_v19 = vadd.f32 %v117_v18, %v26_v16 }
  0xd3   :  { %v4978_v20 = vpop.f32.mrf.mxu0 }
  0xd4   :  { %v208_v22 = vsel %vm204_vm2, %v6029_v19, 0.0 }
  0xd5   :  { %209 = vadd.xlane.f32.xlu0 %v208_v22  ;;  %v122_v23 = vpop.f32.mrf.mxu0 }
  0xd6   :  { %v6036_v24 = vadd.f32 %v122_v23, %v27_v21 }
  0xd7   :  { %v4981_v25 = vpop.f32.mrf.mxu0 }
  0xd8   :  { %v211_v27 = vsel %vm204_vm2, %v6036_v24, 0.0  ;;  %v4461_v25 = vld [vmem:[%s7850_s1 + $0x28] ss:$0 sm:$0xff] }
  0xd9   :  { %212 = vadd.xlane.f32.xlu1 %v211_v27  ;;  %v127_v28 = vpop.f32.mrf.mxu0 }
  0xda   :  { %v6043_v29 = vadd.f32 %v127_v28, %v28_v26  ;;  %v4462_v28 = vld [vmem:[%s7850_s1 + $0x29] ss:$0 sm:$0xff] }
  0xdb   :  { %v4984_v30 = vpop.f32.mrf.mxu0 }
  0xdc   :  { %v214_v32 = vsel %vm204_vm2, %v6043_v29, 0.0 }
  0xdd   :  { %215 = vadd.xlane.f32.xlu1 %v214_v32  ;;  %v132_v33 = vpop.f32.mrf.mxu0 }
  0xde   :  { %v6050_v34 = vadd.f32 %v132_v33, %v29_v31  ;;  %v405_v33 = vld [vmem:[%s7848_s2 + $0x68] sm:$0xff] }
  0xdf   :  { %v4987_v35 = vpop.f32.mrf.mxu0 }
  0xe0   :  { %v217_v36 = vsel %vm204_vm2, %v6050_v34, 0.0 }
  0xe1   :  { %218 = vadd.xlane.f32.xlu0 %v217_v36 }
 0x15a   :  { %v207_v37 = vpop.xlane.xlu0 %206 }
 0x15b   :  { %v221_v38 = vmul.f32 0.03125, %v207_v37  ;;  %v404_v37 = vld [vmem:[%s7848_s2 + $0x60] sm:$0xff] }
 0x15d   :  { %v6055_v39 = vsub.f32 %v6022_v14, %v221_v38 }
 0x15e   :  { %v210_v40 = vpop.xlane.xlu0 %209 }
 0x15f   :  { %v222_v41 = vmul.f32 0.03125, %v210_v40  ;;  %v231_v42 = vmul.f32 %v6055_v39, %v6055_v39 }
 0x161   :  { %v6060_v43 = vsub.f32 %v6029_v19, %v222_v41  ;;  %v236_v44 = vsel %vm204_vm2, %v231_v42, 0.0  ;;  %v403_v42 = vld [vmem:[%s7848_s2 + $0x58] sm:$0xff] }
 0x162   :  { %v213_v45 = vpop.xlane.xlu1 %212  ;;  %237 = vadd.xlane.f32.xlu1 %v236_v44 }
 0x163   :  { %v223_v46 = vmul.f32 0.03125, %v213_v45  ;;  %v232_v47 = vmul.f32 %v6060_v43, %v6060_v43 }
 0x165   :  { %v6066_v48 = vsub.f32 %v6036_v24, %v223_v46  ;;  %v239_v49 = vsel %vm204_vm2, %v232_v47, 0.0  ;;  %v402_v47 = vld [vmem:[%s7848_s2 + $0x50] sm:$0xff] }
 0x166   :  { %v216_v50 = vpop.xlane.xlu1 %215  ;;  %240 = vadd.xlane.f32.xlu0 %v239_v49 }
 0x167   :  { %v224_v51 = vmul.f32 0.03125, %v216_v50  ;;  %v233_v52 = vmul.f32 %v6066_v48, %v6066_v48 }
 0x169   :  { %v6072_v53 = vsub.f32 %v6043_v29, %v224_v51  ;;  %v242_v54 = vsel %vm204_vm2, %v233_v52, 0.0 }
 0x16a   :  { %243 = vadd.xlane.f32.xlu1 %v242_v54  ;;  %v219_v55 = vpop.xlane.xlu0 %218 }
 0x16b   :  { %v225_v56 = vmul.f32 0.03125, %v219_v55  ;;  %v234_v57 = vmul.f32 %v6072_v53, %v6072_v53 }
 0x16d   :  { %v6078_v58 = vsub.f32 %v6050_v34, %v225_v56  ;;  %v245_v59 = vsel %vm204_vm2, %v234_v57, 0.0 }
 0x16e   :  { %246 = vadd.xlane.f32.xlu0 %v245_v59 }
 0x16f   :  { %v235_v60 = vmul.f32 %v6078_v58, %v6078_v58 }
 0x171   :  { %v248_v61 = vsel %vm204_vm2, %v235_v60, 0.0 }
 0x172   :  { %249 = vadd.xlane.f32.xlu1 %v248_v61 }
 0x1eb   :  { %v238_v7 = vpop.xlane.xlu1 %237 }
 0x1ec   :  { %v251_v8 = vmul.f32 0.03125, %v238_v7 }
 0x1ee   :  { %v256_v9 = vadd.f32 1e-05, %v251_v8 }
 0x1ef   :  { %v241_v10 = vpop.xlane.xlu0 %240 }
 0x1f0   :  { %5702 = vrsqrt.f32 %v256_v9  ;;  %v252_v11 = vmul.f32 0.03125, %v241_v10 }
 0x1f2   :  { %v257_v12 = vadd.f32 1e-05, %v252_v11 }
 0x1f3   :  { %v244_v13 = vpop.xlane.xlu1 %243 }
 0x1f4   :  { %5704 = vrsqrt.f32 %v257_v12  ;;  %v253_v15 = vmul.f32 0.03125, %v244_v13 }
 0x1f6   :  { %v258_v16 = vadd.f32 1e-05, %v253_v15 }
 0x1f7   :  { %v247_v17 = vpop.xlane.xlu0 %246 }
 0x1f8   :  { %5706 = vrsqrt.f32 %v258_v16  ;;  %v254_v18 = vmul.f32 0.03125, %v247_v17 }
 0x1fa   :  { %v259_v20 = vadd.f32 1e-05, %v254_v18 }
 0x1fb   :  { %v250_v21 = vpop.xlane.xlu1 %249 }
 0x1fc   :  { %5708 = vrsqrt.f32 %v259_v20  ;;  %v255_v22 = vmul.f32 0.03125, %v250_v21 }
 0x1fd   :  { %v5703_v23 = vpop.eup %5702 }
 0x1fe   :  { %v260_v26 = vadd.f32 1e-05, %v255_v22  ;;  %v266_v27 = vmul.f32 %v5703_v23, %v6055_v39 }
 0x200   :  { %5710 = vrsqrt.f32 %v260_v26  ;;  %v275_v30 = vmul.f32 %v4461_v25, %v266_v27  ;;  %v4469_v27 = vld [vmem:[%s7850_s1 + $0x2b] ss:$0 sm:$0xff] }
 0x201   :  { %v5705_v31 = vpop.eup %5704 }
 0x202   :  { %v284_v32 = vadd.f32 %v4462_v28, %v275_v30  ;;  %v267_v35 = vmul.f32 %v5705_v31, %v6060_v43 }
 0x204   :  { %4997 = vmatmul.mubr.msk.f32.vlgmr.msra.gmra.mxu1 %vm204_vm2, %v284_v32  ;;  %5043 = vmatmul.mubr.msk.f32.vlgmr.msra.gmra.mxu0 %vm204_vm2, %v284_v32  ;;  %v276_v36 = vmul.f32 %v4461_v25, %v267_v35  ;;  %v4463_v35 = vld [vmem:[%s7850_s1 + $0x2a] ss:$0 sm:$0xff] }
 0x205   :  { %v5707_v38 = vpop.eup %5706  ;;  %5012 = vmatpush3.msra.mxu1 %v405_v33  ;;  %4999 = vmatprep.mubr.msk.f32.mxu1 %vm5937_vm0, %v5936_v0 }
 0x206   :  { %5045 = vmatprep.mubr.msk.f32.mxu0 %vm5937_vm0, %v5936_v0  ;;  %v285_v39 = vadd.f32 %v4462_v28, %v276_v36  ;;  %5013 = vmatprep.subr.mxu1 %v5936_v0  ;;  %v268_v40 = vmul.f32 %v5707_v38, %v6066_v48  ;;  %v4481_v38 = vld [vmem:[%s7850_s1 + $0x3f] ss:$0 sm:$0xff] }
 0x207   :  { %5014 = vmatpush3.msra.mxu1 %v404_v37 }
 0x208   :  { %5000 = vmatmul.mubr.msk.f32.gmra.mxu1 %vm204_vm2, %v285_v39  ;;  %5046 = vmatmul.mubr.msk.f32.gmra.mxu0 %vm204_vm2, %v285_v39  ;;  %v277_v41 = vmul.f32 %v4461_v25, %v268_v40 }
 0x209   :  { %v5709_v43 = vpop.eup %5708  ;;  %5002 = vmatprep.mubr.msk.f32.mxu1 %vm5937_vm0, %v5936_v0  ;;  %5048 = vmatprep.mubr.msk.f32.mxu0 %vm5937_vm0, %v5936_v0 }
 0x20a   :  { %v286_v44 = vadd.f32 %v4462_v28, %v277_v41  ;;  %5015 = vmatprep.subr.mxu1 %v5936_v0  ;;  %v269_v45 = vmul.f32 %v5709_v43, %v6072_v53 }
 0x20b   :  { %5016 = vmatpush3.msra.mxu1 %v403_v42 }
 0x20c   :  { %5003 = vmatmul.mubr.msk.f32.gmra.mxu1 %vm204_vm2, %v286_v44  ;;  %5049 = vmatmul.mubr.msk.f32.gmra.mxu0 %vm204_vm2, %v286_v44  ;;  %v278_v46 = vmul.f32 %v4461_v25, %v269_v45 }
 0x20d   :  { %v5711_v48 = vpop.eup %5710  ;;  %5005 = vmatprep.mubr.msk.f32.mxu1 %vm5937_vm0, %v5936_v0  ;;  %5051 = vmatprep.mubr.msk.f32.mxu0 %vm5937_vm0, %v5936_v0 }
 0x20e   :  { %v287_v49 = vadd.f32 %v4462_v28, %v278_v46  ;;  %5017 = vmatprep.subr.mxu1 %v5936_v0  ;;  %v270_v50 = vmul.f32 %v5711_v48, %v6078_v58 }
 0x20f   :  { %5018 = vmatpush3.msra.mxu1 %v402_v47 }
 0x210   :  { %5006 = vmatmul.mubr.msk.f32.gmra.mxu1 %vm204_vm2, %v287_v49  ;;  %5052 = vmatmul.mubr.msk.f32.gmra.mxu0 %vm204_vm2, %v287_v49  ;;  %v279_v51 = vmul.f32 %v4461_v25, %v270_v50 }
 0x211   :  { %5008 = vmatprep.mubr.msk.f32.mxu1 %vm5937_vm0, %v5936_v0  ;;  %5054 = vmatprep.mubr.msk.f32.mxu0 %vm5937_vm0, %v5936_v0 }
 0x212   :  { %v288_v52 = vadd.f32 %v4462_v28, %v279_v51  ;;  %5057 = vmatprep.subr.mxu1 %v5936_v0 }
 0x214   :  { %5009 = vmatmul.mubr.msk.f32.gmra.mxu1 %vm204_vm2, %v288_v52  ;;  %5055 = vmatmul.mubr.msk.f32.gmra.mxu0 %vm204_vm2, %v288_v52 }
 0x215   :  { %5019 = vmatprep.mubr.msk.f32.mxu1 %vm5937_vm0, %v5936_v0  ;;  %5092 = vmatprep.mubr.msk.f32.mxu0 %vm5937_vm0, %v5936_v0 }
 0x218   :  { %5020 = vmatmul.mubr.msk.f32.vlgmr.msra.gmra.mxu1 %vm204_vm2, %v284_v32 }
 0x219   :  { %5022 = vmatprep.mubr.msk.f32.mxu1 %vm5937_vm0, %v5936_v0 }
 0x21c   :  { %5023 = vmatmul.mubr.msk.f32.gmra.mxu1 %vm204_vm2, %v285_v39 }
 0x21d   :  { %5025 = vmatprep.mubr.msk.f32.mxu1 %vm5937_vm0, %v5936_v0 }
 0x220   :  { %5026 = vmatmul.mubr.msk.f32.gmra.mxu1 %vm204_vm2, %v286_v44 }
 0x221   :  { %5028 = vmatprep.mubr.msk.f32.mxu1 %vm5937_vm0, %v5936_v0 }
 0x224   :  { %5029 = vmatmul.mubr.msk.f32.gmra.mxu1 %vm204_vm2, %v287_v49  ;;  %v4497_v49 = vld [vmem:[%s7850_s1 + $0x40] ss:$0 sm:$0xff] }
 0x225   :  { %5031 = vmatprep.mubr.msk.f32.mxu1 %vm5937_vm0, %v5936_v0 }
 0x228   :  { %5032 = vmatmul.mubr.msk.f32.gmra.mxu1 %vm204_vm2, %v288_v52 }
 0x229   :  { %5067 = vmatprep.mubr.msk.f32.mxu1 %vm5937_vm0, %v5936_v0 }
 0x2c4   :  { %v378_v53 = vpop.f32.mrf.mxu1  ;;  %v574_v54 = vpop.f32.mrf.mxu0 }
 0x2c5   :  { %v6209_v20 = vadd.f32 %v4475_v6, %v574_v54  ;;  %v6240_v37 = vadd.f32 %v4463_v35, %v378_v53 }
 0x2c6   :  { %v4998_v55 = vpop.f32.mrf.mxu1  ;;  %v5044_v56 = vpop.f32.mrf.mxu0 }
 0x2c7   :  { %v602_v40 = vmul.f32 %v4481_v38, %v6240_v37  ;;  %v912_v50 = vmul.f32 %v4497_v49, %v6240_v37  ;;  %v4513_v55 = vld [vmem:[%s7850_s1 + $0x41] ss:$0 sm:$0xff] }
 0x2c8   :  { %v383_v57 = vpop.f32.mrf.mxu1  ;;  %v579_v58 = vpop.f32.mrf.mxu0  ;;  %v1206_v56 = vmul.f32 %v4513_v55, %v6240_v37 }
 0x2c9   :  { %v6205_v17 = vadd.f32 %v4475_v6, %v579_v58  ;;  %v6251_v41 = vadd.f32 %v4463_v35, %v383_v57 }
 0x2ca   :  { %v5001_v59 = vpop.f32.mrf.mxu1  ;;  %v5047_v60 = vpop.f32.mrf.mxu0 }
 0x2cb   :  { %v603_v43 = vmul.f32 %v4481_v38, %v6251_v41  ;;  %v913_v51 = vmul.f32 %v4497_v49, %v6251_v41  ;;  %v1207_v57 = vmul.f32 %v4513_v55, %v6251_v41 }
 0x2cc   :  { %v388_v61 = vpop.f32.mrf.mxu1  ;;  %v584_v62 = vpop.f32.mrf.mxu0 }
 0x2cd   :  { %v6201_v15 = vadd.f32 %v4475_v6, %v584_v62  ;;  %v6259_v42 = vadd.f32 %v4463_v35, %v388_v61  ;;  %v4529_v61 = vld [vmem:[%s7850_s1 + $0x42] ss:$0 sm:$0xff] }
 0x2ce   :  { %v5004_v63 = vpop.f32.mrf.mxu1  ;;  %v5050_v1 = vpop.f32.mrf.mxu0  ;;  %v1500_v62 = vmul.f32 %v4529_v61, %v6240_v37 }
 0x2cf   :  { %v604_v45 = vmul.f32 %v4481_v38, %v6259_v42  ;;  %v914_v52 = vmul.f32 %v4497_v49, %v6259_v42  ;;  %v1208_v58 = vmul.f32 %v4513_v55, %v6259_v42  ;;  %v1501_v63 = vmul.f32 %v4529_v61, %v6251_v41 }
 0x2d0   :  { %v6188_v2 = vpop.f32.mrf.mxu1  ;;  %v589_v3 = vpop.f32.mrf.mxu0  ;;  %v1502_v1 = vmul.f32 %v4529_v61, %v6259_v42 }
 0x2d1   :  { %v6197_v12 = vadd.f32 %v4475_v6, %v589_v3  ;;  %v6269_v44 = vadd.f32 %v4463_v35, %v6188_v2 }
 0x2d2   :  { %v5007_v4 = vpop.f32.mrf.mxu1  ;;  %v5053_v5 = vpop.f32.mrf.mxu0 }
 0x2d3   :  { %v605_v47 = vmul.f32 %v4481_v38, %v6269_v44  ;;  %v915_v53 = vmul.f32 %v4497_v49, %v6269_v44  ;;  %v1209_v59 = vmul.f32 %v4513_v55, %v6269_v44  ;;  %v1503_v2 = vmul.f32 %v4529_v61, %v6269_v44 }
 0x2d4   :  { %v6193_v7 = vpop.f32.mrf.mxu1  ;;  %v594_v8 = vpop.f32.mrf.mxu0  ;;  %v136_v4 = vlaneseq }
 0x2d5   :  { %v6195_v9 = vadd.f32 %v4475_v6, %v594_v8  ;;  %v6279_v46 = vadd.f32 %v4463_v35, %v6193_v7 }
 0x2d6   :  { %v5010_v10 = vpop.f32.mrf.mxu1  ;;  %v5056_v11 = vpop.f32.mrf.mxu0  ;;  %v137_v5 = vshrl.u32 %v136_v4, 7  ;;  %v143_v6 = vand.u32 127, %v136_v4 }
 0x2d7   :  { %5083 = vmatpush3.msra.mxu0 %v6195_v9  ;;  %v606_v48 = vmul.f32 %v4481_v38, %v6279_v46  ;;  %v916_v54 = vmul.f32 %v4497_v49, %v6279_v46  ;;  %v1210_v60 = vmul.f32 %v4513_v55, %v6279_v46  ;;  %v1504_v3 = vmul.f32 %v4529_v61, %v6279_v46 }
 0x2d8   :  { %v476_v13 = vpop.f32.mrf.mxu1  ;;  %5084 = vmatprep.subr.mxu0 %v5936_v0  ;;  %v4455_v7 = vadd.s32 4294967294, %v137_v5  ;;  %v4460_v8 = vadd.s32 4294967294, %v143_v6  ;;  %vm144_vm5 = vcmp.lt.s32.totalorder %v137_v5, 2  ;;  %vm174_vm6 = vcmp.lt.s32.totalorder %v143_v6, 2 }
 0x2d9   :  { %5085 = vmatpush3.msra.mxu0 %v6197_v12  ;;  %v6246_v39 = vadd.f32 %v4469_v27, %v476_v13  ;;  %v138_v13 = vadd.s32 8, %v137_v5  ;;  %v141_v37 = vadd.s32 32, %v137_v5 }
 0x2da   :  { %v5021_v16 = vpop.f32.mrf.mxu1  ;;  %5086 = vmatprep.subr.mxu0 %v5936_v0  ;;  %vm154_vm3 = vcmp.gt.s32.totalorder %v4455_v7, 0  ;;  %vm176_vm4 = vcmp.gt.s32.totalorder %v4460_v8, 0 }
 0x2db   :  { %5087 = vmatpush3.msra.mxu0 %v6201_v15  ;;  %v155_v10 = vsel %vm154_vm3, %v4455_v7, 0  ;;  %v177_v11 = vsel %vm176_vm4, %v4460_v8, 0 }
 0x2dc   :  { %v481_v18 = vpop.f32.mrf.mxu1  ;;  %5088 = vmatprep.subr.mxu0 %v5936_v0  ;;  %v164_v16 = vshra.s32 %v155_v10, 4 }
 0x2dd   :  { %5089 = vmatpush3.msra.mxu0 %v6205_v17  ;;  %v6236_v36 = vadd.f32 %v4469_v27, %v481_v18  ;;  %v178_v18 = vshra.s32 %v177_v11, 4 }
 0x2de   :  { %v5024_v21 = vpop.f32.mrf.mxu1  ;;  %5090 = vmatprep.subr.mxu0 %v5936_v0 }
 0x2df   :  { %5091 = vmatpush3.msra.mxu0 %v6209_v20  ;;  %v139_v21 = vadd.s32 16, %v137_v5 }
 0x2e0   :  { %v486_v22 = vpop.f32.mrf.mxu1  ;;  %5132 = vmatprep.subr.mxu0 %v5936_v0 }
 0x2e1   :  { %v6228_v33 = vadd.f32 %v4469_v27, %v486_v22  ;;  %v4456_v22 = vadd.s32 4294967294, %v138_v13 }
 0x2e2   :  { %v5027_v23 = vpop.f32.mrf.mxu1 }
 0x2e3   :  { %v169_v23 = vsel %vm144_vm5, %v137_v5, %v164_v16 }
 0x2e4   :  { %v491_v25 = vpop.f32.mrf.mxu1 }
 0x2e5   :  { %v6223_v32 = vadd.f32 %v4469_v27, %v491_v25  ;;  %v179_v25 = vsel %vm174_vm6, %v143_v6, %v178_v18 }
 0x2e6   :  { %v5030_v26 = vpop.f32.mrf.mxu1  ;;  %vm180_vm7 = vcmp.eq.s32.totalorder %v169_v23, %v179_v25 }
 0x2e7   :  { %v4457_v26 = vadd.s32 4294967294, %v139_v21 }
 0x2e8   :  { %v496_v28 = vpop.f32.mrf.mxu1 }
 0x2e9   :  { %v6218_v30 = vadd.f32 %v4469_v27, %v496_v28  ;;  %v165_v27 = vshra.s32 %v4456_v22, 4  ;;  %v140_v28 = vadd.s32 24, %v137_v5 }
 0x2ea   :  { %v5033_v31 = vpop.f32.mrf.mxu1 }
 0x2eb   :  { %5058 = vmatpush3.xpose.msk.msra.mxu1 %vm204_vm2, %v6218_v30  ;;  %v5938_v31 = vmov -1e+30   ;;  %vm181_vm8 = vcmp.eq.s32.totalorder %v165_v27, %v179_v25 }
 0x2ec   :  { %5059 = vmatprep.subr.mxu1 %v5936_v0  ;;  %v6400_v41 = vsel %vm181_vm8, 0.0, %v5938_v31 }
 0x2ef   :  { %5060 = vmatpush3.xpose.msk.msra.mxu1 %vm204_vm2, %v6223_v32 }
 0x2f0   :  { %5061 = vmatprep.subr.mxu1 %v5936_v0 }
 0x2f3   :  { %5062 = vmatpush3.xpose.msk.msra.mxu1 %vm204_vm2, %v6228_v33 }
 0x2f4   :  { %5063 = vmatprep.subr.mxu1 %v5936_v0 }
 0x2f7   :  { %5064 = vmatpush3.xpose.msk.msra.mxu1 %vm204_vm2, %v6236_v36 }
 0x2f8   :  { %5065 = vmatprep.subr.mxu1 %v5936_v0 }
 0x2fb   :  { %5066 = vmatpush3.xpose.msk.msra.mxu1 %vm204_vm2, %v6246_v39 }
 0x2fc   :  { %5107 = vmatprep.subr.mxu1 %v5936_v0 }
 0x2fe   :  { %5068 = vmatmul.mubr.msk.f32.vlgmr.msra.gmra.mxu1 %vm204_vm2, %v602_v40 }
 0x2ff   :  { %5108 = vmatpush3.xpose.msk.msra.mxu1 %vm204_vm2, %v6218_v30  ;;  %5070 = vmatprep.mubr.msk.f32.mxu1 %vm5937_vm0, %v5936_v0 }
 0x300   :  { %5109 = vmatprep.subr.mxu1 %v5936_v0 }
 0x302   :  { %5071 = vmatmul.mubr.msk.f32.gmra.mxu1 %vm204_vm2, %v603_v43 }
 0x303   :  { %5110 = vmatpush3.xpose.msk.msra.mxu1 %vm204_vm2, %v6223_v32  ;;  %5073 = vmatprep.mubr.msk.f32.mxu1 %vm5937_vm0, %v5936_v0 }
 0x304   :  { %5111 = vmatprep.subr.mxu1 %v5936_v0 }
 0x306   :  { %5074 = vmatmul.mubr.msk.f32.gmra.mxu1 %vm204_vm2, %v604_v45  ;;  %v4459_v45 = vadd.s32 4294967294, %v141_v37 }
 0x307   :  { %5112 = vmatpush3.xpose.msk.msra.mxu1 %vm204_vm2, %v6228_v33  ;;  %5076 = vmatprep.mubr.msk.f32.mxu1 %vm5937_vm0, %v5936_v0 }
 0x308   :  { %5113 = vmatprep.subr.mxu1 %v5936_v0 }
 0x30a   :  { %5077 = vmatmul.mubr.msk.f32.gmra.mxu1 %vm204_vm2, %v605_v47 }
 0x30b   :  { %5114 = vmatpush3.xpose.msk.msra.mxu1 %vm204_vm2, %v6236_v36  ;;  %5079 = vmatprep.mubr.msk.f32.mxu1 %vm5937_vm0, %v5936_v0 }
 0x30c   :  { %5115 = vmatprep.subr.mxu1 %v5936_v0 }
 0x30e   :  { %5080 = vmatmul.mubr.msk.f32.gmra.mxu1 %vm204_vm2, %v606_v48 }
 0x30f   :  { %5116 = vmatpush3.xpose.msk.msra.mxu1 %vm204_vm2, %v6246_v39  ;;  %5117 = vmatprep.mubr.msk.f32.mxu1 %vm5937_vm0, %v5936_v0 }
 0x310   :  { %5157 = vmatprep.subr.mxu1 %v5936_v0 }
 0x312   :  { %5118 = vmatmul.mubr.msk.f32.vlgmr.msra.gmra.mxu1 %vm204_vm2, %v912_v50 }
 0x313   :  { %5158 = vmatpush3.xpose.msk.msra.mxu1 %vm204_vm2, %v6218_v30  ;;  %5120 = vmatprep.mubr.msk.f32.mxu1 %vm5937_vm0, %v5936_v0 }
 0x314   :  { %5159 = vmatprep.subr.mxu1 %v5936_v0 }
 0x316   :  { %5121 = vmatmul.mubr.msk.f32.gmra.mxu1 %vm204_vm2, %v913_v51 }
 0x317   :  { %5160 = vmatpush3.xpose.msk.msra.mxu1 %vm204_vm2, %v6223_v32  ;;  %5123 = vmatprep.mubr.msk.f32.mxu1 %vm5937_vm0, %v5936_v0 }
 0x318   :  { %5161 = vmatprep.subr.mxu1 %v5936_v0 }
 0x31a   :  { %5124 = vmatmul.mubr.msk.f32.gmra.mxu1 %vm204_vm2, %v914_v52  ;;  %v168_v52 = vshra.s32 %v4459_v45, 4 }
 0x31b   :  { %5162 = vmatpush3.xpose.msk.msra.mxu1 %vm204_vm2, %v6228_v33  ;;  %5126 = vmatprep.mubr.msk.f32.mxu1 %vm5937_vm0, %v5936_v0 }
 0x31c   :  { %5163 = vmatprep.subr.mxu1 %v5936_v0  ;;  %vm184_vm12 = vcmp.eq.s32.totalorder %v168_v52, %v179_v25 }
 0x31e   :  { %5127 = vmatmul.mubr.msk.f32.gmra.mxu1 %vm204_vm2, %v915_v53 }
 0x31f   :  { %5164 = vmatpush3.xpose.msk.msra.mxu1 %vm204_vm2, %v6236_v36  ;;  %5129 = vmatprep.mubr.msk.f32.mxu1 %vm5937_vm0, %v5936_v0 }
 0x320   :  { %5165 = vmatprep.subr.mxu1 %v5936_v0 }
 0x322   :  { %5130 = vmatmul.mubr.msk.f32.gmra.mxu1 %vm204_vm2, %v916_v54 }
 0x323   :  { %5166 = vmatpush3.xpose.msk.msra.mxu1 %vm204_vm2, %v6246_v39  ;;  %5167 = vmatprep.mubr.msk.f32.mxu1 %vm5937_vm0, %v5936_v0 }
 0x324   :  { %5207 = vmatprep.subr.mxu1 %v5936_v0 }
 0x326   :  { %5168 = vmatmul.mubr.msk.f32.vlgmr.msra.gmra.mxu1 %vm204_vm2, %v1206_v56 }
 0x327   :  { %5208 = vmatpush3.xpose.msk.msra.mxu1 %vm204_vm2, %v6218_v30  ;;  %5170 = vmatprep.mubr.msk.f32.mxu1 %vm5937_vm0, %v5936_v0 }
 0x328   :  { %5209 = vmatprep.subr.mxu1 %v5936_v0 }
 0x32a   :  { %5171 = vmatmul.mubr.msk.f32.gmra.mxu1 %vm204_vm2, %v1207_v57 }
 0x32b   :  { %5210 = vmatpush3.xpose.msk.msra.mxu1 %vm204_vm2, %v6223_v32  ;;  %5173 = vmatprep.mubr.msk.f32.mxu1 %vm5937_vm0, %v5936_v0  ;;  %v6395_v32 = vsel %vm180_vm7, 0.0, %v5938_v31 }
 0x32c   :  { %5211 = vmatprep.subr.mxu1 %v5936_v0 }
 0x32e   :  { %5174 = vmatmul.mubr.msk.f32.gmra.mxu1 %vm204_vm2, %v1208_v58 }
 0x32f   :  { %5212 = vmatpush3.xpose.msk.msra.mxu1 %vm204_vm2, %v6228_v33  ;;  %5176 = vmatprep.mubr.msk.f32.mxu1 %vm5937_vm0, %v5936_v0  ;;  %v166_v33 = vshra.s32 %v4457_v26, 4 }
 0x330   :  { %5213 = vmatprep.subr.mxu1 %v5936_v0 }
 0x331   :  { %vm182_vm10 = vcmp.eq.s32.totalorder %v166_v33, %v179_v25 }
 0x332   :  { %5177 = vmatmul.mubr.msk.f32.gmra.mxu1 %vm204_vm2, %v1209_v59  ;;  %v6407_v49 = vsel %vm182_vm10, 0.0, %v5938_v31 }
 0x333   :  { %5214 = vmatpush3.xpose.msk.msra.mxu1 %vm204_vm2, %v6236_v36  ;;  %5179 = vmatprep.mubr.msk.f32.mxu1 %vm5937_vm0, %v5936_v0  ;;  %v4458_v36 = vadd.s32 4294967294, %v140_v28 }
 0x334   :  { %5215 = vmatprep.subr.mxu1 %v5936_v0 }
 0x335   :  { %v167_v44 = vshra.s32 %v4458_v36, 4 }
 0x336   :  { %5180 = vmatmul.mubr.msk.f32.gmra.mxu1 %vm204_vm2, %v1210_v60 }
 0x337   :  { %5216 = vmatpush3.xpose.msk.msra.mxu1 %vm204_vm2, %v6246_v39  ;;  %5217 = vmatprep.mubr.msk.f32.mxu1 %vm5937_vm0, %v5936_v0  ;;  %vm183_vm11 = vcmp.eq.s32.totalorder %v167_v44, %v179_v25 }
 0x338   :  { %5691 = vmatprep.subr.mxu1 %v5936_v0  ;;  %v6414_v56 = vsel %vm183_vm11, 0.0, %v5938_v31 }
 0x33a   :  { %5218 = vmatmul.mubr.msk.f32.vlgmr.msra.gmra.mxu1 %vm204_vm2, %v1500_v62  ;;  %v6421_v62 = vsel %vm184_vm12, 0.0, %v5938_v31 }
 0x33b   :  { %5220 = vmatprep.mubr.msk.f32.mxu1 %vm5937_vm0, %v5936_v0 }
 0x33e   :  { %5221 = vmatmul.mubr.msk.f32.gmra.mxu1 %vm204_vm2, %v1501_v63 }
 0x33f   :  { %5223 = vmatprep.mubr.msk.f32.mxu1 %vm5937_vm0, %v5936_v0 }
 0x342   :  { %5224 = vmatmul.mubr.msk.f32.gmra.mxu1 %vm204_vm2, %v1502_v1 }
 0x343   :  { %5226 = vmatprep.mubr.msk.f32.mxu1 %vm5937_vm0, %v5936_v0 }
 0x346   :  { %5227 = vmatmul.mubr.msk.f32.gmra.mxu1 %vm204_vm2, %v1503_v2 }
 0x347   :  { %5229 = vmatprep.mubr.msk.f32.mxu1 %vm5937_vm0, %v5936_v0 }
 0x34a   :  { %5230 = vmatmul.mubr.msk.f32.gmra.mxu1 %vm204_vm2, %v1504_v3 }
 0x34b   :  { %5268 = vmatprep.mubr.msk.f32.mxu1 %vm5937_vm0, %v5936_v0 }
 0x3be   :  { %v703_v30 = vpop.f32.mrf.mxu1 }
 0x3bf   :  { %v727_v35 = vmul.f32 0.35355338, %v703_v30 }
 0x3c0   :  { %v5069_v38 = vpop.f32.mrf.mxu1 }
 0x3c1   :  { %v6398_v39 = vadd.f32 %v727_v35, %v6395_v32 }
 0x3c2   :  { %v708_v40 = vpop.f32.mrf.mxu1 }
 0x3c3   :  { %v728_v42 = vmul.f32 0.35355338, %v708_v40  ;;  %v738_v43 = vsel %vm737_vm9, %v6398_v39, -inf }
 0x3c4   :  { %739 = vmax.xlane.f32.xlu0 %v738_v43  ;;  %v5072_v46 = vpop.f32.mrf.mxu1 }
 0x3c5   :  { %v6405_v47 = vadd.f32 %v728_v42, %v6400_v41 }
 0x3c6   :  { %v713_v48 = vpop.f32.mrf.mxu1 }
 0x3c7   :  { %v729_v50 = vmul.f32 0.35355338, %v713_v48  ;;  %v741_v51 = vsel %vm737_vm9, %v6405_v47, -inf }
 0x3c8   :  { %742 = vmax.xlane.f32.xlu1 %v741_v51  ;;  %v5075_v53 = vpop.f32.mrf.mxu1 }
 0x3c9   :  { %v6412_v54 = vadd.f32 %v729_v50, %v6407_v49 }
 0x3ca   :  { %v718_v55 = vpop.f32.mrf.mxu1 }
 0x3cb   :  { %v730_v57 = vmul.f32 0.35355338, %v718_v55  ;;  %v744_v58 = vsel %vm737_vm9, %v6412_v54, -inf }
 0x3cc   :  { %745 = vmax.xlane.f32.xlu0 %v744_v58  ;;  %v5078_v59 = vpop.f32.mrf.mxu1 }
 0x3cd   :  { %v6419_v60 = vadd.f32 %v730_v57, %v6414_v56 }
 0x3ce   :  { %v723_v61 = vpop.f32.mrf.mxu1 }
 0x3cf   :  { %v731_v63 = vmul.f32 0.35355338, %v723_v61  ;;  %v747_v1 = vsel %vm737_vm9, %v6419_v60, -inf }
 0x3d0   :  { %748 = vmax.xlane.f32.xlu1 %v747_v1  ;;  %v5081_v2 = vpop.f32.mrf.mxu1 }
 0x3d1   :  { %v6426_v3 = vadd.f32 %v731_v63, %v6421_v62 }
 0x3d2   :  { %v998_v4 = vpop.f32.mrf.mxu1 }
 0x3d3   :  { %v1022_v5 = vmul.f32 0.35355338, %v998_v4  ;;  %v750_v6 = vsel %vm737_vm9, %v6426_v3, -inf }
 0x3d4   :  { %751 = vmax.xlane.f32.xlu0 %v750_v6  ;;  %v5119_v7 = vpop.f32.mrf.mxu1 }
 0x3d5   :  { %v6431_v8 = vadd.f32 %v1022_v5, %v6395_v32 }
 0x3d6   :  { %v1003_v10 = vpop.f32.mrf.mxu1 }
 0x3d7   :  { %v1023_v11 = vmul.f32 0.35355338, %v1003_v10  ;;  %v1032_v13 = vsel %vm737_vm9, %v6431_v8, -inf }
 0x3d8   :  { %1033 = vmax.xlane.f32.xlu1 %v1032_v13  ;;  %v5122_v16 = vpop.f32.mrf.mxu1 }
 0x3d9   :  { %v6436_v18 = vadd.f32 %v1023_v11, %v6400_v41 }
 0x3da   :  { %v1008_v21 = vpop.f32.mrf.mxu1 }
 0x3db   :  { %v1024_v22 = vmul.f32 0.35355338, %v1008_v21  ;;  %v1035_v23 = vsel %vm737_vm9, %v6436_v18, -inf }
 0x3dc   :  { %1036 = vmax.xlane.f32.xlu0 %v1035_v23  ;;  %v5125_v25 = vpop.f32.mrf.mxu1 }
 0x3dd   :  { %v6441_v26 = vadd.f32 %v1024_v22, %v6407_v49 }
 0x3de   :  { %v1013_v27 = vpop.f32.mrf.mxu1 }
 0x3df   :  { %v1025_v28 = vmul.f32 0.35355338, %v1013_v27  ;;  %v1038_v30 = vsel %vm737_vm9, %v6441_v26, -inf }
 0x3e0   :  { %1039 = vmax.xlane.f32.xlu1 %v1038_v30  ;;  %v5128_v31 = vpop.f32.mrf.mxu1 }
 0x3e1   :  { %v6446_v33 = vadd.f32 %v1025_v28, %v6414_v56 }
 0x3e2   :  { %v1018_v35 = vpop.f32.mrf.mxu1 }
 0x3e3   :  { %v1026_v36 = vmul.f32 0.35355338, %v1018_v35  ;;  %v1041_v37 = vsel %vm737_vm9, %v6446_v33, -inf }
 0x3e4   :  { %1042 = vmax.xlane.f32.xlu0 %v1041_v37  ;;  %v5131_v38 = vpop.f32.mrf.mxu1 }
 0x3e5   :  { %v6451_v40 = vadd.f32 %v1026_v36, %v6421_v62 }
 0x3e6   :  { %v1292_v42 = vpop.f32.mrf.mxu1 }
 0x3e7   :  { %v1316_v43 = vmul.f32 0.35355338, %v1292_v42  ;;  %v1044_v44 = vsel %vm737_vm9, %v6451_v40, -inf }
 0x3e8   :  { %1045 = vmax.xlane.f32.xlu1 %v1044_v44  ;;  %v5169_v45 = vpop.f32.mrf.mxu1 }
 0x3e9   :  { %v6456_v46 = vadd.f32 %v1316_v43, %v6395_v32 }
 0x3ea   :  { %v1297_v48 = vpop.f32.mrf.mxu1 }
 0x3eb   :  { %v1317_v50 = vmul.f32 0.35355338, %v1297_v48  ;;  %v1326_v51 = vsel %vm737_vm9, %v6456_v46, -inf }
 0x3ec   :  { %1327 = vmax.xlane.f32.xlu0 %v1326_v51  ;;  %v5172_v52 = vpop.f32.mrf.mxu1 }
 0x3ed   :  { %v6461_v53 = vadd.f32 %v1317_v50, %v6400_v41 }
 0x3ee   :  { %v1302_v55 = vpop.f32.mrf.mxu1 }
 0x3ef   :  { %v1318_v57 = vmul.f32 0.35355338, %v1302_v55  ;;  %v1329_v58 = vsel %vm737_vm9, %v6461_v53, -inf }
 0x3f0   :  { %1330 = vmax.xlane.f32.xlu1 %v1329_v58  ;;  %v5175_v59 = vpop.f32.mrf.mxu1 }
 0x3f1   :  { %v6466_v61 = vadd.f32 %v1318_v57, %v6407_v49 }
 0x3f2   :  { %v1307_v63 = vpop.f32.mrf.mxu1 }
 0x3f3   :  { %v1319_v1 = vmul.f32 0.35355338, %v1307_v63  ;;  %v1332_v2 = vsel %vm737_vm9, %v6466_v61, -inf }
 0x3f4   :  { %1333 = vmax.xlane.f32.xlu0 %v1332_v2  ;;  %v5178_v4 = vpop.f32.mrf.mxu1 }
 0x3f5   :  { %v6471_v5 = vadd.f32 %v1319_v1, %v6414_v56 }
 0x3f6   :  { %v1312_v6 = vpop.f32.mrf.mxu1 }
 0x3f7   :  { %v1320_v7 = vmul.f32 0.35355338, %v1312_v6  ;;  %v1335_v10 = vsel %vm737_vm9, %v6471_v5, -inf }
 0x3f8   :  { %1336 = vmax.xlane.f32.xlu1 %v1335_v10  ;;  %v5181_v11 = vpop.f32.mrf.mxu1 }
 0x3f9   :  { %v6476_v13 = vadd.f32 %v1320_v7, %v6421_v62 }
 0x3fa   :  { %v1586_v16 = vpop.f32.mrf.mxu1 }
 0x3fb   :  { %v1610_v21 = vmul.f32 0.35355338, %v1586_v16  ;;  %v1338_v22 = vsel %vm737_vm9, %v6476_v13, -inf }
 0x3fc   :  { %1339 = vmax.xlane.f32.xlu0 %v1338_v22  ;;  %v5219_v23 = vpop.f32.mrf.mxu1 }
 0x3fd   :  { %v6481_v25 = vadd.f32 %v1610_v21, %v6395_v32 }
 0x3fe   :  { %v1591_v27 = vpop.f32.mrf.mxu1 }
 0x3ff   :  { %v1611_v28 = vmul.f32 0.35355338, %v1591_v27  ;;  %v1620_v30 = vsel %vm737_vm9, %v6481_v25, -inf }
 0x400   :  { %1621 = vmax.xlane.f32.xlu1 %v1620_v30  ;;  %v5222_v31 = vpop.f32.mrf.mxu1 }
 0x401   :  { %v6486_v35 = vadd.f32 %v1611_v28, %v6400_v41 }
 0x402   :  { %v1596_v36 = vpop.f32.mrf.mxu1 }
 0x403   :  { %v1612_v37 = vmul.f32 0.35355338, %v1596_v36  ;;  %v1623_v38 = vsel %vm737_vm9, %v6486_v35, -inf }
 0x404   :  { %1624 = vmax.xlane.f32.xlu0 %v1623_v38  ;;  %v5225_v42 = vpop.f32.mrf.mxu1 }
 0x405   :  { %v6491_v43 = vadd.f32 %v1612_v37, %v6407_v49 }
 0x406   :  { %v1601_v44 = vpop.f32.mrf.mxu1 }
 0x407   :  { %v1613_v45 = vmul.f32 0.35355338, %v1601_v44  ;;  %v1626_v48 = vsel %vm737_vm9, %v6491_v43, -inf }
 0x408   :  { %1627 = vmax.xlane.f32.xlu1 %v1626_v48  ;;  %v5228_v50 = vpop.f32.mrf.mxu1 }
 0x409   :  { %v6496_v51 = vadd.f32 %v1613_v45, %v6414_v56 }
 0x40a   :  { %v1606_v52 = vpop.f32.mrf.mxu1 }
 0x40b   :  { %v1614_v55 = vmul.f32 0.35355338, %v1606_v52  ;;  %v1629_v57 = vsel %vm737_vm9, %v6496_v51, -inf }
 0x40c   :  { %1630 = vmax.xlane.f32.xlu0 %v1629_v57  ;;  %v5231_v58 = vpop.f32.mrf.mxu1 }
 0x40d   :  { %v6501_v59 = vadd.f32 %v1614_v55, %v6421_v62 }
 0x40f   :  { %v1632_v63 = vsel %vm737_vm9, %v6501_v59, -inf }
 0x410   :  { %1633 = vmax.xlane.f32.xlu1 %v1632_v63 }
 0x44d   :  { %v740_v1 = vpop.xlane.xlu0 %739 }
 0x44e   :  { %v753_v2 = vsub.f32 %v6398_v39, %v740_v1 }
 0x450   :  { %v758_v4 = vmul.f32 1.442695, %v753_v2 }
 0x451   :  { %v743_v6 = vpop.xlane.xlu1 %742 }
 0x452   :  { %5712 = vpow2.f32 %v758_v4  ;;  %v754_v7 = vsub.f32 %v6405_v47, %v743_v6 }
 0x454   :  { %v760_v10 = vmul.f32 1.442695, %v754_v7 }
 0x455   :  { %v746_v11 = vpop.xlane.xlu0 %745 }
 0x456   :  { %5714 = vpow2.f32 %v760_v10  ;;  %v755_v16 = vsub.f32 %v6412_v54, %v746_v11 }
 0x458   :  { %v762_v21 = vmul.f32 1.442695, %v755_v16 }
 0x459   :  { %v749_v22 = vpop.xlane.xlu1 %748 }
 0x45a   :  { %5716 = vpow2.f32 %v762_v21  ;;  %v756_v23 = vsub.f32 %v6419_v60, %v749_v22 }
 0x45c   :  { %v764_v27 = vmul.f32 1.442695, %v756_v23 }
 0x45d   :  { %v752_v28 = vpop.xlane.xlu0 %751 }
 0x45e   :  { %5718 = vpow2.f32 %v764_v27  ;;  %v757_v39 = vsub.f32 %v6426_v3, %v752_v28 }
 0x45f   :  { %v6510_v30 = vpop.eup %5712 }
 0x460   :  { %v766_v31 = vmul.f32 1.442695, %v757_v39  ;;  %v768_v47 = vsel %vm737_vm9, %v6510_v30, 0.0 }
 0x461   :  { %v1034_v36 = vpop.xlane.xlu1 %1033  ;;  %769 = vadd.xlane.f32.xlu0 %v768_v47 }
 0x462   :  { %5720 = vpow2.f32 %v766_v31  ;;  %v1047_v54 = vsub.f32 %v6431_v8, %v1034_v36 }
 0x463   :  { %v6515_v37 = vpop.eup %5714 }
 0x464   :  { %v1052_v38 = vmul.f32 1.442695, %v1047_v54  ;;  %v771_v60 = vsel %vm737_vm9, %v6515_v37, 0.0 }
 0x465   :  { %v1037_v42 = vpop.xlane.xlu0 %1036  ;;  %772 = vadd.xlane.f32.xlu1 %v771_v60 }
 0x466   :  { %5722 = vpow2.f32 %v1052_v38  ;;  %v1048_v3 = vsub.f32 %v6436_v18, %v1037_v42 }
 0x467   :  { %v6520_v44 = vpop.eup %5716 }
 0x468   :  { %v1054_v45 = vmul.f32 1.442695, %v1048_v3  ;;  %v774_v48 = vsel %vm737_vm9, %v6520_v44, 0.0 }
 0x469   :  { %v1040_v50 = vpop.xlane.xlu1 %1039  ;;  %775 = vadd.xlane.f32.xlu0 %v774_v48 }
 0x46a   :  { %5724 = vpow2.f32 %v1054_v45  ;;  %v1049_v8 = vsub.f32 %v6441_v26, %v1040_v50 }
 0x46b   :  { %v6525_v52 = vpop.eup %5718 }
 0x46c   :  { %v1056_v55 = vmul.f32 1.442695, %v1049_v8  ;;  %v777_v57 = vsel %vm737_vm9, %v6525_v52, 0.0 }
 0x46d   :  { %v1043_v58 = vpop.xlane.xlu0 %1042  ;;  %778 = vadd.xlane.f32.xlu1 %v777_v57 }
 0x46e   :  { %5726 = vpow2.f32 %v1056_v55  ;;  %v1050_v18 = vsub.f32 %v6446_v33, %v1043_v58 }
 0x46f   :  { %v6530_v63 = vpop.eup %5720 }
 0x470   :  { %v1058_v1 = vmul.f32 1.442695, %v1050_v18  ;;  %v780_v2 = vsel %vm737_vm9, %v6530_v63, 0.0 }
 0x471   :  { %v1046_v4 = vpop.xlane.xlu1 %1045  ;;  %781 = vadd.xlane.f32.xlu0 %v780_v2 }
 0x472   :  { %5728 = vpow2.f32 %v1058_v1  ;;  %v1051_v26 = vsub.f32 %v6451_v40, %v1046_v4 }
 0x473   :  { %v6535_v6 = vpop.eup %5722 }
 0x474   :  { %v1060_v7 = vmul.f32 1.442695, %v1051_v26  ;;  %v1062_v10 = vsel %vm737_vm9, %v6535_v6, 0.0 }
 0x475   :  { %v1328_v11 = vpop.xlane.xlu0 %1327  ;;  %1063 = vadd.xlane.f32.xlu1 %v1062_v10 }
 0x476   :  { %5730 = vpow2.f32 %v1060_v7  ;;  %v1341_v33 = vsub.f32 %v6456_v46, %v1328_v11 }
 0x477   :  { %v6540_v16 = vpop.eup %5724 }
 0x478   :  { %v1346_v21 = vmul.f32 1.442695, %v1341_v33  ;;  %v1065_v22 = vsel %vm737_vm9, %v6540_v16, 0.0 }
 0x479   :  { %v1331_v23 = vpop.xlane.xlu1 %1330  ;;  %1066 = vadd.xlane.f32.xlu0 %v1065_v22 }
 0x47a   :  { %5732 = vpow2.f32 %v1346_v21  ;;  %v1342_v40 = vsub.f32 %v6461_v53, %v1331_v23 }
 0x47b   :  { %v6545_v27 = vpop.eup %5726 }
 0x47c   :  { %v1348_v28 = vmul.f32 1.442695, %v1342_v40  ;;  %v1068_v39 = vsel %vm737_vm9, %v6545_v27, 0.0 }
 0x47d   :  { %v1334_v31 = vpop.xlane.xlu0 %1333  ;;  %1069 = vadd.xlane.f32.xlu1 %v1068_v39 }
 0x47e   :  { %5734 = vpow2.f32 %v1348_v28  ;;  %v1343_v46 = vsub.f32 %v6466_v61, %v1334_v31 }
 0x47f   :  { %v6550_v47 = vpop.eup %5728 }
 0x480   :  { %v1350_v36 = vmul.f32 1.442695, %v1343_v46  ;;  %v1071_v54 = vsel %vm737_vm9, %v6550_v47, 0.0 }
 0x481   :  { %v1337_v38 = vpop.xlane.xlu1 %1336  ;;  %1072 = vadd.xlane.f32.xlu0 %v1071_v54 }
 0x482   :  { %5736 = vpow2.f32 %v1350_v36  ;;  %v1344_v53 = vsub.f32 %v6471_v5, %v1337_v38 }
 0x483   :  { %v6555_v60 = vpop.eup %5730 }
 0x484   :  { %v1352_v42 = vmul.f32 1.442695, %v1344_v53  ;;  %v1074_v3 = vsel %vm737_vm9, %v6555_v60, 0.0 }
 0x485   :  { %v1340_v45 = vpop.xlane.xlu0 %1339  ;;  %1075 = vadd.xlane.f32.xlu1 %v1074_v3 }
 0x486   :  { %5738 = vpow2.f32 %v1352_v42  ;;  %v1345_v61 = vsub.f32 %v6476_v13, %v1340_v45 }
 0x487   :  { %v6560_v48 = vpop.eup %5732 }
 0x488   :  { %v1354_v50 = vmul.f32 1.442695, %v1345_v61  ;;  %v1356_v8 = vsel %vm737_vm9, %v6560_v48, 0.0 }
 0x489   :  { %v1622_v55 = vpop.xlane.xlu1 %1621  ;;  %1357 = vadd.xlane.f32.xlu0 %v1356_v8 }
 0x48a   :  { %5740 = vpow2.f32 %v1354_v50  ;;  %v1635_v5 = vsub.f32 %v6481_v25, %v1622_v55 }
 0x48b   :  { %v6565_v57 = vpop.eup %5734 }
 0x48c   :  { %v1640_v58 = vmul.f32 1.442695, %v1635_v5  ;;  %v1359_v18 = vsel %vm737_vm9, %v6565_v57, 0.0 }
 0x48d   :  { %v1625_v1 = vpop.xlane.xlu0 %1624  ;;  %1360 = vadd.xlane.f32.xlu1 %v1359_v18 }
 0x48e   :  { %5742 = vpow2.f32 %v1640_v58  ;;  %v1636_v13 = vsub.f32 %v6486_v35, %v1625_v1 }
 0x48f   :  { %v6570_v2 = vpop.eup %5736 }
 0x490   :  { %v1642_v4 = vmul.f32 1.442695, %v1636_v13  ;;  %v1362_v26 = vsel %vm737_vm9, %v6570_v2, 0.0 }
 0x491   :  { %v1628_v7 = vpop.xlane.xlu1 %1627  ;;  %1363 = vadd.xlane.f32.xlu0 %v1362_v26 }
 0x492   :  { %5744 = vpow2.f32 %v1642_v4  ;;  %v1637_v25 = vsub.f32 %v6491_v43, %v1628_v7 }
 0x493   :  { %v6575_v10 = vpop.eup %5738 }
 0x494   :  { %v1644_v11 = vmul.f32 1.442695, %v1637_v25  ;;  %v1365_v33 = vsel %vm737_vm9, %v6575_v10, 0.0 }
 0x495   :  { %v1631_v21 = vpop.xlane.xlu0 %1630  ;;  %1366 = vadd.xlane.f32.xlu1 %v1365_v33 }
 0x496   :  { %5746 = vpow2.f32 %v1644_v11  ;;  %v1638_v35 = vsub.f32 %v6496_v51, %v1631_v21 }
 0x497   :  { %v6580_v22 = vpop.eup %5740 }
 0x498   :  { %v1646_v23 = vmul.f32 1.442695, %v1638_v35  ;;  %v1368_v40 = vsel %vm737_vm9, %v6580_v22, 0.0 }
 0x499   :  { %1369 = vadd.xlane.f32.xlu0 %v1368_v40  ;;  %v1634_v28 = vpop.xlane.xlu1 %1633 }
 0x49a   :  { %5748 = vpow2.f32 %v1646_v23  ;;  %v1639_v43 = vsub.f32 %v6501_v59, %v1634_v28 }
 0x49b   :  { %v6585_v39 = vpop.eup %5742 }
 0x49c   :  { %v1648_v31 = vmul.f32 1.442695, %v1639_v43  ;;  %v1650_v46 = vsel %vm737_vm9, %v6585_v39, 0.0 }
 0x49d   :  { %1651 = vadd.xlane.f32.xlu1 %v1650_v46 }
 0x49e   :  { %5750 = vpow2.f32 %v1648_v31 }
 0x49f   :  { %v6589_v51 = vpop.eup %5744 }
 0x4a0   :  { %v1653_v36 = vsel %vm737_vm9, %v6589_v51, 0.0 }
 0x4a1   :  { %1654 = vadd.xlane.f32.xlu0 %v1653_v36 }
 0x4a3   :  { %v6593_v54 = vpop.eup %5746 }
 0x4a4   :  { %v1656_v38 = vsel %vm737_vm9, %v6593_v54, 0.0 }
 0x4a5   :  { %1657 = vadd.xlane.f32.xlu1 %v1656_v38 }
 0x4a7   :  { %v6597_v59 = vpop.eup %5748 }
 0x4a8   :  { %v1659_v53 = vsel %vm737_vm9, %v6597_v59, 0.0 }
 0x4a9   :  { %1660 = vadd.xlane.f32.xlu0 %v1659_v53 }
 0x4ab   :  { %v6601_v42 = vpop.eup %5750 }
 0x4ac   :  { %v1662_v3 = vsel %vm737_vm9, %v6601_v42, 0.0 }
 0x4ad   :  { %1663 = vadd.xlane.f32.xlu1 %v1662_v3 }
 0x4ea   :  { %v770_v45 = vpop.xlane.xlu0 %769 }
 0x4eb   :  { %5752 = vrcp.f32 %v770_v45 }
 0x4ee   :  { %v773_v61 = vpop.xlane.xlu1 %772 }
 0x4ef   :  { %5754 = vrcp.f32 %v773_v61 }
 0x4f2   :  { %v776_v50 = vpop.xlane.xlu0 %775 }
 0x4f3   :  { %5756 = vrcp.f32 %v776_v50 }
 0x4f6   :  { %v779_v8 = vpop.xlane.xlu1 %778 }
 0x4f7   :  { %5758 = vrcp.f32 %v779_v8 }
 0x4f8   :  { %v5753_v55 = vpop.eup %5752 }
 0x4f9   :  { %v784_v5 = vmul.f32 %v5753_v55, %v6510_v30 }
 0x4fa   :  { %v782_v58 = vpop.xlane.xlu0 %781 }
 0x4fb   :  { %5760 = vrcp.f32 %v782_v58  ;;  %5093 = vmatmul.mubr.msk.f32.vlgmr.msra.gmra.mxu0 %vm737_vm9, %v784_v5 }
 0x4fc   :  { %v5755_v18 = vpop.eup %5754  ;;  %5133 = vmatpush3.msra.mxu0 %v6195_v9  ;;  %5095 = vmatprep.mubr.msk.f32.mxu0 %vm5937_vm0, %v5936_v0 }
 0x4fd   :  { %5134 = vmatprep.subr.mxu0 %v5936_v0  ;;  %v786_v1 = vmul.f32 %v5755_v18, %v6515_v37 }
 0x4fe   :  { %5135 = vmatpush3.msra.mxu0 %v6197_v12  ;;  %v1064_v13 = vpop.xlane.xlu1 %1063 }
 0x4ff   :  { %5762 = vrcp.f32 %v1064_v13  ;;  %5136 = vmatprep.subr.mxu0 %v5936_v0  ;;  %5096 = vmatmul.mubr.msk.f32.gmra.mxu0 %vm737_vm9, %v786_v1 }
 0x500   :  { %v5757_v30 = vpop.eup %5756  ;;  %5137 = vmatpush3.msra.mxu0 %v6201_v15  ;;  %5098 = vmatprep.mubr.msk.f32.mxu0 %vm5937_vm0, %v5936_v0 }
 0x501   :  { %5138 = vmatprep.subr.mxu0 %v5936_v0  ;;  %v788_v4 = vmul.f32 %v5757_v30, %v6520_v44  ;;  %v1790_v30 = vld [vmem:[%s7848_s2 + $0x90] sm:$0xff] }
 0x502   :  { %5139 = vmatpush3.msra.mxu0 %v6205_v17  ;;  %v1067_v37 = vpop.xlane.xlu0 %1066 }
 0x503   :  { %5764 = vrcp.f32 %v1067_v37  ;;  %5140 = vmatprep.subr.mxu0 %v5936_v0  ;;  %5099 = vmatmul.mubr.msk.f32.gmra.mxu0 %vm737_vm9, %v788_v4 }
 0x504   :  { %v5759_v26 = vpop.eup %5758  ;;  %5141 = vmatpush3.msra.mxu0 %v6209_v20  ;;  %5101 = vmatprep.mubr.msk.f32.mxu0 %vm5937_vm0, %v5936_v0 }
 0x505   :  { %v790_v7 = vmul.f32 %v5759_v26, %v6525_v52  ;;  %5182 = vmatprep.subr.mxu0 %v5936_v0 }
 0x506   :  { %v1070_v25 = vpop.xlane.xlu1 %1069 }
 0x507   :  { %5766 = vrcp.f32 %v1070_v25  ;;  %5102 = vmatmul.mubr.msk.f32.gmra.mxu0 %vm737_vm9, %v790_v7 }
 0x508   :  { %v5761_v44 = vpop.eup %5760  ;;  %5104 = vmatprep.mubr.msk.f32.mxu0 %vm5937_vm0, %v5936_v0 }
 0x509   :  { %v792_v11 = vmul.f32 %v5761_v44, %v6530_v63 }
 0x50a   :  { %v1073_v33 = vpop.xlane.xlu0 %1072 }
 0x50b   :  { %5768 = vrcp.f32 %v1073_v33  ;;  %5105 = vmatmul.mubr.msk.f32.gmra.mxu0 %vm737_vm9, %v792_v11 }
 0x50c   :  { %v5763_v21 = vpop.eup %5762  ;;  %5142 = vmatprep.mubr.msk.f32.mxu0 %vm5937_vm0, %v5936_v0 }
 0x50d   :  { %v1078_v52 = vmul.f32 %v5763_v21, %v6535_v6 }
 0x50e   :  { %v1076_v35 = vpop.xlane.xlu1 %1075 }
 0x50f   :  { %5770 = vrcp.f32 %v1076_v35  ;;  %5143 = vmatmul.mubr.msk.f32.vlgmr.msra.gmra.mxu0 %vm737_vm9, %v1078_v52 }
 0x510   :  { %v5765_v23 = vpop.eup %5764  ;;  %5183 = vmatpush3.msra.mxu0 %v6195_v9  ;;  %5145 = vmatprep.mubr.msk.f32.mxu0 %vm5937_vm0, %v5936_v0 }
 0x511   :  { %5184 = vmatprep.subr.mxu0 %v5936_v0  ;;  %v1080_v63 = vmul.f32 %v5765_v23, %v6540_v16 }
 0x512   :  { %5185 = vmatpush3.msra.mxu0 %v6197_v12  ;;  %v1358_v40 = vpop.xlane.xlu0 %1357 }
 0x513   :  { %5772 = vrcp.f32 %v1358_v40  ;;  %5186 = vmatprep.subr.mxu0 %v5936_v0  ;;  %5146 = vmatmul.mubr.msk.f32.gmra.mxu0 %vm737_vm9, %v1080_v63 }
 0x514   :  { %v5767_v6 = vpop.eup %5766  ;;  %5187 = vmatpush3.msra.mxu0 %v6201_v15  ;;  %5148 = vmatprep.mubr.msk.f32.mxu0 %vm5937_vm0, %v5936_v0 }
 0x515   :  { %5188 = vmatprep.subr.mxu0 %v5936_v0  ;;  %v1082_v28 = vmul.f32 %v5767_v6, %v6545_v27 }
 0x516   :  { %5189 = vmatpush3.msra.mxu0 %v6205_v17  ;;  %v1361_v16 = vpop.xlane.xlu1 %1360 }
 0x517   :  { %5774 = vrcp.f32 %v1361_v16  ;;  %5190 = vmatprep.subr.mxu0 %v5936_v0  ;;  %5149 = vmatmul.mubr.msk.f32.gmra.mxu0 %vm737_vm9, %v1082_v28 }
 0x518   :  { %v5769_v43 = vpop.eup %5768  ;;  %5191 = vmatpush3.msra.mxu0 %v6209_v20  ;;  %5151 = vmatprep.mubr.msk.f32.mxu0 %vm5937_vm0, %v5936_v0 }
 0x519   :  { %v1084_v31 = vmul.f32 %v5769_v43, %v6550_v47  ;;  %5232 = vmatprep.subr.mxu0 %v5936_v0 }
 0x51a   :  { %v1364_v46 = vpop.xlane.xlu0 %1363 }
 0x51b   :  { %5776 = vrcp.f32 %v1364_v46  ;;  %5152 = vmatmul.mubr.msk.f32.gmra.mxu0 %vm737_vm9, %v1084_v31 }
 0x51c   :  { %v5771_v27 = vpop.eup %5770  ;;  %5154 = vmatprep.mubr.msk.f32.mxu0 %vm5937_vm0, %v5936_v0 }
 0x51d   :  { %v1086_v36 = vmul.f32 %v5771_v27, %v6555_v60 }
 0x51e   :  { %v1367_v38 = vpop.xlane.xlu1 %1366 }
 0x51f   :  { %5778 = vrcp.f32 %v1367_v38  ;;  %5155 = vmatmul.mubr.msk.f32.gmra.mxu0 %vm737_vm9, %v1086_v36 }
 0x520   :  { %v5773_v53 = vpop.eup %5772  ;;  %5192 = vmatprep.mubr.msk.f32.mxu0 %vm5937_vm0, %v5936_v0 }
 0x521   :  { %v1372_v47 = vmul.f32 %v5773_v53, %v6560_v48 }
 0x522   :  { %v1370_v3 = vpop.xlane.xlu0 %1369 }
 0x523   :  { %5780 = vrcp.f32 %v1370_v3  ;;  %5193 = vmatmul.mubr.msk.f32.vlgmr.msra.gmra.mxu0 %vm737_vm9, %v1372_v47 }
 0x524   :  { %v5775_v45 = vpop.eup %5774  ;;  %5233 = vmatpush3.msra.mxu0 %v6195_v9  ;;  %5195 = vmatprep.mubr.msk.f32.mxu0 %vm5937_vm0, %v5936_v0 }
 0x525   :  { %5234 = vmatprep.subr.mxu0 %v5936_v0  ;;  %v1374_v60 = vmul.f32 %v5775_v45, %v6565_v57 }
 0x526   :  { %5235 = vmatpush3.msra.mxu0 %v6197_v12  ;;  %v1652_v61 = vpop.xlane.xlu1 %1651 }
 0x527   :  { %5782 = vrcp.f32 %v1652_v61  ;;  %5236 = vmatprep.subr.mxu0 %v5936_v0  ;;  %5196 = vmatmul.mubr.msk.f32.gmra.mxu0 %vm737_vm9, %v1374_v60  ;;  %v5924_v61 = vld [vmem:[%s7850_s1 + $0x40] ss:$0 sm:$0xff] }
 0x528   :  { %v5777_v48 = vpop.eup %5776  ;;  %5237 = vmatpush3.msra.mxu0 %v6201_v15  ;;  %5198 = vmatprep.mubr.msk.f32.mxu0 %vm5937_vm0, %v5936_v0 }
 0x529   :  { %5238 = vmatprep.subr.mxu0 %v5936_v0  ;;  %v1376_v9 = vmul.f32 %v5777_v48, %v6570_v2 }
 0x52a   :  { %5239 = vmatpush3.msra.mxu0 %v6205_v17  ;;  %v1655_v57 = vpop.xlane.xlu0 %1654 }
 0x52b   :  { %5784 = vrcp.f32 %v1655_v57  ;;  %5240 = vmatprep.subr.mxu0 %v5936_v0  ;;  %5199 = vmatmul.mubr.msk.f32.gmra.mxu0 %vm737_vm9, %v1376_v9  ;;  %v6743_v57 = vld [vmem:[%s7850_s1 + $0x3f] ss:$0 sm:$0xff] }
 0x52c   :  { %v5779_v12 = vpop.eup %5778  ;;  %5241 = vmatpush3.msra.mxu0 %v6209_v20  ;;  %5201 = vmatprep.mubr.msk.f32.mxu0 %vm5937_vm0, %v5936_v0 }
 0x52d   :  { %v1378_v15 = vmul.f32 %v5779_v12, %v6575_v10  ;;  %5257 = vmatprep.subr.mxu0 %v5936_v0 }
 0x52e   :  { %v1658_v50 = vpop.xlane.xlu1 %1657 }
 0x52f   :  { %5786 = vrcp.f32 %v1658_v50  ;;  %5202 = vmatmul.mubr.msk.f32.gmra.mxu0 %vm737_vm9, %v1378_v15  ;;  %v5926_v15 = vld [vmem:[%s7850_s1 + $0x41] ss:$0 sm:$0xff] }
 0x530   :  { %v5781_v17 = vpop.eup %5780  ;;  %5204 = vmatprep.mubr.msk.f32.mxu0 %vm5937_vm0, %v5936_v0 }
 0x531   :  { %v1380_v2 = vmul.f32 %v5781_v17, %v6580_v22 }
 0x532   :  { %v1661_v8 = vpop.xlane.xlu0 %1660 }
 0x533   :  { %5788 = vrcp.f32 %v1661_v8  ;;  %5205 = vmatmul.mubr.msk.f32.gmra.mxu0 %vm737_vm9, %v1380_v2 }
 0x534   :  { %v5783_v20 = vpop.eup %5782  ;;  %5242 = vmatprep.mubr.msk.f32.mxu0 %vm5937_vm0, %v5936_v0 }
 0x535   :  { %v1666_v10 = vmul.f32 %v5783_v20, %v6585_v39 }
 0x536   :  { %v1664_v55 = vpop.xlane.xlu1 %1663 }
 0x537   :  { %5790 = vrcp.f32 %v1664_v55  ;;  %5243 = vmatmul.mubr.msk.f32.vlgmr.msra.gmra.mxu0 %vm737_vm9, %v1666_v10 }
 0x538   :  { %v5785_v5 = vpop.eup %5784  ;;  %5245 = vmatprep.mubr.msk.f32.mxu0 %vm5937_vm0, %v5936_v0 }
 0x539   :  { %v1668_v22 = vmul.f32 %v5785_v5, %v6589_v51 }
 0x53b   :  { %5246 = vmatmul.mubr.msk.f32.gmra.mxu0 %vm737_vm9, %v1668_v22  ;;  %v5927_v22 = vld [vmem:[%s7850_s1 + $0x42] ss:$0 sm:$0xff] }
 0x53c   :  { %v5787_v58 = vpop.eup %5786  ;;  %5248 = vmatprep.mubr.msk.f32.mxu0 %vm5937_vm0, %v5936_v0 }
 0x53d   :  { %v1670_v18 = vmul.f32 %v5787_v58, %v6593_v54  ;;  %v1793_v54 = vld [vmem:[%s7848_s2 + $0xa8] sm:$0xff] }
 0x53e   :  { %5258 = vmatpush3.msra.mxu0 %v1793_v54  ;;  %5695 = vmatpush3.msra.mxu1 %v1793_v54 }
 0x53f   :  { %5249 = vmatmul.mubr.msk.f32.gmra.mxu0 %vm737_vm9, %v1670_v18  ;;  %5259 = vmatprep.subr.mxu0 %v5936_v0 }
 0x540   :  { %v5789_v39 = vpop.eup %5788  ;;  %5251 = vmatprep.mubr.msk.f32.mxu0 %vm5937_vm0, %v5936_v0  ;;  %5692 = vmatprep.subr.mxu1 %v5936_v0 }
 0x541   :  { %v1672_v1 = vmul.f32 %v5789_v39, %v6597_v59  ;;  %v1792_v59 = vld [vmem:[%s7848_s2 + $0xa0] sm:$0xff] }
 0x542   :  { %5260 = vmatpush3.msra.mxu0 %v1792_v59  ;;  %5696 = vmatpush3.msra.mxu1 %v1792_v59 }
 0x543   :  { %5252 = vmatmul.mubr.msk.f32.gmra.mxu0 %vm737_vm9, %v1672_v1  ;;  %5261 = vmatprep.subr.mxu0 %v5936_v0 }
 0x544   :  { %v5791_v13 = vpop.eup %5790  ;;  %5254 = vmatprep.mubr.msk.f32.mxu0 %vm5937_vm0, %v5936_v0  ;;  %5693 = vmatprep.subr.mxu1 %v5936_v0 }
 0x545   :  { %v1674_v51 = vmul.f32 %v5791_v13, %v6601_v42  ;;  %v1791_v42 = vld [vmem:[%s7848_s2 + $0x98] sm:$0xff] }
 0x546   :  { %5262 = vmatpush3.msra.mxu0 %v1791_v42  ;;  %5697 = vmatpush3.msra.mxu1 %v1791_v42 }
 0x547   :  { %5255 = vmatmul.mubr.msk.f32.gmra.mxu0 %vm737_vm9, %v1674_v51  ;;  %5263 = vmatprep.subr.mxu0 %v5936_v0 }
 0x548   :  { %5265 = vmatprep.mubr.msk.f32.mxu0 %vm5937_vm0, %v5936_v0  ;;  %5694 = vmatprep.subr.mxu1 %v5936_v0 }
 0x549   :  { %5264 = vmatpush3.msra.mxu0 %v1790_v30  ;;  %5698 = vmatpush3.msra.mxu1 %v1790_v30 }
 0x54a   :  { %5280 = vmatprep.subr.mxu0 %v5936_v0  ;;  %5303 = vmatprep.subr.mxu1 %v5936_v0 }
 0x5bb   :  { %v874_v4 = vpop.f32.mrf.mxu0 }
 0x5bc   :  { %v898_v12 = vmul.f32 %v6743_v57, %v874_v4 }
 0x5bd   :  { %v5094_v37 = vpop.f32.mrf.mxu0 }
 0x5bf   :  { %v879_v26 = vpop.f32.mrf.mxu0 }
 0x5c0   :  { %v899_v10 = vmul.f32 %v6743_v57, %v879_v26 }
 0x5c1   :  { %v5097_v7 = vpop.f32.mrf.mxu0 }
 0x5c3   :  { %v884_v25 = vpop.f32.mrf.mxu0 }
 0x5c4   :  { %v900_v54 = vmul.f32 %v6743_v57, %v884_v25 }
 0x5c5   :  { %v5100_v44 = vpop.f32.mrf.mxu0 }
 0x5c7   :  { %v889_v11 = vpop.f32.mrf.mxu0 }
 0x5c9   :  { %v5103_v33 = vpop.f32.mrf.mxu0 }
 0x5ca   :  { %v901_v33 = vmul.f32 %v6743_v57, %v889_v11 }
 0x5cb   :  { %v6735_v21 = vpop.f32.mrf.mxu0 }
 0x5cd   :  { %v5106_v52 = vpop.f32.mrf.mxu0 }
 0x5cf   :  { %v1168_v35 = vpop.f32.mrf.mxu0 }
 0x5d0   :  { %v1192_v48 = vmul.f32 %v5924_v61, %v1168_v35 }
 0x5d1   :  { %v5144_v23 = vpop.f32.mrf.mxu0 }
 0x5d2   :  { %v1197_v2 = vadd.f32 %v1192_v48, %v898_v12 }
 0x5d3   :  { %v1173_v63 = vpop.f32.mrf.mxu0 }
 0x5d4   :  { %v1193_v8 = vmul.f32 %v5924_v61, %v1173_v63 }
 0x5d5   :  { %v5147_v40 = vpop.f32.mrf.mxu0 }
 0x5d6   :  { %v1198_v39 = vadd.f32 %v1193_v8, %v899_v10 }
 0x5d7   :  { %v1178_v6 = vpop.f32.mrf.mxu0 }
 0x5d8   :  { %v1194_v1 = vmul.f32 %v5924_v61, %v1178_v6 }
 0x5d9   :  { %v5150_v28 = vpop.f32.mrf.mxu0 }
 0x5da   :  { %v1199_v37 = vadd.f32 %v1194_v1, %v900_v54 }
 0x5db   :  { %v1183_v16 = vpop.f32.mrf.mxu0 }
 0x5dc   :  { %v1195_v26 = vmul.f32 %v5924_v61, %v1183_v16  ;;  %v902_v16 = vmul.f32 %v6743_v57, %v6735_v21 }
 0x5dd   :  { %v5153_v43 = vpop.f32.mrf.mxu0 }
 0x5de   :  { %v1200_v63 = vadd.f32 %v1195_v26, %v901_v33 }
 0x5df   :  { %v1188_v31 = vpop.f32.mrf.mxu0 }
 0x5e0   :  { %v1196_v40 = vmul.f32 %v5924_v61, %v1188_v31 }
 0x5e1   :  { %v5156_v46 = vpop.f32.mrf.mxu0 }
 0x5e3   :  { %v1462_v27 = vpop.f32.mrf.mxu0 }
 0x5e4   :  { %v1486_v50 = vmul.f32 %v5926_v15, %v1462_v27 }
 0x5e5   :  { %v5194_v36 = vpop.f32.mrf.mxu0 }
 0x5e6   :  { %v1491_v55 = vadd.f32 %v1486_v50, %v1197_v2  ;;  %v1201_v36 = vadd.f32 %v1196_v40, %v902_v16 }
 0x5e7   :  { %v1467_v38 = vpop.f32.mrf.mxu0 }
 0x5e8   :  { %v1487_v5 = vmul.f32 %v5926_v15, %v1467_v38 }
 0x5e9   :  { %v5197_v53 = vpop.f32.mrf.mxu0 }
 0x5ea   :  { %v1492_v59 = vadd.f32 %v1487_v5, %v1198_v39 }
 0x5eb   :  { %v1472_v47 = vpop.f32.mrf.mxu0 }
 0x5ec   :  { %v1488_v42 = vmul.f32 %v5926_v15, %v1472_v47 }
 0x5ed   :  { %v5200_v3 = vpop.f32.mrf.mxu0 }
 0x5ee   :  { %v1493_v52 = vadd.f32 %v1488_v42, %v1199_v37 }
 0x5ef   :  { %v1477_v45 = vpop.f32.mrf.mxu0 }
 0x5f0   :  { %v1489_v35 = vmul.f32 %v5926_v15, %v1477_v45  ;;  %v4550_v45 = vld [vmem:[%s7850_s1 + $0x2d] ss:$0 sm:$0xff] }
 0x5f1   :  { %v5203_v60 = vpop.f32.mrf.mxu0 }
 0x5f2   :  { %v1494_v43 = vadd.f32 %v1489_v35, %v1200_v63 }
 0x5f3   :  { %v1482_v9 = vpop.f32.mrf.mxu0 }
 0x5f4   :  { %v1490_v46 = vmul.f32 %v5926_v15, %v1482_v9 }
 0x5f5   :  { %v5206_v17 = vpop.f32.mrf.mxu0 }
 0x5f6   :  { %v1495_v47 = vadd.f32 %v1490_v46, %v1201_v36 }
 0x5f7   :  { %v1756_v20 = vpop.f32.mrf.mxu0 }
 0x5f8   :  { %v1780_v58 = vmul.f32 %v5927_v22, %v1756_v20 }
 0x5f9   :  { %v5244_v18 = vpop.f32.mrf.mxu0 }
 0x5fa   :  { %v1785_v13 = vadd.f32 %v1780_v58, %v1491_v55 }
 0x5fb   :  { %v1761_v51 = vpop.f32.mrf.mxu0 }
 0x5fc   :  { %v1781_v30 = vmul.f32 %v5927_v22, %v1761_v51  ;;  %5266 = vmatmul.mubr.msk.f32.vlgmr.msra.gmra.mxu0 %vm204_vm2, %v1785_v13 }
 0x5fd   :  { %v5247_v4 = vpop.f32.mrf.mxu0  ;;  %5288 = vmatprep.mubr.msk.f32.mxu0 %vm5937_vm0, %v5936_v0 }
 0x5fe   :  { %v1786_v7 = vadd.f32 %v1781_v30, %v1492_v59 }
 0x5ff   :  { %v1766_v44 = vpop.f32.mrf.mxu0 }
 0x600   :  { %v1782_v23 = vmul.f32 %v5927_v22, %v1766_v44  ;;  %5269 = vmatmul.mubr.msk.f32.vlgmr.msra.gmra.mxu1 %vm204_vm2, %v1786_v7 }
 0x601   :  { %v5250_v25 = vpop.f32.mrf.mxu0  ;;  %5271 = vmatprep.mubr.msk.f32.mxu1 %vm5937_vm0, %v5936_v0 }
 0x602   :  { %v1787_v6 = vadd.f32 %v1782_v23, %v1493_v52 }
 0x603   :  { %v1771_v28 = vpop.f32.mrf.mxu0 }
 0x604   :  { %v1783_v27 = vmul.f32 %v5927_v22, %v1771_v28  ;;  %5272 = vmatmul.mubr.msk.f32.gmra.mxu1 %vm204_vm2, %v1787_v6 }
 0x605   :  { %v5253_v11 = vpop.f32.mrf.mxu0  ;;  %5274 = vmatprep.mubr.msk.f32.mxu1 %vm5937_vm0, %v5936_v0 }
 0x606   :  { %v1788_v38 = vadd.f32 %v1783_v27, %v1494_v43 }
 0x607   :  { %v1776_v53 = vpop.f32.mrf.mxu0 }
 0x608   :  { %v1784_v3 = vmul.f32 %v5927_v22, %v1776_v53  ;;  %5275 = vmatmul.mubr.msk.f32.gmra.mxu1 %vm204_vm2, %v1788_v38  ;;  %v1999_v38 = vld [vmem:[%s7848_s2 + $0xc8] sm:$0xff]  ;;  %v1998_v53 = vld [vmem:[%s7848_s2 + $0xc0] sm:$0xff] }
 0x609   :  { %v5256_v31 = vpop.f32.mrf.mxu0  ;;  %5277 = vmatprep.mubr.msk.f32.mxu1 %vm5937_vm0, %v5936_v0  ;;  %5281 = vmatpush3.msra.mxu0 %v1999_v38 }
 0x60a   :  { %v1789_v21 = vadd.f32 %v1784_v3, %v1495_v47  ;;  %5282 = vmatprep.subr.mxu0 %v5936_v0  ;;  %v1997_v47 = vld [vmem:[%s7848_s2 + $0xb8] sm:$0xff]  ;;  %v1996_v3 = vld [vmem:[%s7848_s2 + $0xb0] sm:$0xff] }
 0x60b   :  { %5283 = vmatpush3.msra.mxu0 %v1998_v53 }
 0x60c   :  { %5278 = vmatmul.mubr.msk.f32.gmra.mxu1 %vm204_vm2, %v1789_v21  ;;  %5284 = vmatprep.subr.mxu0 %v5936_v0 }
 0x60d   :  { %5319 = vmatprep.mubr.msk.f32.mxu1 %vm5937_vm0, %v5936_v0  ;;  %5285 = vmatpush3.msra.mxu0 %v1997_v47 }
 0x60e   :  { %5286 = vmatprep.subr.mxu0 %v5936_v0 }
 0x60f   :  { %5287 = vmatpush3.msra.mxu0 %v1996_v3 }
 0x610   :  { %5334 = vmatprep.subr.mxu0 %v5936_v0 }
 0x6bc   :  { %v1875_v60 = vpop.f32.mrf.mxu0 }
 0x6bd   :  { %v1899_v61 = vadd.f32 %v1875_v60, %v6022_v14 }
 0x6be   :  { %v5267_v48 = vpop.f32.mrf.mxu0 }
 0x6bf   :  { %v6776_v9 = vadd.f32 %v4550_v45, %v1899_v61 }
 0x6c0   :  { %v1880_v12 = vpop.f32.mrf.mxu1 }
 0x6c1   :  { %v1900_v15 = vadd.f32 %v1880_v12, %v6029_v19  ;;  %v1913_v50 = vsel %vm204_vm2, %v6776_v9, 0.0 }
 0x6c2   :  { %v5270_v17 = vpop.f32.mrf.mxu1  ;;  %1914 = vadd.xlane.f32.xlu0 %v1913_v50 }
 0x6c3   :  { %v6781_v2 = vadd.f32 %v4550_v45, %v1900_v15 }
 0x6c4   :  { %v1885_v8 = vpop.f32.mrf.mxu1 }
 0x6c5   :  { %v1901_v20 = vadd.f32 %v1885_v8, %v6036_v24  ;;  %v1916_v10 = vsel %vm204_vm2, %v6781_v2, 0.0 }
 0x6c6   :  { %1917 = vadd.xlane.f32.xlu1 %v1916_v10  ;;  %v5273_v14 = vpop.f32.mrf.mxu1 }
 0x6c7   :  { %v6786_v55 = vadd.f32 %v4550_v45, %v1901_v20 }
 0x6c8   :  { %v1890_v5 = vpop.f32.mrf.mxu1 }
 0x6c9   :  { %v1902_v19 = vadd.f32 %v1890_v5, %v6043_v29  ;;  %v1919_v22 = vsel %vm204_vm2, %v6786_v55, 0.0 }
 0x6ca   :  { %v5276_v58 = vpop.f32.mrf.mxu1  ;;  %1920 = vadd.xlane.f32.xlu0 %v1919_v22 }
 0x6cb   :  { %v6791_v18 = vadd.f32 %v4550_v45, %v1902_v19  ;;  %v4551_v19 = vld [vmem:[%s7850_s1 + $0x2e] ss:$0 sm:$0xff] }
 0x6cc   :  { %v1895_v39 = vpop.f32.mrf.mxu1 }
 0x6cd   :  { %v1903_v24 = vadd.f32 %v1895_v39, %v6050_v34  ;;  %v1922_v1 = vsel %vm204_vm2, %v6791_v18, 0.0  ;;  %v4552_v39 = vld [vmem:[%s7850_s1 + $0x2f] ss:$0 sm:$0xff] }
 0x6ce   :  { %1923 = vadd.xlane.f32.xlu1 %v1922_v1  ;;  %v5279_v13 = vpop.f32.mrf.mxu1 }
 0x6cf   :  { %v6796_v51 = vadd.f32 %v4550_v45, %v1903_v24 }
 0x6d1   :  { %v1925_v29 = vsel %vm204_vm2, %v6796_v51, 0.0 }
 0x6d2   :  { %1926 = vadd.xlane.f32.xlu0 %v1925_v29 }
 0x74b   :  { %v1915_v54 = vpop.xlane.xlu0 %1914 }
 0x74c   :  { %v1928_v59 = vmul.f32 0.03125, %v1915_v54 }
 0x74e   :  { %v1933_v42 = vsub.f32 %v6776_v9, %v1928_v59 }
 0x74f   :  { %v1918_v30 = vpop.xlane.xlu1 %1917 }
 0x750   :  { %v1929_v4 = vmul.f32 0.03125, %v1918_v30  ;;  %v1938_v37 = vmul.f32 %v1933_v42, %v1933_v42 }
 0x752   :  { %v6802_v34 = vsub.f32 %v6781_v2, %v1929_v4  ;;  %v1943_v26 = vsel %vm204_vm2, %v1938_v37, 0.0 }
 0x753   :  { %1944 = vadd.xlane.f32.xlu1 %v1943_v26  ;;  %v1921_v7 = vpop.xlane.xlu0 %1920 }
 0x754   :  { %v1930_v44 = vmul.f32 0.03125, %v1921_v7  ;;  %v1939_v33 = vmul.f32 %v6802_v34, %v6802_v34 }
 0x756   :  { %v6808_v52 = vsub.f32 %v6786_v55, %v1930_v44  ;;  %v1946_v35 = vsel %vm204_vm2, %v1939_v33, 0.0 }
 0x757   :  { %v1924_v23 = vpop.xlane.xlu1 %1923  ;;  %1947 = vadd.xlane.f32.xlu0 %v1946_v35 }
 0x758   :  { %v1931_v25 = vmul.f32 0.03125, %v1924_v23  ;;  %v1940_v63 = vmul.f32 %v6808_v52, %v6808_v52 }
 0x75a   :  { %v6814_v40 = vsub.f32 %v6791_v18, %v1931_v25  ;;  %v1949_v6 = vsel %vm204_vm2, %v1940_v63, 0.0  ;;  %v2161_v25 = vld [vmem:[%s7848_s2 + $0x108] sm:$0xff]  ;;  %v2160_v63 = vld [vmem:[%s7848_s2 + $0x100] sm:$0xff] }
 0x75b   :  { %1950 = vadd.xlane.f32.xlu1 %v1949_v6  ;;  %v1927_v28 = vpop.xlane.xlu0 %1926  ;;  %5304 = vmatpush3.msra.mxu1 %v2161_v25  ;;  %v2158_v6 = vld [vmem:[%s7848_s2 + $0xf0] sm:$0xff] }
 0x75c   :  { %v1932_v16 = vmul.f32 0.03125, %v1927_v28  ;;  %v1941_v43 = vmul.f32 %v6814_v40, %v6814_v40  ;;  %5305 = vmatprep.subr.mxu1 %v5936_v0  ;;  %v2157_v28 = vld [vmem:[%s7848_s2 + $0xe8] sm:$0xff] }
 0x75d   :  { %5306 = vmatpush3.msra.mxu1 %v2160_v63 }
 0x75e   :  { %v6820_v46 = vsub.f32 %v6796_v51, %v1932_v16  ;;  %v1952_v27 = vsel %vm204_vm2, %v1941_v43, 0.0  ;;  %5307 = vmatprep.subr.mxu1 %v5936_v0  ;;  %v2156_v16 = vld [vmem:[%s7848_s2 + $0xe0] sm:$0xff]  ;;  %v2155_v43 = vld [vmem:[%s7848_s2 + $0xd8] sm:$0xff] }
 0x75f   :  { %1953 = vadd.xlane.f32.xlu0 %v1952_v27  ;;  %v4553_v27 = vld [vmem:[%s7850_s1 + $0x30] ss:$0 sm:$0xff] }
 0x760   :  { %v1942_v11 = vmul.f32 %v6820_v46, %v6820_v46 }
 0x762   :  { %v1955_v36 = vsel %vm204_vm2, %v1942_v11, 0.0 }
 0x763   :  { %1956 = vadd.xlane.f32.xlu1 %v1955_v36 }
 0x7dc   :  { %v1945_v31 = vpop.xlane.xlu1 %1944 }
 0x7dd   :  { %v1958_v21 = vmul.f32 0.03125, %v1945_v31 }
 0x7df   :  { %v1963_v45 = vadd.f32 1e-05, %v1958_v21 }
 0x7e0   :  { %v1948_v60 = vpop.xlane.xlu0 %1947 }
 0x7e1   :  { %5792 = vrsqrt.f32 %v1963_v45  ;;  %v1959_v61 = vmul.f32 0.03125, %v1948_v60 }
 0x7e3   :  { %v1964_v48 = vadd.f32 1e-05, %v1959_v61 }
 0x7e4   :  { %v1951_v12 = vpop.xlane.xlu1 %1950 }
 0x7e5   :  { %5794 = vrsqrt.f32 %v1964_v48  ;;  %v1960_v15 = vmul.f32 0.03125, %v1951_v12 }
 0x7e7   :  { %v1965_v50 = vadd.f32 1e-05, %v1960_v15 }
 0x7e8   :  { %v1954_v17 = vpop.xlane.xlu0 %1953 }
 0x7e9   :  { %5796 = vrsqrt.f32 %v1965_v50  ;;  %v1961_v8 = vmul.f32 0.03125, %v1954_v17 }
 0x7eb   :  { %v1966_v20 = vadd.f32 1e-05, %v1961_v8 }
 0x7ec   :  { %v1957_v10 = vpop.xlane.xlu1 %1956 }
 0x7ed   :  { %5798 = vrsqrt.f32 %v1966_v20  ;;  %v1962_v14 = vmul.f32 0.03125, %v1957_v10 }
 0x7ee   :  { %v5793_v5 = vpop.eup %5792 }
 0x7ef   :  { %v1973_v22 = vmul.f32 %v5793_v5, %v1933_v42  ;;  %v1967_v58 = vadd.f32 1e-05, %v1962_v14 }
 0x7f1   :  { %5800 = vrsqrt.f32 %v1967_v58  ;;  %v1982_v24 = vmul.f32 %v4551_v19, %v1973_v22 }
 0x7f2   :  { %v5795_v1 = vpop.eup %5794 }
 0x7f3   :  { %v1991_v13 = vadd.f32 %v4552_v39, %v1982_v24  ;;  %v1974_v29 = vmul.f32 %v5795_v1, %v6802_v34 }
 0x7f5   :  { %5289 = vmatmul.mubr.msk.f32.vlgmr.msra.gmra.mxu0 %vm204_vm2, %v1991_v13  ;;  %v1983_v54 = vmul.f32 %v4551_v19, %v1974_v29 }
 0x7f6   :  { %v5797_v59 = vpop.eup %5796  ;;  %5291 = vmatprep.mubr.msk.f32.mxu0 %vm5937_vm0, %v5936_v0 }
 0x7f7   :  { %v1992_v30 = vadd.f32 %v4552_v39, %v1983_v54  ;;  %v1975_v42 = vmul.f32 %v5797_v59, %v6808_v52 }
 0x7f9   :  { %5292 = vmatmul.mubr.msk.f32.gmra.mxu0 %vm204_vm2, %v1992_v30  ;;  %v1984_v4 = vmul.f32 %v4551_v19, %v1975_v42 }
 0x7fa   :  { %v5799_v37 = vpop.eup %5798  ;;  %5294 = vmatprep.mubr.msk.f32.mxu0 %vm5937_vm0, %v5936_v0 }
 0x7fb   :  { %v1993_v26 = vadd.f32 %v4552_v39, %v1984_v4  ;;  %v1976_v34 = vmul.f32 %v5799_v37, %v6814_v40  ;;  %v2159_v40 = vld [vmem:[%s7848_s2 + $0xf8] sm:$0xff] }
 0x7fc   :  { %5308 = vmatpush3.msra.mxu1 %v2159_v40 }
 0x7fd   :  { %5295 = vmatmul.mubr.msk.f32.gmra.mxu0 %vm204_vm2, %v1993_v26  ;;  %v1985_v7 = vmul.f32 %v4551_v19, %v1976_v34  ;;  %5309 = vmatprep.subr.mxu1 %v5936_v0 }
 0x7fe   :  { %v5801_v44 = vpop.eup %5800  ;;  %5297 = vmatprep.mubr.msk.f32.mxu0 %vm5937_vm0, %v5936_v0  ;;  %5310 = vmatpush3.msra.mxu1 %v2158_v6 }
 0x7ff   :  { %v1994_v33 = vadd.f32 %v4552_v39, %v1985_v7  ;;  %v1977_v52 = vmul.f32 %v5801_v44, %v6820_v46  ;;  %5311 = vmatprep.subr.mxu1 %v5936_v0  ;;  %v2154_v46 = vld [vmem:[%s7848_s2 + $0xd0] sm:$0xff] }
 0x800   :  { %5312 = vmatpush3.msra.mxu1 %v2157_v28 }
 0x801   :  { %5298 = vmatmul.mubr.msk.f32.gmra.mxu0 %vm204_vm2, %v1994_v33  ;;  %v1986_v35 = vmul.f32 %v4551_v19, %v1977_v52  ;;  %5313 = vmatprep.subr.mxu1 %v5936_v0 }
 0x802   :  { %5300 = vmatprep.mubr.msk.f32.mxu0 %vm5937_vm0, %v5936_v0  ;;  %5314 = vmatpush3.msra.mxu1 %v2156_v16 }
 0x803   :  { %v1995_v23 = vadd.f32 %v4552_v39, %v1986_v35  ;;  %5315 = vmatprep.subr.mxu1 %v5936_v0 }
 0x804   :  { %5316 = vmatpush3.msra.mxu1 %v2155_v43 }
 0x805   :  { %5301 = vmatmul.mubr.msk.f32.gmra.mxu0 %vm204_vm2, %v1995_v23  ;;  %5317 = vmatprep.subr.mxu1 %v5936_v0 }
 0x806   :  { %5342 = vmatprep.mubr.msk.f32.mxu0 %vm5937_vm0, %v5936_v0  ;;  %5318 = vmatpush3.msra.mxu1 %v2154_v46 }
 0x807   :  { %5357 = vmatprep.subr.mxu1 %v5936_v0 }
 0x8b5   :  { %v2085_v11 = vpop.f32.mrf.mxu0 }
 0x8b6   :  { %v2086_v36 = vadd.f32 %v4553_v27, %v2085_v11 }
 0x8b7   :  { %v5290_v38 = vpop.f32.mrf.mxu0 }
 0x8b8   :  { %v2114_v53 = vmul.f32 0.044715, %v2086_v36  ;;  %v2109_v52 = vmul.f32 0.5, %v2086_v36 }
 0x8b9   :  { %v2090_v47 = vpop.f32.mrf.mxu0 }
 0x8ba   :  { %v2119_v3 = vmul.f32 %v2114_v53, %v2086_v36  ;;  %v2091_v31 = vadd.f32 %v4553_v27, %v2090_v47 }
 0x8bb   :  { %v5293_v21 = vpop.f32.mrf.mxu0 }
 0x8bc   :  { %v2124_v45 = vmul.f32 %v2119_v3, %v2086_v36  ;;  %v2115_v60 = vmul.f32 0.044715, %v2091_v31  ;;  %v2110_v40 = vmul.f32 0.5, %v2091_v31 }
 0x8bd   :  { %v2095_v61 = vpop.f32.mrf.mxu0 }
 0x8be   :  { %v2129_v48 = vadd.f32 %v2124_v45, %v2086_v36  ;;  %v2120_v12 = vmul.f32 %v2115_v60, %v2091_v31  ;;  %v2096_v15 = vadd.f32 %v4553_v27, %v2095_v61  ;;  %v4564_v45 = vld [vmem:[%s7850_s1 + $0x31] ss:$0 sm:$0xff] }
 0x8bf   :  { %v5296_v50 = vpop.f32.mrf.mxu0 }
 0x8c0   :  { %v2134_v17 = vmul.f32 0.7978846, %v2129_v48  ;;  %v2125_v8 = vmul.f32 %v2120_v12, %v2091_v31  ;;  %v2116_v20 = vmul.f32 0.044715, %v2096_v15  ;;  %v2111_v43 = vmul.f32 0.5, %v2096_v15 }
 0x8c1   :  { %v2100_v10 = vpop.f32.mrf.mxu0 }
 0x8c2   :  { %5802 = vtanh.f32 %v2134_v17  ;;  %v2130_v14 = vadd.f32 %v2125_v8, %v2091_v31  ;;  %v2121_v5 = vmul.f32 %v2116_v20, %v2096_v15  ;;  %v2101_v19 = vadd.f32 %v4553_v27, %v2100_v10 }
 0x8c3   :  { %v5299_v22 = vpop.f32.mrf.mxu0 }
 0x8c4   :  { %v2126_v58 = vmul.f32 %v2121_v5, %v2096_v15  ;;  %v2117_v39 = vmul.f32 0.044715, %v2101_v19  ;;  %v2135_v24 = vmul.f32 0.7978846, %v2130_v14  ;;  %v2112_v36 = vmul.f32 0.5, %v2101_v19 }
 0x8c5   :  { %v2105_v1 = vpop.f32.mrf.mxu0 }
 0x8c6   :  { %v2131_v13 = vadd.f32 %v2126_v58, %v2096_v15  ;;  %v2122_v29 = vmul.f32 %v2117_v39, %v2101_v19  ;;  %v2106_v54 = vadd.f32 %v4553_v27, %v2105_v1  ;;  %5804 = vtanh.f32 %v2135_v24 }
 0x8c7   :  { %v5302_v59 = vpop.f32.mrf.mxu0 }
 0x8c8   :  { %v2127_v30 = vmul.f32 %v2122_v29, %v2101_v19  ;;  %v2118_v42 = vmul.f32 0.044715, %v2106_v54  ;;  %v2136_v4 = vmul.f32 0.7978846, %v2131_v13  ;;  %v2113_v3 = vmul.f32 0.5, %v2106_v54 }
 0x8ca   :  { %v2132_v37 = vadd.f32 %v2127_v30, %v2101_v19  ;;  %v2123_v26 = vmul.f32 %v2118_v42, %v2106_v54  ;;  %5806 = vtanh.f32 %v2136_v4 }
 0x8cc   :  { %v2128_v34 = vmul.f32 %v2123_v26, %v2106_v54  ;;  %v2137_v7 = vmul.f32 0.7978846, %v2132_v37 }
 0x8ce   :  { %v2133_v44 = vadd.f32 %v2128_v34, %v2106_v54  ;;  %5808 = vtanh.f32 %v2137_v7 }
 0x8cf   :  { %v5803_v33 = vpop.eup %5802 }
 0x8d0   :  { %v2144_v35 = vadd.f32 1.0, %v5803_v33  ;;  %v2138_v23 = vmul.f32 0.7978846, %v2133_v44 }
 0x8d2   :  { %v2149_v25 = vmul.f32 %v2144_v35, %v2109_v52  ;;  %5810 = vtanh.f32 %v2138_v23 }
 0x8d3   :  { %v5805_v63 = vpop.eup %5804 }
 0x8d4   :  { %5320 = vmatmul.mubr.msk.f32.vlgmr.msra.gmra.mxu1 %vm2162_vm13, %v2149_v25  ;;  %v2145_v6 = vadd.f32 1.0, %v5805_v63 }
 0x8d5   :  { %5322 = vmatprep.mubr.msk.f32.mxu1 %vm5937_vm0, %v5936_v0 }
 0x8d6   :  { %v2150_v28 = vmul.f32 %v2145_v6, %v2110_v40 }
 0x8d7   :  { %v5807_v16 = vpop.eup %5806 }
 0x8d8   :  { %5323 = vmatmul.mubr.msk.f32.gmra.mxu1 %vm2162_vm13, %v2150_v28  ;;  %v2146_v46 = vadd.f32 1.0, %v5807_v16 }
 0x8d9   :  { %5325 = vmatprep.mubr.msk.f32.mxu1 %vm5937_vm0, %v5936_v0 }
 0x8da   :  { %v2151_v27 = vmul.f32 %v2146_v46, %v2111_v43 }
 0x8db   :  { %v5809_v11 = vpop.eup %5808 }
 0x8dc   :  { %5326 = vmatmul.mubr.msk.f32.gmra.mxu1 %vm2162_vm13, %v2151_v27  ;;  %v2147_v38 = vadd.f32 1.0, %v5809_v11 }
 0x8dd   :  { %5328 = vmatprep.mubr.msk.f32.mxu1 %vm5937_vm0, %v5936_v0 }
 0x8de   :  { %v2152_v53 = vmul.f32 %v2147_v38, %v2112_v36  ;;  %v2491_v38 = vld [vmem:[%s7848_s2 + $0x148] sm:$0xff] }
 0x8df   :  { %v5811_v47 = vpop.eup %5810  ;;  %5358 = vmatpush3.msra.mxu1 %v2491_v38 }
 0x8e0   :  { %5329 = vmatmul.mubr.msk.f32.gmra.mxu1 %vm2162_vm13, %v2152_v53  ;;  %v2148_v31 = vadd.f32 1.0, %v5811_v47  ;;  %v2378_v53 = vld [vmem:[%s7848_s2 + $0x128] sm:$0xff]  ;;  %5359 = vmatprep.subr.mxu1 %v5936_v0  ;;  %v2490_v47 = vld [vmem:[%s7848_s2 + $0x140] sm:$0xff] }
 0x8e1   :  { %5331 = vmatprep.mubr.msk.f32.mxu1 %vm5937_vm0, %v5936_v0  ;;  %5335 = vmatpush3.msra.mxu0 %v2378_v53 }
 0x8e2   :  { %v2153_v21 = vmul.f32 %v2148_v31, %v2113_v3  ;;  %5336 = vmatprep.subr.mxu0 %v5936_v0  ;;  %v2377_v3 = vld [vmem:[%s7848_s2 + $0x120] sm:$0xff]  ;;  %5360 = vmatpush3.msra.mxu1 %v2490_v47  ;;  %v2489_v31 = vld [vmem:[%s7848_s2 + $0x138] sm:$0xff] }
 0x8e3   :  { %5337 = vmatpush3.msra.mxu0 %v2377_v3  ;;  %5361 = vmatprep.subr.mxu1 %v5936_v0 }
 0x8e4   :  { %5332 = vmatmul.mubr.msk.f32.gmra.mxu1 %vm2162_vm13, %v2153_v21  ;;  %v2376_v21 = vld [vmem:[%s7848_s2 + $0x118] sm:$0xff]  ;;  %5338 = vmatprep.subr.mxu0 %v5936_v0 }
 0x8e5   :  { %5365 = vmatprep.mubr.msk.f32.mxu1 %vm5937_vm0, %v5936_v0  ;;  %5362 = vmatpush3.msra.mxu1 %v2489_v31 }
 0x8e6   :  { %5339 = vmatpush3.msra.mxu0 %v2376_v21  ;;  %5363 = vmatprep.subr.mxu1 %v5936_v0 }
 0x8e7   :  { %5340 = vmatprep.subr.mxu0 %v5936_v0 }
 0x994   :  { %v2244_v60 = vpop.f32.mrf.mxu1 }
 0x995   :  { %v2268_v61 = vadd.f32 %v2244_v60, %v6776_v9  ;;  %v2375_v60 = vld [vmem:[%s7848_s2 + $0x110] sm:$0xff] }
 0x996   :  { %v5321_v48 = vpop.f32.mrf.mxu1  ;;  %5341 = vmatpush3.msra.mxu0 %v2375_v60 }
 0x997   :  { %v6921_v12 = vadd.f32 %v4564_v45, %v2268_v61  ;;  %5380 = vmatprep.subr.mxu0 %v5936_v0 }
 0x998   :  { %v2249_v15 = vpop.f32.mrf.mxu1 }
 0x999   :  { %v2269_v50 = vadd.f32 %v2249_v15, %v6781_v2  ;;  %v2292_v17 = vsel %vm204_vm2, %v6921_v12, 0.0 }
 0x99a   :  { %2293 = vadd.xlane.f32.xlu0 %v2292_v17  ;;  %v5324_v8 = vpop.f32.mrf.mxu1 }
 0x99b   :  { %v6926_v20 = vadd.f32 %v4564_v45, %v2269_v50 }
 0x99c   :  { %v2254_v10 = vpop.f32.mrf.mxu1 }
 0x99d   :  { %v2270_v14 = vadd.f32 %v2254_v10, %v6786_v55  ;;  %v2295_v5 = vsel %vm204_vm2, %v6926_v20, 0.0 }
 0x99e   :  { %2296 = vadd.xlane.f32.xlu1 %v2295_v5  ;;  %v5327_v9 = vpop.f32.mrf.mxu1 }
 0x99f   :  { %v6931_v19 = vadd.f32 %v4564_v45, %v2270_v14 }
 0x9a0   :  { %v2259_v22 = vpop.f32.mrf.mxu1 }
 0x9a1   :  { %v2271_v2 = vadd.f32 %v2259_v22, %v6791_v18  ;;  %v2298_v58 = vsel %vm204_vm2, %v6931_v19, 0.0 }
 0x9a2   :  { %2299 = vadd.xlane.f32.xlu0 %v2298_v58  ;;  %v5330_v39 = vpop.f32.mrf.mxu1 }
 0x9a3   :  { %v6936_v24 = vadd.f32 %v4564_v45, %v2271_v2 }
 0x9a4   :  { %v2264_v1 = vpop.f32.mrf.mxu1 }
 0x9a5   :  { %v2272_v55 = vadd.f32 %v2264_v1, %v6796_v51  ;;  %v2301_v13 = vsel %vm204_vm2, %v6936_v24, 0.0 }
 0x9a6   :  { %2302 = vadd.xlane.f32.xlu1 %v2301_v13  ;;  %v5333_v29 = vpop.f32.mrf.mxu1 }
 0x9a7   :  { %v6941_v54 = vadd.f32 %v4564_v45, %v2272_v55  ;;  %v2488_v45 = vld [vmem:[%s7848_s2 + $0x130] sm:$0xff] }
 0x9a8   :  { %5364 = vmatpush3.msra.mxu1 %v2488_v45  ;;  %v4565_v55 = vld [vmem:[%s7850_s1 + $0x32] ss:$0 sm:$0xff] }
 0x9a9   :  { %v2304_v18 = vsel %vm204_vm2, %v6941_v54, 0.0  ;;  %5403 = vmatprep.subr.mxu1 %v5936_v0 }
 0x9aa   :  { %2305 = vadd.xlane.f32.xlu0 %v2304_v18  ;;  %v4566_v18 = vld [vmem:[%s7850_s1 + $0x33] ss:$0 sm:$0xff] }
 0xa23   :  { %v2294_v59 = vpop.xlane.xlu0 %2293 }
 0xa24   :  { %v2307_v30 = vmul.f32 0.03125, %v2294_v59 }
 0xa26   :  { %v6946_v42 = vsub.f32 %v6921_v12, %v2307_v30 }
 0xa27   :  { %v2297_v4 = vpop.xlane.xlu1 %2296 }
 0xa28   :  { %v2308_v37 = vmul.f32 0.03125, %v2297_v4  ;;  %v2317_v51 = vmul.f32 %v6946_v42, %v6946_v42 }
 0xa2a   :  { %v6951_v26 = vsub.f32 %v6926_v20, %v2308_v37  ;;  %v2322_v34 = vsel %vm204_vm2, %v2317_v51, 0.0  ;;  %v2589_v51 = vld [vmem:[%s7848_s2 + $0x168] sm:$0xff] }
 0xa2b   :  { %v2300_v7 = vpop.xlane.xlu0 %2299  ;;  %2323 = vadd.xlane.f32.xlu1 %v2322_v34 }
 0xa2c   :  { %v2309_v44 = vmul.f32 0.03125, %v2300_v7  ;;  %v2318_v33 = vmul.f32 %v6951_v26, %v6951_v26 }
 0xa2e   :  { %v6957_v52 = vsub.f32 %v6931_v19, %v2309_v44  ;;  %v2325_v35 = vsel %vm204_vm2, %v2318_v33, 0.0 }
 0xa2f   :  { %v2303_v23 = vpop.xlane.xlu1 %2302  ;;  %2326 = vadd.xlane.f32.xlu0 %v2325_v35 }
 0xa30   :  { %v2310_v25 = vmul.f32 0.03125, %v2303_v23  ;;  %v2319_v63 = vmul.f32 %v6957_v52, %v6957_v52 }
 0xa32   :  { %v6963_v40 = vsub.f32 %v6936_v24, %v2310_v25  ;;  %v2328_v6 = vsel %vm204_vm2, %v2319_v63, 0.0  ;;  %v2587_v25 = vld [vmem:[%s7848_s2 + $0x158] sm:$0xff] }
 0xa33   :  { %2329 = vadd.xlane.f32.xlu1 %v2328_v6  ;;  %v2306_v28 = vpop.xlane.xlu0 %2305 }
 0xa34   :  { %v2311_v16 = vmul.f32 0.03125, %v2306_v28  ;;  %v2320_v43 = vmul.f32 %v6963_v40, %v6963_v40 }
 0xa36   :  { %v6969_v46 = vsub.f32 %v6941_v54, %v2311_v16  ;;  %v2331_v27 = vsel %vm204_vm2, %v2320_v43, 0.0  ;;  %v2586_v16 = vld [vmem:[%s7848_s2 + $0x150] sm:$0xff] }
 0xa37   :  { %2332 = vadd.xlane.f32.xlu0 %v2331_v27 }
 0xa38   :  { %v2321_v11 = vmul.f32 %v6969_v46, %v6969_v46 }
 0xa3a   :  { %v2334_v36 = vsel %vm204_vm2, %v2321_v11, 0.0 }
 0xa3b   :  { %2335 = vadd.xlane.f32.xlu1 %v2334_v36 }
 0xab4   :  { %v2324_v61 = vpop.xlane.xlu1 %2323 }
 0xab5   :  { %v2337_v48 = vmul.f32 0.03125, %v2324_v61 }
 0xab7   :  { %v2342_v15 = vadd.f32 1e-05, %v2337_v48 }
 0xab8   :  { %v2327_v50 = vpop.xlane.xlu0 %2326 }
 0xab9   :  { %5812 = vrsqrt.f32 %v2342_v15  ;;  %v2338_v17 = vmul.f32 0.03125, %v2327_v50 }
 0xabb   :  { %v2343_v8 = vadd.f32 1e-05, %v2338_v17 }
 0xabc   :  { %v2330_v10 = vpop.xlane.xlu1 %2329 }
 0xabd   :  { %5814 = vrsqrt.f32 %v2343_v8  ;;  %v2339_v14 = vmul.f32 0.03125, %v2330_v10  ;;  %v4573_v8 = vld [vmem:[%s7850_s1 + $0x35] ss:$0 sm:$0xff] }
 0xabf   :  { %v2344_v5 = vadd.f32 1e-05, %v2339_v14 }
 0xac0   :  { %v2333_v9 = vpop.xlane.xlu0 %2332 }
 0xac1   :  { %5816 = vrsqrt.f32 %v2344_v5  ;;  %v2340_v22 = vmul.f32 0.03125, %v2333_v9 }
 0xac3   :  { %v2345_v2 = vadd.f32 1e-05, %v2340_v22 }
 0xac4   :  { %v2336_v58 = vpop.xlane.xlu1 %2335 }
 0xac5   :  { %5818 = vrsqrt.f32 %v2345_v2  ;;  %v2341_v39 = vmul.f32 0.03125, %v2336_v58 }
 0xac6   :  { %v5813_v1 = vpop.eup %5812 }
 0xac7   :  { %v2352_v13 = vmul.f32 %v5813_v1, %v6946_v42  ;;  %v2346_v29 = vadd.f32 1e-05, %v2341_v39 }
 0xac9   :  { %v2361_v59 = vmul.f32 %v4565_v55, %v2352_v13  ;;  %5820 = vrsqrt.f32 %v2346_v29 }
 0xaca   :  { %v5815_v30 = vpop.eup %5814 }
 0xacb   :  { %v2370_v4 = vadd.f32 %v4566_v18, %v2361_v59  ;;  %v2353_v37 = vmul.f32 %v5815_v30, %v6951_v26  ;;  %v2588_v26 = vld [vmem:[%s7848_s2 + $0x160] sm:$0xff] }
 0xacd   :  { %5343 = vmatmul.mubr.msk.f32.vlgmr.msra.gmra.mxu0 %vm204_vm2, %v2370_v4  ;;  %5366 = vmatmul.mubr.msk.f32.vlgmr.msra.gmra.mxu1 %vm204_vm2, %v2370_v4  ;;  %v2362_v42 = vmul.f32 %v4565_v55, %v2353_v37 }
 0xace   :  { %v5817_v34 = vpop.eup %5816  ;;  %5345 = vmatprep.mubr.msk.f32.mxu0 %vm5937_vm0, %v5936_v0  ;;  %5368 = vmatprep.mubr.msk.f32.mxu1 %vm5937_vm0, %v5936_v0 }
 0xacf   :  { %v2371_v7 = vadd.f32 %v4566_v18, %v2362_v42  ;;  %v2354_v44 = vmul.f32 %v5817_v34, %v6957_v52  ;;  %5381 = vmatpush3.msra.mxu0 %v2589_v51 }
 0xad0   :  { %5382 = vmatprep.subr.mxu0 %v5936_v0 }
 0xad1   :  { %5346 = vmatmul.mubr.msk.f32.gmra.mxu0 %vm204_vm2, %v2371_v7  ;;  %5369 = vmatmul.mubr.msk.f32.gmra.mxu1 %vm204_vm2, %v2371_v7  ;;  %v2363_v33 = vmul.f32 %v4565_v55, %v2354_v44  ;;  %v4579_v44 = vld [vmem:[%s7850_s1 + $0x36] ss:$0 sm:$0xff] }
 0xad2   :  { %v5819_v35 = vpop.eup %5818  ;;  %5348 = vmatprep.mubr.msk.f32.mxu0 %vm5937_vm0, %v5936_v0  ;;  %5371 = vmatprep.mubr.msk.f32.mxu1 %vm5937_vm0, %v5936_v0 }
 0xad3   :  { %v2372_v52 = vadd.f32 %v4566_v18, %v2363_v33  ;;  %v2355_v23 = vmul.f32 %v5819_v35, %v6963_v40  ;;  %5383 = vmatpush3.msra.mxu0 %v2588_v26 }
 0xad4   :  { %5384 = vmatprep.subr.mxu0 %v5936_v0 }
 0xad5   :  { %5349 = vmatmul.mubr.msk.f32.gmra.mxu0 %vm204_vm2, %v2372_v52  ;;  %5372 = vmatmul.mubr.msk.f32.gmra.mxu1 %vm204_vm2, %v2372_v52  ;;  %v2364_v63 = vmul.f32 %v4565_v55, %v2355_v23 }
 0xad6   :  { %v5821_v6 = vpop.eup %5820  ;;  %5351 = vmatprep.mubr.msk.f32.mxu0 %vm5937_vm0, %v5936_v0  ;;  %5374 = vmatprep.mubr.msk.f32.mxu1 %vm5937_vm0, %v5936_v0 }
 0xad7   :  { %v2373_v40 = vadd.f32 %v4566_v18, %v2364_v63  ;;  %v2356_v28 = vmul.f32 %v5821_v6, %v6969_v46  ;;  %5385 = vmatpush3.msra.mxu0 %v2587_v25 }
 0xad8   :  { %5386 = vmatprep.subr.mxu0 %v5936_v0 }
 0xad9   :  { %5352 = vmatmul.mubr.msk.f32.gmra.mxu0 %vm204_vm2, %v2373_v40  ;;  %5375 = vmatmul.mubr.msk.f32.gmra.mxu1 %vm204_vm2, %v2373_v40  ;;  %v2365_v43 = vmul.f32 %v4565_v55, %v2356_v28 }
 0xada   :  { %5354 = vmatprep.mubr.msk.f32.mxu0 %vm5937_vm0, %v5936_v0  ;;  %5377 = vmatprep.mubr.msk.f32.mxu1 %vm5937_vm0, %v5936_v0 }
 0xadb   :  { %v2374_v27 = vadd.f32 %v4566_v18, %v2365_v43  ;;  %5387 = vmatpush3.msra.mxu0 %v2586_v16  ;;  %v4567_v18 = vld [vmem:[%s7850_s1 + $0x34] ss:$0 sm:$0xff] }
 0xadc   :  { %5428 = vmatprep.subr.mxu0 %v5936_v0 }
 0xadd   :  { %5355 = vmatmul.mubr.msk.f32.gmra.mxu0 %vm204_vm2, %v2374_v27  ;;  %5378 = vmatmul.mubr.msk.f32.gmra.mxu1 %vm204_vm2, %v2374_v27 }
 0xade   :  { %5388 = vmatprep.mubr.msk.f32.mxu0 %vm5937_vm0, %v5936_v0  ;;  %5413 = vmatprep.mubr.msk.f32.mxu1 %vm5937_vm0, %v5936_v0 }
 0xae1   :  { %5389 = vmatmul.mubr.msk.f32.vlgmr.msra.gmra.mxu0 %vm204_vm2, %v2370_v4 }
 0xae2   :  { %5391 = vmatprep.mubr.msk.f32.mxu0 %vm5937_vm0, %v5936_v0 }
 0xae5   :  { %5392 = vmatmul.mubr.msk.f32.gmra.mxu0 %vm204_vm2, %v2371_v7 }
 0xae6   :  { %5394 = vmatprep.mubr.msk.f32.mxu0 %vm5937_vm0, %v5936_v0 }
 0xae9   :  { %5395 = vmatmul.mubr.msk.f32.gmra.mxu0 %vm204_vm2, %v2372_v52 }
 0xaea   :  { %5397 = vmatprep.mubr.msk.f32.mxu0 %vm5937_vm0, %v5936_v0 }
 0xaed   :  { %5398 = vmatmul.mubr.msk.f32.gmra.mxu0 %vm204_vm2, %v2373_v40 }
 0xaee   :  { %5400 = vmatprep.mubr.msk.f32.mxu0 %vm5937_vm0, %v5936_v0 }
 0xaf1   :  { %5401 = vmatmul.mubr.msk.f32.gmra.mxu0 %vm204_vm2, %v2374_v27 }
 0xaf2   :  { %5438 = vmatprep.mubr.msk.f32.mxu0 %vm5937_vm0, %v5936_v0 }
 0xb8d   :  { %v2464_v46 = vpop.f32.mrf.mxu0  ;;  %v2562_v11 = vpop.f32.mrf.mxu1 }
 0xb8e   :  { %v7106_v4 = vadd.f32 %v4567_v18, %v2464_v46  ;;  %v7109_v51 = vadd.f32 %v4573_v8, %v2562_v11  ;;  %v7193_v11 = vld [vmem:[%s7850_s1 + $0x40] ss:$0 sm:$0xff] }
 0xb8f   :  { %v5344_v36 = vpop.f32.mrf.mxu0  ;;  %v5367_v38 = vpop.f32.mrf.mxu1 }
 0xb90   :  { %v2684_v34 = vmul.f32 %v6743_v57, %v7106_v4  ;;  %v2989_v36 = vmul.f32 %v7193_v11, %v7106_v4 }
 0xb91   :  { %v2469_v53 = vpop.f32.mrf.mxu0  ;;  %v2567_v47 = vpop.f32.mrf.mxu1 }
 0xb92   :  { %v7102_v59 = vadd.f32 %v4573_v8, %v2567_v47  ;;  %v7115_v7 = vadd.f32 %v4567_v18, %v2469_v53 }
 0xb93   :  { %v5347_v3 = vpop.f32.mrf.mxu0  ;;  %v5370_v31 = vpop.f32.mrf.mxu1 }
 0xb94   :  { %v2685_v25 = vmul.f32 %v6743_v57, %v7115_v7  ;;  %v7155_v57 = vld [vmem:[%s7850_s1 + $0x3f] ss:$0 sm:$0xff]  ;;  %v2990_v38 = vmul.f32 %v7193_v11, %v7115_v7  ;;  %v7238_v31 = vld [vmem:[%s7850_s1 + $0x41] ss:$0 sm:$0xff] }
 0xb95   :  { %v2474_v21 = vpop.f32.mrf.mxu0  ;;  %v2572_v45 = vpop.f32.mrf.mxu1 }
 0xb96   :  { %v7094_v55 = vadd.f32 %v4573_v8, %v2572_v45  ;;  %v7129_v23 = vadd.f32 %v4567_v18, %v2474_v21  ;;  %v3279_v21 = vmul.f32 %v7238_v31, %v7106_v4  ;;  %v3280_v45 = vmul.f32 %v7238_v31, %v7115_v7 }
 0xb97   :  { %v5350_v60 = vpop.f32.mrf.mxu0  ;;  %v5373_v61 = vpop.f32.mrf.mxu1 }
 0xb98   :  { %v2686_v28 = vmul.f32 %v7155_v57, %v7129_v23  ;;  %v2991_v53 = vmul.f32 %v7193_v11, %v7129_v23  ;;  %v3281_v60 = vmul.f32 %v7238_v31, %v7129_v23 }
 0xb99   :  { %v2479_v48 = vpop.f32.mrf.mxu0  ;;  %v2577_v15 = vpop.f32.mrf.mxu1 }
 0xb9a   :  { %v7089_v58 = vadd.f32 %v4573_v8, %v2577_v15  ;;  %v7147_v40 = vadd.f32 %v4567_v18, %v2479_v48  ;;  %v7283_v15 = vld [vmem:[%s7850_s1 + $0x42] ss:$0 sm:$0xff] }
 0xb9b   :  { %v5353_v50 = vpop.f32.mrf.mxu0  ;;  %v5376_v17 = vpop.f32.mrf.mxu1 }
 0xb9c   :  { %v2687_v27 = vmul.f32 %v7155_v57, %v7147_v40  ;;  %v2992_v47 = vmul.f32 %v7193_v11, %v7147_v40  ;;  %v3282_v61 = vmul.f32 %v7238_v31, %v7147_v40  ;;  %v3569_v50 = vmul.f32 %v7283_v15, %v7106_v4 }
 0xb9d   :  { %v7082_v10 = vpop.f32.mrf.mxu0  ;;  %v2582_v14 = vpop.f32.mrf.mxu1  ;;  %v3570_v17 = vmul.f32 %v7283_v15, %v7115_v7 }
 0xb9e   :  { %v7084_v5 = vadd.f32 %v4573_v8, %v2582_v14  ;;  %v7169_v43 = vadd.f32 %v4567_v18, %v7082_v10  ;;  %v3571_v8 = vmul.f32 %v7283_v15, %v7129_v23  ;;  %v3572_v10 = vmul.f32 %v7283_v15, %v7147_v40 }
 0xb9f   :  { %v5356_v9 = vpop.f32.mrf.mxu0  ;;  %v5379_v22 = vpop.f32.mrf.mxu1 }
 0xba0   :  { %5404 = vmatpush3.xpose.msk.msra.mxu1 %vm204_vm2, %v7084_v5  ;;  %v2688_v46 = vmul.f32 %v7155_v57, %v7169_v43  ;;  %v2993_v3 = vmul.f32 %v7193_v11, %v7169_v43  ;;  %v3283_v48 = vmul.f32 %v7238_v31, %v7169_v43  ;;  %v3573_v14 = vmul.f32 %v7283_v15, %v7169_v43 }
 0xba1   :  { %v2660_v2 = vpop.f32.mrf.mxu0  ;;  %5405 = vmatprep.subr.mxu1 %v5936_v0 }
 0xba2   :  { %v7159_v16 = vadd.f32 %v4579_v44, %v2660_v2 }
 0xba3   :  { %v5390_v39 = vpop.f32.mrf.mxu0 }
 0xba4   :  { %5406 = vmatpush3.xpose.msk.msra.mxu1 %vm204_vm2, %v7089_v58 }
 0xba5   :  { %v2665_v1 = vpop.f32.mrf.mxu0  ;;  %5407 = vmatprep.subr.mxu1 %v5936_v0 }
 0xba6   :  { %v7142_v6 = vadd.f32 %v4579_v44, %v2665_v1 }
 0xba7   :  { %v5393_v13 = vpop.f32.mrf.mxu0 }
 0xba8   :  { %5408 = vmatpush3.xpose.msk.msra.mxu1 %vm204_vm2, %v7094_v55 }
 0xba9   :  { %v2670_v29 = vpop.f32.mrf.mxu0  ;;  %5409 = vmatprep.subr.mxu1 %v5936_v0 }
 0xbaa   :  { %v7136_v63 = vadd.f32 %v4579_v44, %v2670_v29 }
 0xbab   :  { %v5396_v30 = vpop.f32.mrf.mxu0 }
 0xbac   :  { %5410 = vmatpush3.xpose.msk.msra.mxu1 %vm204_vm2, %v7102_v59 }
 0xbad   :  { %v2675_v37 = vpop.f32.mrf.mxu0  ;;  %5411 = vmatprep.subr.mxu1 %v5936_v0 }
 0xbae   :  { %v7124_v52 = vadd.f32 %v4579_v44, %v2675_v37 }
 0xbaf   :  { %v5399_v42 = vpop.f32.mrf.mxu0 }
 0xbb0   :  { %5412 = vmatpush3.xpose.msk.msra.mxu1 %vm204_vm2, %v7109_v51 }
 0xbb1   :  { %v2680_v26 = vpop.f32.mrf.mxu0  ;;  %5453 = vmatprep.subr.mxu1 %v5936_v0 }
 0xbb2   :  { %v7121_v33 = vadd.f32 %v4579_v44, %v2680_v26 }
 0xbb3   :  { %v5402_v35 = vpop.f32.mrf.mxu0  ;;  %5414 = vmatmul.mubr.msk.f32.vlgmr.msra.gmra.mxu1 %vm204_vm2, %v2684_v34 }
 0xbb4   :  { %5429 = vmatpush3.msra.mxu0 %v7121_v33  ;;  %5454 = vmatpush3.xpose.msk.msra.mxu1 %vm204_vm2, %v7084_v5 }
 0xbb5   :  { %5430 = vmatprep.subr.mxu0 %v5936_v0  ;;  %5416 = vmatprep.mubr.msk.f32.mxu1 %vm5937_vm0, %v5936_v0 }
 0xbb6   :  { %5431 = vmatpush3.msra.mxu0 %v7124_v52  ;;  %5455 = vmatprep.subr.mxu1 %v5936_v0 }
 0xbb7   :  { %5417 = vmatmul.mubr.msk.f32.gmra.mxu1 %vm204_vm2, %v2685_v25  ;;  %5432 = vmatprep.subr.mxu0 %v5936_v0 }
 0xbb8   :  { %5433 = vmatpush3.msra.mxu0 %v7136_v63  ;;  %5456 = vmatpush3.xpose.msk.msra.mxu1 %vm204_vm2, %v7089_v58 }
 0xbb9   :  { %5434 = vmatprep.subr.mxu0 %v5936_v0  ;;  %5419 = vmatprep.mubr.msk.f32.mxu1 %vm5937_vm0, %v5936_v0 }
 0xbba   :  { %5435 = vmatpush3.msra.mxu0 %v7142_v6  ;;  %5457 = vmatprep.subr.mxu1 %v5936_v0 }
 0xbbb   :  { %5420 = vmatmul.mubr.msk.f32.gmra.mxu1 %vm204_vm2, %v2686_v28  ;;  %5436 = vmatprep.subr.mxu0 %v5936_v0 }
 0xbbc   :  { %5437 = vmatpush3.msra.mxu0 %v7159_v16  ;;  %5458 = vmatpush3.xpose.msk.msra.mxu1 %vm204_vm2, %v7094_v55 }
 0xbbd   :  { %5422 = vmatprep.mubr.msk.f32.mxu1 %vm5937_vm0, %v5936_v0  ;;  %5459 = vmatprep.subr.mxu1 %v5936_v0 }
 0xbbe   :  { %5478 = vmatprep.subr.mxu0 %v5936_v0 }
 0xbbf   :  { %5423 = vmatmul.mubr.msk.f32.gmra.mxu1 %vm204_vm2, %v2687_v27 }
 0xbc0   :  { %5460 = vmatpush3.xpose.msk.msra.mxu1 %vm204_vm2, %v7102_v59  ;;  %5425 = vmatprep.mubr.msk.f32.mxu1 %vm5937_vm0, %v5936_v0 }
 0xbc1   :  { %5461 = vmatprep.subr.mxu1 %v5936_v0 }
 0xbc3   :  { %5426 = vmatmul.mubr.msk.f32.gmra.mxu1 %vm204_vm2, %v2688_v46 }
 0xbc4   :  { %5462 = vmatpush3.xpose.msk.msra.mxu1 %vm204_vm2, %v7109_v51  ;;  %5463 = vmatprep.mubr.msk.f32.mxu1 %vm5937_vm0, %v5936_v0 }
 0xbc5   :  { %5503 = vmatprep.subr.mxu1 %v5936_v0 }
 0xbc7   :  { %5464 = vmatmul.mubr.msk.f32.vlgmr.msra.gmra.mxu1 %vm204_vm2, %v2989_v36 }
 0xbc8   :  { %5504 = vmatpush3.xpose.msk.msra.mxu1 %vm204_vm2, %v7084_v5  ;;  %5466 = vmatprep.mubr.msk.f32.mxu1 %vm5937_vm0, %v5936_v0 }
 0xbc9   :  { %5505 = vmatprep.subr.mxu1 %v5936_v0 }
 0xbcb   :  { %5467 = vmatmul.mubr.msk.f32.gmra.mxu1 %vm204_vm2, %v2990_v38 }
 0xbcc   :  { %5506 = vmatpush3.xpose.msk.msra.mxu1 %vm204_vm2, %v7089_v58  ;;  %5469 = vmatprep.mubr.msk.f32.mxu1 %vm5937_vm0, %v5936_v0 }
 0xbcd   :  { %5507 = vmatprep.subr.mxu1 %v5936_v0 }
 0xbcf   :  { %5470 = vmatmul.mubr.msk.f32.gmra.mxu1 %vm204_vm2, %v2991_v53 }
 0xbd0   :  { %5508 = vmatpush3.xpose.msk.msra.mxu1 %vm204_vm2, %v7094_v55  ;;  %5472 = vmatprep.mubr.msk.f32.mxu1 %vm5937_vm0, %v5936_v0 }
 0xbd1   :  { %5509 = vmatprep.subr.mxu1 %v5936_v0 }
 0xbd3   :  { %5473 = vmatmul.mubr.msk.f32.gmra.mxu1 %vm204_vm2, %v2992_v47 }
 0xbd4   :  { %5510 = vmatpush3.xpose.msk.msra.mxu1 %vm204_vm2, %v7102_v59  ;;  %5475 = vmatprep.mubr.msk.f32.mxu1 %vm5937_vm0, %v5936_v0 }
 0xbd5   :  { %5511 = vmatprep.subr.mxu1 %v5936_v0 }
 0xbd7   :  { %5476 = vmatmul.mubr.msk.f32.gmra.mxu1 %vm204_vm2, %v2993_v3 }
 0xbd8   :  { %5512 = vmatpush3.xpose.msk.msra.mxu1 %vm204_vm2, %v7109_v51  ;;  %5513 = vmatprep.mubr.msk.f32.mxu1 %vm5937_vm0, %v5936_v0 }
 0xbd9   :  { %5553 = vmatprep.subr.mxu1 %v5936_v0 }
 0xbdb   :  { %5514 = vmatmul.mubr.msk.f32.vlgmr.msra.gmra.mxu1 %vm204_vm2, %v3279_v21 }
 0xbdc   :  { %5554 = vmatpush3.xpose.msk.msra.mxu1 %vm204_vm2, %v7084_v5  ;;  %5516 = vmatprep.mubr.msk.f32.mxu1 %vm5937_vm0, %v5936_v0 }
 0xbdd   :  { %5555 = vmatprep.subr.mxu1 %v5936_v0 }
 0xbdf   :  { %5517 = vmatmul.mubr.msk.f32.gmra.mxu1 %vm204_vm2, %v3280_v45 }
 0xbe0   :  { %5556 = vmatpush3.xpose.msk.msra.mxu1 %vm204_vm2, %v7089_v58  ;;  %5519 = vmatprep.mubr.msk.f32.mxu1 %vm5937_vm0, %v5936_v0 }
 0xbe1   :  { %5557 = vmatprep.subr.mxu1 %v5936_v0 }
 0xbe3   :  { %5520 = vmatmul.mubr.msk.f32.gmra.mxu1 %vm204_vm2, %v3281_v60 }
 0xbe4   :  { %5558 = vmatpush3.xpose.msk.msra.mxu1 %vm204_vm2, %v7094_v55  ;;  %5522 = vmatprep.mubr.msk.f32.mxu1 %vm5937_vm0, %v5936_v0 }
 0xbe5   :  { %5559 = vmatprep.subr.mxu1 %v5936_v0 }
 0xbe7   :  { %5523 = vmatmul.mubr.msk.f32.gmra.mxu1 %vm204_vm2, %v3282_v61 }
 0xbe8   :  { %5560 = vmatpush3.xpose.msk.msra.mxu1 %vm204_vm2, %v7102_v59  ;;  %5525 = vmatprep.mubr.msk.f32.mxu1 %vm5937_vm0, %v5936_v0 }
 0xbe9   :  { %5561 = vmatprep.subr.mxu1 %v5936_v0 }
 0xbeb   :  { %5526 = vmatmul.mubr.msk.f32.gmra.mxu1 %vm204_vm2, %v3283_v48 }
 0xbec   :  { %5562 = vmatpush3.xpose.msk.msra.mxu1 %vm204_vm2, %v7109_v51  ;;  %5563 = vmatprep.mubr.msk.f32.mxu1 %vm5937_vm0, %v5936_v0 }
 0xbed   :  { %5603 = vmatprep.subr.mxu1 %v5936_v0 }
 0xbef   :  { %5564 = vmatmul.mubr.msk.f32.vlgmr.msra.gmra.mxu1 %vm204_vm2, %v3569_v50 }
 0xbf0   :  { %5566 = vmatprep.mubr.msk.f32.mxu1 %vm5937_vm0, %v5936_v0 }
 0xbf3   :  { %5567 = vmatmul.mubr.msk.f32.gmra.mxu1 %vm204_vm2, %v3570_v17 }
 0xbf4   :  { %5569 = vmatprep.mubr.msk.f32.mxu1 %vm5937_vm0, %v5936_v0 }
 0xbf7   :  { %5570 = vmatmul.mubr.msk.f32.gmra.mxu1 %vm204_vm2, %v3571_v8 }
 0xbf8   :  { %5572 = vmatprep.mubr.msk.f32.mxu1 %vm5937_vm0, %v5936_v0 }
 0xbfb   :  { %5573 = vmatmul.mubr.msk.f32.gmra.mxu1 %vm204_vm2, %v3572_v10 }
 0xbfc   :  { %5575 = vmatprep.mubr.msk.f32.mxu1 %vm5937_vm0, %v5936_v0 }
 0xbff   :  { %5576 = vmatmul.mubr.msk.f32.gmra.mxu1 %vm204_vm2, %v3573_v14 }
 0xc00   :  { %5611 = vmatprep.mubr.msk.f32.mxu1 %vm5937_vm0, %v5936_v0 }
 0xc73   :  { %v2785_v5 = vpop.f32.mrf.mxu1 }
 0xc74   :  { %v2809_v9 = vmul.f32 0.35355338, %v2785_v5 }
 0xc75   :  { %v5415_v22 = vpop.f32.mrf.mxu1 }
 0xc76   :  { %v7312_v2 = vadd.f32 %v2809_v9, %v6395_v32 }
 0xc77   :  { %v2790_v58 = vpop.f32.mrf.mxu1 }
 0xc78   :  { %v2810_v39 = vmul.f32 0.35355338, %v2790_v58  ;;  %v2819_v1 = vsel %vm737_vm9, %v7312_v2, -inf }
 0xc79   :  { %2820 = vmax.xlane.f32.xlu0 %v2819_v1  ;;  %v5418_v55 = vpop.f32.mrf.mxu1 }
 0xc7a   :  { %v7317_v13 = vadd.f32 %v2810_v39, %v6400_v41 }
 0xc7b   :  { %v2795_v29 = vpop.f32.mrf.mxu1 }
 0xc7c   :  { %v2811_v18 = vmul.f32 0.35355338, %v2795_v29  ;;  %v2822_v59 = vsel %vm737_vm9, %v7317_v13, -inf }
 0xc7d   :  { %2823 = vmax.xlane.f32.xlu1 %v2822_v59  ;;  %v5421_v30 = vpop.f32.mrf.mxu1 }
 0xc7e   :  { %v7322_v4 = vadd.f32 %v2811_v18, %v6407_v49 }
 0xc7f   :  { %v2800_v37 = vpop.f32.mrf.mxu1 }
 0xc80   :  { %v2812_v51 = vmul.f32 0.35355338, %v2800_v37  ;;  %v2825_v42 = vsel %vm737_vm9, %v7322_v4, -inf }
 0xc81   :  { %2826 = vmax.xlane.f32.xlu0 %v2825_v42  ;;  %v5424_v34 = vpop.f32.mrf.mxu1 }
 0xc82   :  { %v7327_v7 = vadd.f32 %v2812_v51, %v6414_v56 }
 0xc83   :  { %v2805_v44 = vpop.f32.mrf.mxu1 }
 0xc84   :  { %v2813_v26 = vmul.f32 0.35355338, %v2805_v44  ;;  %v2828_v35 = vsel %vm737_vm9, %v7327_v7, -inf }
 0xc85   :  { %2829 = vmax.xlane.f32.xlu1 %v2828_v35  ;;  %v5427_v23 = vpop.f32.mrf.mxu1 }
 0xc86   :  { %v7332_v25 = vadd.f32 %v2813_v26, %v6421_v62 }
 0xc87   :  { %v3075_v40 = vpop.f32.mrf.mxu1 }
 0xc88   :  { %v3099_v28 = vmul.f32 0.35355338, %v3075_v40  ;;  %v2831_v43 = vsel %vm737_vm9, %v7332_v25, -inf }
 0xc89   :  { %2832 = vmax.xlane.f32.xlu0 %v2831_v43  ;;  %v5465_v27 = vpop.f32.mrf.mxu1 }
 0xc8a   :  { %v7337_v46 = vadd.f32 %v3099_v28, %v6395_v32 }
 0xc8b   :  { %v3080_v36 = vpop.f32.mrf.mxu1 }
 0xc8c   :  { %v3100_v38 = vmul.f32 0.35355338, %v3080_v36  ;;  %v3109_v53 = vsel %vm737_vm9, %v7337_v46, -inf }
 0xc8d   :  { %3110 = vmax.xlane.f32.xlu1 %v3109_v53  ;;  %v5468_v47 = vpop.f32.mrf.mxu1 }
 0xc8e   :  { %v7342_v3 = vadd.f32 %v3100_v38, %v6400_v41 }
 0xc8f   :  { %v3085_v21 = vpop.f32.mrf.mxu1 }
 0xc90   :  { %v3101_v45 = vmul.f32 0.35355338, %v3085_v21  ;;  %v3112_v60 = vsel %vm737_vm9, %v7342_v3, -inf }
 0xc91   :  { %3113 = vmax.xlane.f32.xlu0 %v3112_v60  ;;  %v5471_v61 = vpop.f32.mrf.mxu1 }
 0xc92   :  { %v7347_v48 = vadd.f32 %v3101_v45, %v6407_v49 }
 0xc93   :  { %v3090_v50 = vpop.f32.mrf.mxu1 }
 0xc94   :  { %v3102_v17 = vmul.f32 0.35355338, %v3090_v50  ;;  %v3115_v8 = vsel %vm737_vm9, %v7347_v48, -inf }
 0xc95   :  { %3116 = vmax.xlane.f32.xlu1 %v3115_v8  ;;  %v5474_v10 = vpop.f32.mrf.mxu1 }
 0xc96   :  { %v7352_v14 = vadd.f32 %v3102_v17, %v6414_v56 }
 0xc97   :  { %v3095_v5 = vpop.f32.mrf.mxu1 }
 0xc98   :  { %v3103_v9 = vmul.f32 0.35355338, %v3095_v5  ;;  %v3118_v22 = vsel %vm737_vm9, %v7352_v14, -inf }
 0xc99   :  { %3119 = vmax.xlane.f32.xlu0 %v3118_v22  ;;  %v5477_v58 = vpop.f32.mrf.mxu1 }
 0xc9a   :  { %v7357_v39 = vadd.f32 %v3103_v9, %v6421_v62 }
 0xc9b   :  { %v3365_v1 = vpop.f32.mrf.mxu1 }
 0xc9c   :  { %v3389_v55 = vmul.f32 0.35355338, %v3365_v1  ;;  %v3121_v29 = vsel %vm737_vm9, %v7357_v39, -inf }
 0xc9d   :  { %3122 = vmax.xlane.f32.xlu1 %v3121_v29  ;;  %v5515_v18 = vpop.f32.mrf.mxu1 }
 0xc9e   :  { %v7362_v59 = vadd.f32 %v3389_v55, %v6395_v32 }
 0xc9f   :  { %v3370_v30 = vpop.f32.mrf.mxu1 }
 0xca0   :  { %v3390_v37 = vmul.f32 0.35355338, %v3370_v30  ;;  %v3399_v51 = vsel %vm737_vm9, %v7362_v59, -inf }
 0xca1   :  { %3400 = vmax.xlane.f32.xlu0 %v3399_v51  ;;  %v5518_v42 = vpop.f32.mrf.mxu1 }
 0xca2   :  { %v7367_v34 = vadd.f32 %v3390_v37, %v6400_v41 }
 0xca3   :  { %v3375_v44 = vpop.f32.mrf.mxu1 }
 0xca4   :  { %v3391_v26 = vmul.f32 0.35355338, %v3375_v44  ;;  %v3402_v35 = vsel %vm737_vm9, %v7367_v34, -inf }
 0xca5   :  { %3403 = vmax.xlane.f32.xlu1 %v3402_v35  ;;  %v5521_v23 = vpop.f32.mrf.mxu1 }
 0xca6   :  { %v7372_v40 = vadd.f32 %v3391_v26, %v6407_v49 }
 0xca7   :  { %v3380_v28 = vpop.f32.mrf.mxu1 }
 0xca8   :  { %v3392_v43 = vmul.f32 0.35355338, %v3380_v28  ;;  %v3405_v27 = vsel %vm737_vm9, %v7372_v40, -inf }
 0xca9   :  { %3406 = vmax.xlane.f32.xlu0 %v3405_v27  ;;  %v5524_v36 = vpop.f32.mrf.mxu1 }
 0xcaa   :  { %v7377_v38 = vadd.f32 %v3392_v43, %v6414_v56 }
 0xcab   :  { %v3385_v53 = vpop.f32.mrf.mxu1 }
 0xcac   :  { %v3393_v47 = vmul.f32 0.35355338, %v3385_v53  ;;  %v3408_v21 = vsel %vm737_vm9, %v7377_v38, -inf }
 0xcad   :  { %3409 = vmax.xlane.f32.xlu1 %v3408_v21  ;;  %v5527_v45 = vpop.f32.mrf.mxu1 }
 0xcae   :  { %v7382_v60 = vadd.f32 %v3393_v47, %v6421_v62 }
 0xcaf   :  { %v3655_v61 = vpop.f32.mrf.mxu1 }
 0xcb0   :  { %v3679_v50 = vmul.f32 0.35355338, %v3655_v61  ;;  %v3411_v17 = vsel %vm737_vm9, %v7382_v60, -inf }
 0xcb1   :  { %3412 = vmax.xlane.f32.xlu0 %v3411_v17  ;;  %v5565_v8 = vpop.f32.mrf.mxu1 }
 0xcb2   :  { %v7387_v10 = vadd.f32 %v3679_v50, %v6395_v32 }
 0xcb3   :  { %v7389_v5 = vpop.f32.mrf.mxu1 }
 0xcb4   :  { %v3689_v9 = vsel %vm737_vm9, %v7387_v10, -inf }
 0xcb5   :  { %3690 = vmax.xlane.f32.xlu1 %v3689_v9  ;;  %v5568_v22 = vpop.f32.mrf.mxu1 }
 0xcb7   :  { %v7393_v58 = vpop.f32.mrf.mxu1 }
 0xcb9   :  { %v5571_v1 = vpop.f32.mrf.mxu1 }
 0xcbb   :  { %v7395_v55 = vpop.f32.mrf.mxu1 }
 0xcbd   :  { %v5574_v29 = vpop.f32.mrf.mxu1 }
 0xcbf   :  { %v7397_v18 = vpop.f32.mrf.mxu1 }
 0xcc1   :  { %v5577_v30 = vpop.f32.mrf.mxu1 }
 0xd02   :  { %v2821_v37 = vpop.xlane.xlu0 %2820 }
 0xd03   :  { %v2834_v32 = vsub.f32 %v7312_v2, %v2821_v37 }
 0xd05   :  { %v2839_v51 = vmul.f32 1.442695, %v2834_v32 }
 0xd06   :  { %v2824_v42 = vpop.xlane.xlu1 %2823 }
 0xd07   :  { %5822 = vpow2.f32 %v2839_v51  ;;  %v2835_v44 = vsub.f32 %v7317_v13, %v2824_v42 }
 0xd09   :  { %v2841_v26 = vmul.f32 1.442695, %v2835_v44 }
 0xd0a   :  { %v2827_v35 = vpop.xlane.xlu0 %2826 }
 0xd0b   :  { %5824 = vpow2.f32 %v2841_v26  ;;  %v2836_v23 = vsub.f32 %v7322_v4, %v2827_v35 }
 0xd0d   :  { %v2843_v28 = vmul.f32 1.442695, %v2836_v23 }
 0xd0e   :  { %v2830_v43 = vpop.xlane.xlu1 %2829 }
 0xd0f   :  { %5826 = vpow2.f32 %v2843_v28  ;;  %v2837_v27 = vsub.f32 %v7327_v7, %v2830_v43 }
 0xd11   :  { %v2845_v36 = vmul.f32 1.442695, %v2837_v27 }
 0xd12   :  { %v2833_v53 = vpop.xlane.xlu0 %2832 }
 0xd13   :  { %5828 = vpow2.f32 %v2845_v36  ;;  %v2838_v2 = vsub.f32 %v7332_v25, %v2833_v53 }
 0xd14   :  { %v7404_v47 = vpop.eup %5822 }
 0xd15   :  { %v2847_v21 = vmul.f32 1.442695, %v2838_v2  ;;  %v2849_v13 = vsel %vm737_vm9, %v7404_v47, 0.0 }
 0xd16   :  { %v3111_v45 = vpop.xlane.xlu1 %3110  ;;  %2850 = vadd.xlane.f32.xlu0 %v2849_v13 }
 0xd17   :  { %5830 = vpow2.f32 %v2847_v21  ;;  %v3124_v4 = vsub.f32 %v7337_v46, %v3111_v45 }
 0xd18   :  { %v7409_v61 = vpop.eup %5824 }
 0xd19   :  { %v3129_v50 = vmul.f32 1.442695, %v3124_v4  ;;  %v2852_v7 = vsel %vm737_vm9, %v7409_v61, 0.0 }
 0xd1a   :  { %v3114_v17 = vpop.xlane.xlu0 %3113  ;;  %2853 = vadd.xlane.f32.xlu1 %v2852_v7 }
 0xd1b   :  { %5832 = vpow2.f32 %v3129_v50  ;;  %v3125_v25 = vsub.f32 %v7342_v3, %v3114_v17 }
 0xd1c   :  { %v7414_v8 = vpop.eup %5826 }
 0xd1d   :  { %v3131_v9 = vmul.f32 1.442695, %v3125_v25  ;;  %v2855_v22 = vsel %vm737_vm9, %v7414_v8, 0.0 }
 0xd1e   :  { %v3117_v1 = vpop.xlane.xlu1 %3116  ;;  %2856 = vadd.xlane.f32.xlu0 %v2855_v22 }
 0xd1f   :  { %5834 = vpow2.f32 %v3131_v9  ;;  %v3126_v46 = vsub.f32 %v7347_v48, %v3117_v1 }
 0xd20   :  { %v7419_v29 = vpop.eup %5828 }
 0xd21   :  { %v3133_v30 = vmul.f32 1.442695, %v3126_v46  ;;  %v2858_v37 = vsel %vm737_vm9, %v7419_v29, 0.0 }
 0xd22   :  { %v3120_v32 = vpop.xlane.xlu0 %3119  ;;  %2859 = vadd.xlane.f32.xlu1 %v2858_v37 }
 0xd23   :  { %5836 = vpow2.f32 %v3133_v30  ;;  %v3127_v3 = vsub.f32 %v7352_v14, %v3120_v32 }
 0xd24   :  { %v7424_v51 = vpop.eup %5830 }
 0xd25   :  { %v3135_v42 = vmul.f32 1.442695, %v3127_v3  ;;  %v2861_v44 = vsel %vm737_vm9, %v7424_v51, 0.0 }
 0xd26   :  { %v3123_v26 = vpop.xlane.xlu1 %3122  ;;  %2862 = vadd.xlane.f32.xlu0 %v2861_v44 }
 0xd27   :  { %5838 = vpow2.f32 %v3135_v42  ;;  %v3128_v48 = vsub.f32 %v7357_v39, %v3123_v26 }
 0xd28   :  { %v7429_v35 = vpop.eup %5832 }
 0xd29   :  { %v3137_v23 = vmul.f32 1.442695, %v3128_v48  ;;  %v3139_v28 = vsel %vm737_vm9, %v7429_v35, 0.0 }
 0xd2a   :  { %v3401_v43 = vpop.xlane.xlu0 %3400  ;;  %3140 = vadd.xlane.f32.xlu1 %v3139_v28  ;;  %v3680_v28 = vmul.f32 0.35355338, %v7389_v5 }
 0xd2b   :  { %5840 = vpow2.f32 %v3137_v23  ;;  %v3414_v14 = vsub.f32 %v7362_v59, %v3401_v43 }
 0xd2c   :  { %v7434_v27 = vpop.eup %5834 }
 0xd2d   :  { %v3419_v36 = vmul.f32 1.442695, %v3414_v14  ;;  %v3142_v53 = vsel %vm737_vm9, %v7434_v27, 0.0  ;;  %v7475_v14 = vadd.f32 %v3680_v28, %v6400_v41  ;;  %v3683_v41 = vmul.f32 0.35355338, %v7397_v18 }
 0xd2e   :  { %v3404_v2 = vpop.xlane.xlu1 %3403  ;;  %3143 = vadd.xlane.f32.xlu0 %v3142_v53  ;;  %v3682_v53 = vmul.f32 0.35355338, %v7395_v55 }
 0xd2f   :  { %5842 = vpow2.f32 %v3419_v36  ;;  %v3415_v39 = vsub.f32 %v7367_v34, %v3404_v2  ;;  %v3681_v36 = vmul.f32 0.35355338, %v7393_v58  ;;  %v3692_v5 = vsel %vm737_vm9, %v7475_v14, -inf }
 0xd30   :  { %v7439_v21 = vpop.eup %5836  ;;  %v7495_v55 = vadd.f32 %v3683_v41, %v6421_v62 }
 0xd31   :  { %v3421_v13 = vmul.f32 1.442695, %v3415_v39  ;;  %v3145_v45 = vsel %vm737_vm9, %v7439_v21, 0.0 }
 0xd32   :  { %v3407_v4 = vpop.xlane.xlu0 %3406  ;;  %3146 = vadd.xlane.f32.xlu1 %v3145_v45  ;;  %v7489_v45 = vadd.f32 %v3682_v53, %v6414_v56  ;;  %v3701_v56 = vsel %vm737_vm9, %v7495_v55, -inf }
 0xd33   :  { %5844 = vpow2.f32 %v3421_v13  ;;  %v3416_v59 = vsub.f32 %v7372_v40, %v3407_v4  ;;  %v7486_v13 = vadd.f32 %v3681_v36, %v6407_v49 }
 0xd34   :  { %v7444_v50 = vpop.eup %5838  ;;  %v3698_v49 = vsel %vm737_vm9, %v7489_v45, -inf }
 0xd35   :  { %v3423_v7 = vmul.f32 1.442695, %v3416_v59  ;;  %v3148_v17 = vsel %vm737_vm9, %v7444_v50, 0.0  ;;  %v3695_v4 = vsel %vm737_vm9, %v7486_v13, -inf }
 0xd36   :  { %v3410_v25 = vpop.xlane.xlu1 %3409  ;;  %3149 = vadd.xlane.f32.xlu0 %v3148_v17 }
 0xd37   :  { %5846 = vpow2.f32 %v3423_v7  ;;  %v3417_v34 = vsub.f32 %v7377_v38, %v3410_v25 }
 0xd38   :  { %v7449_v9 = vpop.eup %5840 }
 0xd39   :  { %v3425_v22 = vmul.f32 1.442695, %v3417_v34  ;;  %v3151_v1 = vsel %vm737_vm9, %v7449_v9, 0.0 }
 0xd3a   :  { %v3413_v46 = vpop.xlane.xlu0 %3412  ;;  %3152 = vadd.xlane.f32.xlu1 %v3151_v1 }
 0xd3b   :  { %5848 = vpow2.f32 %v3425_v22  ;;  %v3418_v40 = vsub.f32 %v7382_v60, %v3413_v46 }
 0xd3c   :  { %v7454_v30 = vpop.eup %5842 }
 0xd3d   :  { %v3427_v37 = vmul.f32 1.442695, %v3418_v40  ;;  %v3429_v32 = vsel %vm737_vm9, %v7454_v30, 0.0 }
 0xd3e   :  { %3430 = vadd.xlane.f32.xlu0 %v3429_v32  ;;  %v3691_v3 = vpop.xlane.xlu1 %3690 }
 0xd3f   :  { %5850 = vpow2.f32 %v3427_v37  ;;  %v3704_v38 = vsub.f32 %v7387_v10, %v3691_v3 }
 0xd40   :  { %v7459_v42 = vpop.eup %5844 }
 0xd41   :  { %v3709_v44 = vmul.f32 1.442695, %v3704_v38  ;;  %v3432_v26 = vsel %vm737_vm9, %v7459_v42, 0.0 }
 0xd42   :  { %3433 = vadd.xlane.f32.xlu1 %v3432_v26 }
 0xd43   :  { %5852 = vpow2.f32 %v3709_v44 }
 0xd44   :  { %v7463_v60 = vpop.eup %5846 }
 0xd45   :  { %v3435_v48 = vsel %vm737_vm9, %v7463_v60, 0.0 }
 0xd46   :  { %3436 = vadd.xlane.f32.xlu0 %v3435_v48 }
 0xd48   :  { %v7467_v23 = vpop.eup %5848 }
 0xd49   :  { %v3438_v10 = vsel %vm737_vm9, %v7467_v23, 0.0 }
 0xd4a   :  { %3439 = vadd.xlane.f32.xlu1 %v3438_v10 }
 0xd4c   :  { %v7472_v43 = vpop.eup %5850 }
 0xd4d   :  { %v3441_v2 = vsel %vm737_vm9, %v7472_v43, 0.0 }
 0xd4e   :  { %3442 = vadd.xlane.f32.xlu0 %v3441_v2 }
 0xd50   :  { %v7481_v39 = vpop.eup %5852 }
 0xd51   :  { %v3719_v58 = vsel %vm737_vm9, %v7481_v39, 0.0 }
 0xd52   :  { %3720 = vadd.xlane.f32.xlu1 %v3719_v58  ;;  %3693 = vmax.xlane.f32.xlu0 %v3692_v5 }
 0xd56   :  { %3696 = vmax.xlane.f32.xlu1 %v3695_v4  ;;  %3699 = vmax.xlane.f32.xlu0 %v3698_v49 }
 0xd5a   :  { %3702 = vmax.xlane.f32.xlu1 %v3701_v56 }
 0xd9f   :  { %v2851_v18 = vpop.xlane.xlu0 %2850 }
 0xda0   :  { %5854 = vrcp.f32 %v2851_v18 }
 0xda3   :  { %v2854_v59 = vpop.xlane.xlu1 %2853 }
 0xda4   :  { %5856 = vrcp.f32 %v2854_v59 }
 0xda7   :  { %v2857_v7 = vpop.xlane.xlu0 %2856 }
 0xda8   :  { %5858 = vrcp.f32 %v2857_v7 }
 0xdab   :  { %v2860_v62 = vpop.xlane.xlu1 %2859 }
 0xdac   :  { %5860 = vrcp.f32 %v2860_v62 }
 0xdad   :  { %v5855_v17 = vpop.eup %5854 }
 0xdae   :  { %v2865_v25 = vmul.f32 %v5855_v17, %v7404_v47 }
 0xdaf   :  { %v2863_v34 = vpop.xlane.xlu0 %2862 }
 0xdb0   :  { %5862 = vrcp.f32 %v2863_v34  ;;  %5439 = vmatmul.mubr.msk.f32.vlgmr.msra.gmra.mxu0 %vm737_vm9, %v2865_v25 }
 0xdb1   :  { %v5857_v22 = vpop.eup %5856  ;;  %5479 = vmatpush3.msra.mxu0 %v7121_v33  ;;  %5441 = vmatprep.mubr.msk.f32.mxu0 %vm5937_vm0, %v5936_v0 }
 0xdb2   :  { %5480 = vmatprep.subr.mxu0 %v5936_v0  ;;  %v2867_v1 = vmul.f32 %v5857_v22, %v7409_v61 }
 0xdb3   :  { %5481 = vmatpush3.msra.mxu0 %v7124_v52  ;;  %v3141_v46 = vpop.xlane.xlu1 %3140 }
 0xdb4   :  { %5864 = vrcp.f32 %v3141_v46  ;;  %5482 = vmatprep.subr.mxu0 %v5936_v0  ;;  %5442 = vmatmul.mubr.msk.f32.gmra.mxu0 %vm737_vm9, %v2867_v1 }
 0xdb5   :  { %v5859_v47 = vpop.eup %5858  ;;  %5483 = vmatpush3.msra.mxu0 %v7136_v63  ;;  %5444 = vmatprep.mubr.msk.f32.mxu0 %vm5937_vm0, %v5936_v0 }
 0xdb6   :  { %5484 = vmatprep.subr.mxu0 %v5936_v0  ;;  %v2869_v40 = vmul.f32 %v5859_v47, %v7414_v8 }
 0xdb7   :  { %5485 = vmatpush3.msra.mxu0 %v7142_v6  ;;  %v3144_v61 = vpop.xlane.xlu0 %3143 }
 0xdb8   :  { %5866 = vrcp.f32 %v3144_v61  ;;  %5486 = vmatprep.subr.mxu0 %v5936_v0  ;;  %5445 = vmatmul.mubr.msk.f32.gmra.mxu0 %vm737_vm9, %v2869_v40 }
 0xdb9   :  { %v5861_v37 = vpop.eup %5860  ;;  %5487 = vmatpush3.msra.mxu0 %v7159_v16  ;;  %5447 = vmatprep.mubr.msk.f32.mxu0 %vm5937_vm0, %v5936_v0 }
 0xdba   :  { %v2871_v32 = vmul.f32 %v5861_v37, %v7419_v29  ;;  %5528 = vmatprep.subr.mxu0 %v5936_v0 }
 0xdbb   :  { %v3147_v3 = vpop.xlane.xlu1 %3146 }
 0xdbc   :  { %5868 = vrcp.f32 %v3147_v3  ;;  %5448 = vmatmul.mubr.msk.f32.gmra.mxu0 %vm737_vm9, %v2871_v32  ;;  %v3862_v32 = vld [vmem:[%s7848_s2 + $0x188] sm:$0xff]  ;;  %v3861_v3 = vld [vmem:[%s7848_s2 + $0x180] sm:$0xff] }
 0xdbd   :  { %v5863_v8 = vpop.eup %5862  ;;  %5450 = vmatprep.mubr.msk.f32.mxu0 %vm5937_vm0, %v5936_v0  ;;  %5604 = vmatpush3.msra.mxu1 %v3862_v32 }
 0xdbe   :  { %v2873_v38 = vmul.f32 %v5863_v8, %v7424_v51  ;;  %5605 = vmatprep.subr.mxu1 %v5936_v0  ;;  %v3860_v8 = vld [vmem:[%s7848_s2 + $0x178] sm:$0xff] }
 0xdbf   :  { %v3150_v44 = vpop.xlane.xlu0 %3149  ;;  %5606 = vmatpush3.msra.mxu1 %v3861_v3 }
 0xdc0   :  { %5870 = vrcp.f32 %v3150_v44  ;;  %5451 = vmatmul.mubr.msk.f32.gmra.mxu0 %vm737_vm9, %v2873_v38  ;;  %5607 = vmatprep.subr.mxu1 %v5936_v0  ;;  %v3859_v38 = vld [vmem:[%s7848_s2 + $0x170] sm:$0xff] }
 0xdc1   :  { %v5865_v26 = vpop.eup %5864  ;;  %5488 = vmatprep.mubr.msk.f32.mxu0 %vm5937_vm0, %v5936_v0  ;;  %5608 = vmatpush3.msra.mxu1 %v3860_v8 }
 0xdc2   :  { %v3155_v29 = vmul.f32 %v5865_v26, %v7429_v35  ;;  %5609 = vmatprep.subr.mxu1 %v5936_v0 }
 0xdc3   :  { %v3153_v48 = vpop.xlane.xlu1 %3152  ;;  %5610 = vmatpush3.msra.mxu1 %v3859_v38 }
 0xdc4   :  { %5872 = vrcp.f32 %v3153_v48  ;;  %5489 = vmatmul.mubr.msk.f32.vlgmr.msra.gmra.mxu0 %vm737_vm9, %v3155_v29  ;;  %5649 = vmatprep.subr.mxu1 %v5936_v0 }
 0xdc5   :  { %v5867_v28 = vpop.eup %5866  ;;  %5529 = vmatpush3.msra.mxu0 %v7121_v33  ;;  %5491 = vmatprep.mubr.msk.f32.mxu0 %vm5937_vm0, %v5936_v0 }
 0xdc6   :  { %5530 = vmatprep.subr.mxu0 %v5936_v0  ;;  %v3157_v51 = vmul.f32 %v5867_v28, %v7434_v27 }
 0xdc7   :  { %5531 = vmatpush3.msra.mxu0 %v7124_v52  ;;  %v3431_v10 = vpop.xlane.xlu0 %3430 }
 0xdc8   :  { %5874 = vrcp.f32 %v3431_v10  ;;  %5532 = vmatprep.subr.mxu0 %v5936_v0  ;;  %5492 = vmatmul.mubr.msk.f32.gmra.mxu0 %vm737_vm9, %v3157_v51 }
 0xdc9   :  { %v5869_v35 = vpop.eup %5868  ;;  %5533 = vmatpush3.msra.mxu0 %v7136_v63  ;;  %5494 = vmatprep.mubr.msk.f32.mxu0 %vm5937_vm0, %v5936_v0 }
 0xdca   :  { %5534 = vmatprep.subr.mxu0 %v5936_v0  ;;  %v3159_v36 = vmul.f32 %v5869_v35, %v7439_v21 }
 0xdcb   :  { %5535 = vmatpush3.msra.mxu0 %v7142_v6  ;;  %v3434_v27 = vpop.xlane.xlu1 %3433 }
 0xdcc   :  { %5876 = vrcp.f32 %v3434_v27  ;;  %5536 = vmatprep.subr.mxu0 %v5936_v0  ;;  %5495 = vmatmul.mubr.msk.f32.gmra.mxu0 %vm737_vm9, %v3159_v36 }
 0xdcd   :  { %v5871_v53 = vpop.eup %5870  ;;  %5537 = vmatpush3.msra.mxu0 %v7159_v16  ;;  %5497 = vmatprep.mubr.msk.f32.mxu0 %vm5937_vm0, %v5936_v0 }
 0xdce   :  { %v3161_v2 = vmul.f32 %v5871_v53, %v7444_v50  ;;  %5578 = vmatprep.subr.mxu0 %v5936_v0 }
 0xdcf   :  { %v3437_v5 = vpop.xlane.xlu0 %3436 }
 0xdd0   :  { %5878 = vrcp.f32 %v3437_v5  ;;  %5498 = vmatmul.mubr.msk.f32.gmra.mxu0 %vm737_vm9, %v3161_v2 }
 0xdd1   :  { %v5873_v21 = vpop.eup %5872  ;;  %5500 = vmatprep.mubr.msk.f32.mxu0 %vm5937_vm0, %v5936_v0 }
 0xdd2   :  { %v3163_v41 = vmul.f32 %v5873_v21, %v7449_v9 }
 0xdd3   :  { %v3440_v58 = vpop.xlane.xlu1 %3439 }
 0xdd4   :  { %5880 = vrcp.f32 %v3440_v58  ;;  %5501 = vmatmul.mubr.msk.f32.gmra.mxu0 %vm737_vm9, %v3163_v41 }
 0xdd5   :  { %v5875_v4 = vpop.eup %5874  ;;  %5538 = vmatprep.mubr.msk.f32.mxu0 %vm5937_vm0, %v5936_v0 }
 0xdd6   :  { %v3445_v50 = vmul.f32 %v5875_v4, %v7454_v30 }
 0xdd7   :  { %v3443_v49 = vpop.xlane.xlu0 %3442 }
 0xdd8   :  { %5882 = vrcp.f32 %v3443_v49  ;;  %5539 = vmatmul.mubr.msk.f32.vlgmr.msra.gmra.mxu0 %vm737_vm9, %v3445_v50 }
 0xdd9   :  { %v5877_v56 = vpop.eup %5876  ;;  %5579 = vmatpush3.msra.mxu0 %v7121_v33  ;;  %5541 = vmatprep.mubr.msk.f32.mxu0 %vm5937_vm0, %v5936_v0 }
 0xdda   :  { %5580 = vmatprep.subr.mxu0 %v5936_v0  ;;  %v3447_v9 = vmul.f32 %v5877_v56, %v7459_v42 }
 0xddb   :  { %5581 = vmatpush3.msra.mxu0 %v7124_v52  ;;  %v3721_v18 = vpop.xlane.xlu1 %3720  ;;  %v3694_v59 = vpop.xlane.xlu0 %3693 }
 0xddc   :  { %5884 = vrcp.f32 %v3721_v18  ;;  %v3705_v30 = vsub.f32 %v7475_v14, %v3694_v59  ;;  %5582 = vmatprep.subr.mxu0 %v5936_v0  ;;  %5542 = vmatmul.mubr.msk.f32.gmra.mxu0 %vm737_vm9, %v3447_v9 }
 0xddd   :  { %v5879_v7 = vpop.eup %5878  ;;  %5583 = vmatpush3.msra.mxu0 %v7136_v63  ;;  %5544 = vmatprep.mubr.msk.f32.mxu0 %vm5937_vm0, %v5936_v0 }
 0xdde   :  { %v3711_v33 = vmul.f32 1.442695, %v3705_v30  ;;  %5584 = vmatprep.subr.mxu0 %v5936_v0  ;;  %v3449_v52 = vmul.f32 %v5879_v7, %v7463_v60 }
 0xddf   :  { %5585 = vmatpush3.msra.mxu0 %v7142_v6  ;;  %v3697_v42 = vpop.xlane.xlu1 %3696  ;;  %v3700_v62 = vpop.xlane.xlu0 %3699 }
 0xde0   :  { %5886 = vpow2.f32 %v3711_v33  ;;  %v3706_v14 = vsub.f32 %v7486_v13, %v3697_v42  ;;  %v3707_v17 = vsub.f32 %v7489_v45, %v3700_v62  ;;  %5586 = vmatprep.subr.mxu0 %v5936_v0  ;;  %5545 = vmatmul.mubr.msk.f32.gmra.mxu0 %vm737_vm9, %v3449_v52  ;;  %v5932_v42 = vld [vmem:[%s7850_s1 + $0x3f] ss:$0 sm:$0xff] }
 0xde1   :  { %v5881_v63 = vpop.eup %5880  ;;  %5587 = vmatpush3.msra.mxu0 %v7159_v16  ;;  %5547 = vmatprep.mubr.msk.f32.mxu0 %vm5937_vm0, %v5936_v0 }
 0xde2   :  { %v3713_v60 = vmul.f32 1.442695, %v3706_v14  ;;  %v3715_v25 = vmul.f32 1.442695, %v3707_v17  ;;  %v3451_v6 = vmul.f32 %v5881_v63, %v7467_v23  ;;  %5626 = vmatprep.subr.mxu0 %v5936_v0 }
 0xde3   :  { %v3703_v34 = vpop.xlane.xlu1 %3702 }
 0xde4   :  { %5888 = vpow2.f32 %v3713_v60  ;;  %v3708_v13 = vsub.f32 %v7495_v55, %v3703_v34  ;;  %5548 = vmatmul.mubr.msk.f32.gmra.mxu0 %vm737_vm9, %v3451_v6 }
 0xde5   :  { %v5883_v45 = vpop.eup %5882  ;;  %5890 = vpow2.f32 %v3715_v25  ;;  %5550 = vmatprep.mubr.msk.f32.mxu0 %vm5937_vm0, %v5936_v0 }
 0xde6   :  { %v3717_v16 = vmul.f32 1.442695, %v3708_v13  ;;  %v3453_v22 = vmul.f32 %v5883_v45, %v7472_v43 }
 0xde8   :  { %5892 = vpow2.f32 %v3717_v16  ;;  %5551 = vmatmul.mubr.msk.f32.gmra.mxu0 %vm737_vm9, %v3453_v22 }
 0xde9   :  { %v5885_v23 = vpop.eup %5884  ;;  %5588 = vmatprep.mubr.msk.f32.mxu0 %vm5937_vm0, %v5936_v0 }
 0xdea   :  { %v3735_v1 = vmul.f32 %v5885_v23, %v7481_v39 }
 0xdec   :  { %5589 = vmatmul.mubr.msk.f32.vlgmr.msra.gmra.mxu0 %vm737_vm9, %v3735_v1  ;;  %v5933_v1 = vld [vmem:[%s7850_s1 + $0x40] ss:$0 sm:$0xff] }
 0xded   :  { %v5887_v55 = vpop.eup %5886  ;;  %5591 = vmatprep.mubr.msk.f32.mxu0 %vm5937_vm0, %v5936_v0 }
 0xdee   :  { %v3722_v46 = vsel %vm737_vm9, %v5887_v55, 0.0 }
 0xdef   :  { %3723 = vadd.xlane.f32.xlu0 %v3722_v46 }
 0xdf1   :  { %v5889_v47 = vpop.eup %5888 }
 0xdf2   :  { %v5891_v43 = vpop.eup %5890  ;;  %v3725_v40 = vsel %vm737_vm9, %v5889_v47, 0.0 }
 0xdf3   :  { %v3728_v61 = vsel %vm737_vm9, %v5891_v43, 0.0  ;;  %3726 = vadd.xlane.f32.xlu1 %v3725_v40 }
 0xdf4   :  { %3729 = vadd.xlane.f32.xlu0 %v3728_v61 }
 0xdf5   :  { %v7604_v37 = vpop.eup %5892 }
 0xdf6   :  { %v3731_v39 = vsel %vm737_vm9, %v7604_v37, 0.0 }
 0xdf7   :  { %3732 = vadd.xlane.f32.xlu1 %v3731_v39 }
 0xe70   :  { %v7624_v44 = vpop.f32.mrf.mxu0 }
 0xe72   :  { %v5440_v26 = vpop.f32.mrf.mxu0 }
 0xe74   :  { %v2960_v29 = vpop.f32.mrf.mxu0 }
 0xe75   :  { %v2980_v56 = vmul.f32 %v7155_v57, %v2960_v29 }
 0xe76   :  { %v5443_v48 = vpop.f32.mrf.mxu0 }
 0xe78   :  { %v3724_v28 = vpop.xlane.xlu0 %3723  ;;  %v2965_v51 = vpop.f32.mrf.mxu0 }
 0xe79   :  { %5894 = vrcp.f32 %v3724_v28  ;;  %v2981_v62 = vmul.f32 %v5932_v42, %v2965_v51 }
 0xe7a   :  { %v5446_v10 = vpop.f32.mrf.mxu0 }
 0xe7c   :  { %v3727_v35 = vpop.xlane.xlu1 %3726  ;;  %v2970_v36 = vpop.f32.mrf.mxu0 }
 0xe7d   :  { %v3730_v27 = vpop.xlane.xlu0 %3729  ;;  %5896 = vrcp.f32 %v3727_v35  ;;  %v2982_v6 = vmul.f32 %v5932_v42, %v2970_v36  ;;  %v2979_v35 = vmul.f32 %v5932_v42, %v7624_v44  ;;  %v5934_v36 = vld [vmem:[%s7850_s1 + $0x41] ss:$0 sm:$0xff] }
 0xe7e   :  { %v5449_v53 = vpop.f32.mrf.mxu0  ;;  %5898 = vrcp.f32 %v3730_v27 }
 0xe80   :  { %v3733_v2 = vpop.xlane.xlu1 %3732  ;;  %v2975_v5 = vpop.f32.mrf.mxu0 }
 0xe81   :  { %5900 = vrcp.f32 %v3733_v2  ;;  %v2983_v23 = vmul.f32 %v5932_v42, %v2975_v5 }
 0xe82   :  { %v5452_v21 = vpop.f32.mrf.mxu0 }
 0xe84   :  { %v3245_v41 = vpop.f32.mrf.mxu0 }
 0xe85   :  { %v3269_v28 = vmul.f32 %v5933_v1, %v3245_v41 }
 0xe86   :  { %v5895_v58 = vpop.eup %5894  ;;  %v5490_v4 = vpop.f32.mrf.mxu0 }
 0xe87   :  { %v3737_v50 = vmul.f32 %v5895_v58, %v5887_v55  ;;  %v3274_v5 = vadd.f32 %v3269_v28, %v2979_v35  ;;  %v4065_v35 = vld [vmem:[%s7848_s2 + $0x190] sm:$0xff] }
 0xe88   :  { %v3250_v49 = vpop.f32.mrf.mxu0 }
 0xe89   :  { %v3270_v9 = vmul.f32 %v7193_v11, %v3250_v49  ;;  %5592 = vmatmul.mubr.msk.f32.gmra.mxu0 %vm737_vm9, %v3737_v50 }
 0xe8a   :  { %v5897_v18 = vpop.eup %5896  ;;  %v5493_v59 = vpop.f32.mrf.mxu0  ;;  %5594 = vmatprep.mubr.msk.f32.mxu0 %vm5937_vm0, %v5936_v0 }
 0xe8b   :  { %v3275_v30 = vadd.f32 %v3270_v9, %v2980_v56  ;;  %v3739_v7 = vmul.f32 %v5897_v18, %v5889_v47  ;;  %v5899_v33 = vpop.eup %5898 }
 0xe8c   :  { %v3255_v52 = vpop.f32.mrf.mxu0  ;;  %v3741_v63 = vmul.f32 %v5899_v33, %v5891_v43 }
 0xe8d   :  { %v3271_v57 = vmul.f32 %v7193_v11, %v3255_v52  ;;  %5595 = vmatmul.mubr.msk.f32.gmra.mxu0 %vm737_vm9, %v3739_v7 }
 0xe8e   :  { %v5496_v14 = vpop.f32.mrf.mxu0  ;;  %5597 = vmatprep.mubr.msk.f32.mxu0 %vm5937_vm0, %v5936_v0  ;;  %v5901_v60 = vpop.eup %5900 }
 0xe8f   :  { %v3276_v17 = vadd.f32 %v3271_v57, %v2981_v62  ;;  %v3743_v16 = vmul.f32 %v5901_v60, %v7604_v37  ;;  %v5935_v14 = vld [vmem:[%s7850_s1 + $0x42] ss:$0 sm:$0xff]  ;;  %v4650_v60 = vld [vmem:[%s7850_s1 + $0x37] ss:$0 sm:$0xff] }
 0xe90   :  { %v3260_v25 = vpop.f32.mrf.mxu0 }
 0xe91   :  { %v3272_v34 = vmul.f32 %v7193_v11, %v3260_v25  ;;  %5598 = vmatmul.mubr.msk.f32.gmra.mxu0 %vm737_vm9, %v3741_v63 }
 0xe92   :  { %v5499_v13 = vpop.f32.mrf.mxu0  ;;  %5600 = vmatprep.mubr.msk.f32.mxu0 %vm5937_vm0, %v5936_v0 }
 0xe93   :  { %v3277_v45 = vadd.f32 %v3272_v34, %v2982_v6 }
 0xe94   :  { %v3265_v22 = vpop.f32.mrf.mxu0 }
 0xe95   :  { %v3273_v55 = vmul.f32 %v5933_v1, %v3265_v22  ;;  %5601 = vmatmul.mubr.msk.f32.gmra.mxu0 %vm737_vm9, %v3743_v16 }
 0xe96   :  { %v5502_v46 = vpop.f32.mrf.mxu0  ;;  %5634 = vmatprep.mubr.msk.f32.mxu0 %vm5937_vm0, %v5936_v0 }
 0xe97   :  { %v3278_v11 = vadd.f32 %v3273_v55, %v2983_v23 }
 0xe98   :  { %v3535_v47 = vpop.f32.mrf.mxu0 }
 0xe99   :  { %v3559_v27 = vmul.f32 %v5934_v36, %v3535_v47 }
 0xe9a   :  { %v5540_v43 = vpop.f32.mrf.mxu0 }
 0xe9b   :  { %v3564_v4 = vadd.f32 %v3559_v27, %v3274_v5 }
 0xe9c   :  { %v3540_v40 = vpop.f32.mrf.mxu0 }
 0xe9d   :  { %v3560_v61 = vmul.f32 %v7238_v31, %v3540_v40 }
 0xe9e   :  { %v5543_v37 = vpop.f32.mrf.mxu0 }
 0xe9f   :  { %v3565_v39 = vadd.f32 %v3560_v61, %v3275_v30 }
 0xea0   :  { %v3545_v32 = vpop.f32.mrf.mxu0 }
 0xea1   :  { %v3561_v3 = vmul.f32 %v7238_v31, %v3545_v32 }
 0xea2   :  { %v5546_v8 = vpop.f32.mrf.mxu0 }
 0xea3   :  { %v3566_v38 = vadd.f32 %v3561_v3, %v3276_v17 }
 0xea4   :  { %v3550_v26 = vpop.f32.mrf.mxu0 }
 0xea5   :  { %v3562_v29 = vmul.f32 %v7238_v31, %v3550_v26 }
 0xea6   :  { %v5549_v48 = vpop.f32.mrf.mxu0 }
 0xea7   :  { %v3567_v51 = vadd.f32 %v3562_v29, %v3277_v45 }
 0xea8   :  { %v3555_v10 = vpop.f32.mrf.mxu0 }
 0xea9   :  { %v3563_v53 = vmul.f32 %v5934_v36, %v3555_v10  ;;  %v4067_v10 = vld [vmem:[%s7848_s2 + $0x1a0] sm:$0xff] }
 0xeaa   :  { %v5552_v2 = vpop.f32.mrf.mxu0 }
 0xeab   :  { %v3568_v21 = vadd.f32 %v3563_v53, %v3278_v11 }
 0xeac   :  { %v3825_v58 = vpop.f32.mrf.mxu0 }
 0xead   :  { %v3849_v50 = vmul.f32 %v7283_v15, %v3825_v58 }
 0xeae   :  { %v5590_v31 = vpop.f32.mrf.mxu0 }
 0xeaf   :  { %v3854_v49 = vadd.f32 %v3849_v50, %v3564_v4 }
 0xeb1   :  { %5612 = vmatmul.mubr.msk.f32.vlgmr.msra.gmra.mxu1 %vm204_vm2, %v3854_v49  ;;  %v7719_v49 = vld [vmem:[%s7850_s1 + $0x38] ss:$0 sm:$0xff] }
 0xeb2   :  { %5614 = vmatprep.mubr.msk.f32.mxu1 %vm5937_vm0, %v5936_v0 }
 0xf49   :  { %v3830_v44 = vpop.f32.mrf.mxu0 }
 0xf4a   :  { %v3850_v41 = vmul.f32 %v7283_v15, %v3830_v44 }
 0xf4b   :  { %v5593_v56 = vpop.f32.mrf.mxu0 }
 0xf4c   :  { %v3855_v9 = vadd.f32 %v3850_v41, %v3565_v39 }
 0xf4d   :  { %v3835_v18 = vpop.f32.mrf.mxu0 }
 0xf4e   :  { %v3851_v59 = vmul.f32 %v7283_v15, %v3835_v18  ;;  %5615 = vmatmul.mubr.msk.f32.gmra.mxu1 %vm204_vm2, %v3855_v9  ;;  %v7727_v9 = vld [vmem:[%s7850_s1 + $0x39] ss:$0 sm:$0xff] }
 0xf4f   :  { %v5596_v30 = vpop.f32.mrf.mxu0  ;;  %5617 = vmatprep.mubr.msk.f32.mxu1 %vm5937_vm0, %v5936_v0 }
 0xf50   :  { %v3856_v7 = vadd.f32 %v3851_v59, %v3566_v38 }
 0xf51   :  { %v3840_v33 = vpop.f32.mrf.mxu0 }
 0xf52   :  { %v3852_v52 = vmul.f32 %v7283_v15, %v3840_v33  ;;  %5618 = vmatmul.mubr.msk.f32.gmra.mxu1 %vm204_vm2, %v3856_v7 }
 0xf53   :  { %v5599_v42 = vpop.f32.mrf.mxu0  ;;  %5620 = vmatprep.mubr.msk.f32.mxu1 %vm5937_vm0, %v5936_v0 }
 0xf54   :  { %v3857_v62 = vadd.f32 %v3852_v52, %v3567_v51 }
 0xf55   :  { %v3845_v57 = vpop.f32.mrf.mxu0 }
 0xf56   :  { %v3853_v17 = vmul.f32 %v5935_v14, %v3845_v57  ;;  %5621 = vmatmul.mubr.msk.f32.gmra.mxu1 %vm204_vm2, %v3857_v62 }
 0xf57   :  { %v5602_v63 = vpop.f32.mrf.mxu0  ;;  %5623 = vmatprep.mubr.msk.f32.mxu1 %vm5937_vm0, %v5936_v0 }
 0xf58   :  { %v3858_v15 = vadd.f32 %v3853_v17, %v3568_v21 }
 0xf5a   :  { %5624 = vmatmul.mubr.msk.f32.gmra.mxu1 %vm204_vm2, %v3858_v15 }
 0xf5b   :  { %5665 = vmatprep.mubr.msk.f32.mxu1 %vm5937_vm0, %v5936_v0 }
 0xf71   :  { %v3944_v25 = vpop.f32.mrf.mxu1 }
 0xf72   :  { %v3968_v6 = vadd.f32 %v3944_v25, %v6921_v12  ;;  %v4230_v25 = vld [vmem:[%s7848_s2 + $0x1e8] sm:$0xff] }
 0xf73   :  { %v5613_v34 = vpop.f32.mrf.mxu1  ;;  %5650 = vmatpush3.msra.mxu1 %v4230_v25 }
 0xf74   :  { %v7682_v13 = vadd.f32 %v4650_v60, %v3968_v6  ;;  %5651 = vmatprep.subr.mxu1 %v5936_v0  ;;  %v4229_v6 = vld [vmem:[%s7848_s2 + $0x1e0] sm:$0xff]  ;;  %v4228_v34 = vld [vmem:[%s7848_s2 + $0x1d8] sm:$0xff] }
 0xf75   :  { %5652 = vmatpush3.msra.mxu1 %v4229_v6 }
 0xf76   :  { %v3982_v45 = vsel %vm204_vm2, %v7682_v13, 0.0  ;;  %5653 = vmatprep.subr.mxu1 %v5936_v0 }
 0xf77   :  { %3983 = vadd.xlane.f32.xlu0 %v3982_v45  ;;  %5654 = vmatpush3.msra.mxu1 %v4228_v34  ;;  %v4227_v45 = vld [vmem:[%s7848_s2 + $0x1d0] sm:$0xff] }
 0xf78   :  { %5655 = vmatprep.subr.mxu1 %v5936_v0 }
 0xf79   :  { %5656 = vmatpush3.msra.mxu1 %v4227_v45 }
 0xf7a   :  { %5657 = vmatprep.subr.mxu1 %v5936_v0 }
0x1000   :  { %v3984_v16 = vpop.xlane.xlu0 %3983 }
0x1001   :  { %v3997_v22 = vmul.f32 0.03125, %v3984_v16  ;;  %v4226_v16 = vld [vmem:[%s7848_s2 + $0x1c8] sm:$0xff] }
0x1002   :  { %5658 = vmatpush3.msra.mxu1 %v4226_v16 }
0x1003   :  { %v4002_v23 = vsub.f32 %v7682_v13, %v3997_v22  ;;  %5659 = vmatprep.subr.mxu1 %v5936_v0  ;;  %v4225_v22 = vld [vmem:[%s7848_s2 + $0x1c0] sm:$0xff] }
0x1004   :  { %5660 = vmatpush3.msra.mxu1 %v4225_v22 }
0x1005   :  { %v4007_v1 = vmul.f32 %v4002_v23, %v4002_v23  ;;  %5661 = vmatprep.subr.mxu1 %v5936_v0 }
0x1007   :  { %v4012_v55 = vsel %vm204_vm2, %v4007_v1, 0.0  ;;  %v4223_v1 = vld [vmem:[%s7848_s2 + $0x1b0] sm:$0xff] }
0x1008   :  { %4013 = vadd.xlane.f32.xlu1 %v4012_v55 }
0x100e   :  { %v3949_v46 = vpop.f32.mrf.mxu1 }
0x100f   :  { %v3969_v11 = vadd.f32 %v3949_v46, %v6926_v20 }
0x1010   :  { %v5616_v47 = vpop.f32.mrf.mxu1 }
0x1011   :  { %v3978_v12 = vadd.f32 %v4650_v60, %v3969_v11 }
0x1012   :  { %v3954_v43 = vpop.f32.mrf.mxu1 }
0x1013   :  { %v3970_v40 = vadd.f32 %v3954_v43, %v6931_v19  ;;  %v3985_v61 = vsel %vm204_vm2, %v3978_v12, 0.0 }
0x1014   :  { %3986 = vadd.xlane.f32.xlu0 %v3985_v61  ;;  %v5619_v37 = vpop.f32.mrf.mxu1 }
0x1015   :  { %v3979_v39 = vadd.f32 %v4650_v60, %v3970_v40 }
0x1016   :  { %v3959_v32 = vpop.f32.mrf.mxu1 }
0x1017   :  { %v3971_v3 = vadd.f32 %v3959_v32, %v6936_v24  ;;  %v3988_v8 = vsel %vm204_vm2, %v3979_v39, 0.0  ;;  %v4068_v24 = vld [vmem:[%s7848_s2 + $0x1a8] sm:$0xff] }
0x1018   :  { %3989 = vadd.xlane.f32.xlu1 %v3988_v8  ;;  %v5622_v38 = vpop.f32.mrf.mxu1  ;;  %5627 = vmatpush3.msra.mxu0 %v4068_v24 }
0x1019   :  { %v3980_v26 = vadd.f32 %v4650_v60, %v3971_v3  ;;  %5628 = vmatprep.subr.mxu0 %v5936_v0 }
0x101a   :  { %v3964_v29 = vpop.f32.mrf.mxu1  ;;  %5629 = vmatpush3.msra.mxu0 %v4067_v10 }
0x101b   :  { %v3972_v20 = vadd.f32 %v3964_v29, %v6941_v54  ;;  %v3991_v48 = vsel %vm204_vm2, %v3980_v26, 0.0  ;;  %5630 = vmatprep.subr.mxu0 %v5936_v0  ;;  %v4066_v54 = vld [vmem:[%s7848_s2 + $0x198] sm:$0xff] }
0x101c   :  { %3992 = vadd.xlane.f32.xlu0 %v3991_v48  ;;  %v5625_v19 = vpop.f32.mrf.mxu1  ;;  %5631 = vmatpush3.msra.mxu0 %v4066_v54 }
0x101d   :  { %v3981_v28 = vadd.f32 %v4650_v60, %v3972_v20  ;;  %5632 = vmatprep.subr.mxu0 %v5936_v0 }
0x101e   :  { %5633 = vmatpush3.msra.mxu0 %v4065_v35 }
0x101f   :  { %v3994_v51 = vsel %vm204_vm2, %v3981_v28, 0.0  ;;  %5680 = vmatprep.subr.mxu0 %v5936_v0 }
0x1020   :  { %3995 = vadd.xlane.f32.xlu1 %v3994_v51 }
0x1091   :  { %v4014_v36 = vpop.xlane.xlu1 %4013 }
0x1092   :  { %v4027_v27 = vmul.f32 0.03125, %v4014_v36 }
0x1094   :  { %v4032_v53 = vadd.f32 1e-05, %v4027_v27 }
0x1096   :  { %5902 = vrsqrt.f32 %v4032_v53 }
0x109d   :  { %v3987_v2 = vpop.xlane.xlu0 %3986 }
0x109e   :  { %v3998_v5 = vmul.f32 0.03125, %v3987_v2  ;;  %v4653_v2 = vld [vmem:[%s7850_s1 + $0x3a] ss:$0 sm:$0xff] }
0x10a0   :  { %v7712_v21 = vsub.f32 %v3978_v12, %v3998_v5 }
0x10a1   :  { %v3990_v58 = vpop.xlane.xlu1 %3989 }
0x10a2   :  { %v3999_v4 = vmul.f32 0.03125, %v3990_v58  ;;  %v4008_v50 = vmul.f32 %v7712_v21, %v7712_v21 }
0x10a3   :  { %v5903_v31 = vpop.eup %5902 }
0x10a4   :  { %v4042_v44 = vmul.f32 %v5903_v31, %v4002_v23  ;;  %v7721_v41 = vsub.f32 %v3979_v39, %v3999_v4  ;;  %v4015_v56 = vsel %vm204_vm2, %v4008_v50, 0.0  ;;  %v4224_v23 = vld [vmem:[%s7848_s2 + $0x1b8] sm:$0xff] }
0x10a5   :  { %4016 = vadd.xlane.f32.xlu0 %v4015_v56  ;;  %v3993_v18 = vpop.xlane.xlu0 %3992  ;;  %5662 = vmatpush3.msra.mxu1 %v4224_v23 }
0x10a6   :  { %v4051_v59 = vmul.f32 %v7719_v49, %v4042_v44  ;;  %v4000_v30 = vmul.f32 0.03125, %v3993_v18  ;;  %v4009_v7 = vmul.f32 %v7721_v41, %v7721_v41  ;;  %5663 = vmatprep.subr.mxu1 %v5936_v0 }
0x10a7   :  { %5664 = vmatpush3.msra.mxu1 %v4223_v1 }
0x10a8   :  { %v4060_v33 = vadd.f32 %v7727_v9, %v4051_v59  ;;  %v7733_v52 = vsub.f32 %v3980_v26, %v4000_v30  ;;  %v4018_v42 = vsel %vm204_vm2, %v4009_v7, 0.0 }
0x10a9   :  { %4019 = vadd.xlane.f32.xlu1 %v4018_v42  ;;  %v3996_v62 = vpop.xlane.xlu1 %3995 }
0x10aa   :  { %v4001_v57 = vmul.f32 0.03125, %v3996_v62  ;;  %5635 = vmatmul.mubr.msk.f32.vlgmr.msra.gmra.mxu0 %vm204_vm2, %v4060_v33  ;;  %v4010_v14 = vmul.f32 %v7733_v52, %v7733_v52 }
0x10ab   :  { %5637 = vmatprep.mubr.msk.f32.mxu0 %vm5937_vm0, %v5936_v0 }
0x10ac   :  { %v4006_v17 = vsub.f32 %v3981_v28, %v4001_v57  ;;  %v4021_v63 = vsel %vm204_vm2, %v4010_v14, 0.0 }
0x10ad   :  { %4022 = vadd.xlane.f32.xlu0 %v4021_v63 }
0x10ae   :  { %v4011_v15 = vmul.f32 %v4006_v17, %v4006_v17 }
0x10b0   :  { %v4024_v60 = vsel %vm204_vm2, %v4011_v15, 0.0 }
0x10b1   :  { %4025 = vadd.xlane.f32.xlu1 %v4024_v60 }
0x112e   :  { %v4017_v55 = vpop.xlane.xlu0 %4016 }
0x112f   :  { %v4028_v46 = vmul.f32 0.03125, %v4017_v55 }
0x1131   :  { %v4033_v11 = vadd.f32 1e-05, %v4028_v46 }
0x1132   :  { %v4020_v47 = vpop.xlane.xlu1 %4019 }
0x1133   :  { %5904 = vrsqrt.f32 %v4033_v11  ;;  %v4029_v12 = vmul.f32 0.03125, %v4020_v47 }
0x1135   :  { %v4034_v43 = vadd.f32 1e-05, %v4029_v12 }
0x1136   :  { %v4023_v40 = vpop.xlane.xlu0 %4022 }
0x1137   :  { %5906 = vrsqrt.f32 %v4034_v43  ;;  %v4030_v61 = vmul.f32 0.03125, %v4023_v40 }
0x1139   :  { %v4035_v37 = vadd.f32 1e-05, %v4030_v61 }
0x113a   :  { %v4026_v39 = vpop.xlane.xlu1 %4025 }
0x113b   :  { %5908 = vrsqrt.f32 %v4035_v37  ;;  %v4031_v32 = vmul.f32 0.03125, %v4026_v39 }
0x113d   :  { %v4036_v3 = vadd.f32 1e-05, %v4031_v32 }
0x113f   :  { %5910 = vrsqrt.f32 %v4036_v3 }
0x1140   :  { %v5905_v8 = vpop.eup %5904 }
0x1141   :  { %v4043_v38 = vmul.f32 %v5905_v8, %v7712_v21 }
0x1143   :  { %v4052_v26 = vmul.f32 %v7719_v49, %v4043_v38 }
0x1144   :  { %v5907_v29 = vpop.eup %5906 }
0x1145   :  { %v4044_v20 = vmul.f32 %v5907_v29, %v7721_v41  ;;  %v4061_v48 = vadd.f32 %v7727_v9, %v4052_v26 }
0x1147   :  { %5638 = vmatmul.mubr.msk.f32.gmra.mxu0 %vm204_vm2, %v4061_v48  ;;  %v4053_v19 = vmul.f32 %v7719_v49, %v4044_v20 }
0x1148   :  { %v5909_v28 = vpop.eup %5908  ;;  %5640 = vmatprep.mubr.msk.f32.mxu0 %vm5937_vm0, %v5936_v0 }
0x1149   :  { %v4045_v51 = vmul.f32 %v5909_v28, %v7733_v52  ;;  %v4062_v24 = vadd.f32 %v7727_v9, %v4053_v19 }
0x114b   :  { %5641 = vmatmul.mubr.msk.f32.gmra.mxu0 %vm204_vm2, %v4062_v24  ;;  %v4054_v10 = vmul.f32 %v7719_v49, %v4045_v51 }
0x114c   :  { %v5911_v54 = vpop.eup %5910  ;;  %5643 = vmatprep.mubr.msk.f32.mxu0 %vm5937_vm0, %v5936_v0 }
0x114d   :  { %v4046_v35 = vmul.f32 %v5911_v54, %v4006_v17  ;;  %v4063_v36 = vadd.f32 %v7727_v9, %v4054_v10 }
0x114f   :  { %5644 = vmatmul.mubr.msk.f32.gmra.mxu0 %vm204_vm2, %v4063_v36  ;;  %v4055_v27 = vmul.f32 %v7719_v49, %v4046_v35 }
0x1150   :  { %5646 = vmatprep.mubr.msk.f32.mxu0 %vm5937_vm0, %v5936_v0 }
0x1151   :  { %v4064_v53 = vadd.f32 %v7727_v9, %v4055_v27 }
0x1153   :  { %5647 = vmatmul.mubr.msk.f32.gmra.mxu0 %vm204_vm2, %v4064_v53  ;;  %v4664_v53 = vld [vmem:[%s7850_s1 + $0x3b] ss:$0 sm:$0xff] }
0x1154   :  { %5688 = vmatprep.mubr.msk.f32.mxu0 %vm5937_vm0, %v5936_v0 }
0x116a   :  { %v4154_v5 = vpop.f32.mrf.mxu0 }
0x116b   :  { %v4155_v21 = vadd.f32 %v4653_v2, %v4154_v5 }
0x116c   :  { %v5636_v58 = vpop.f32.mrf.mxu0 }
0x116d   :  { %v4183_v4 = vmul.f32 0.044715, %v4155_v21  ;;  %v4178_v56 = vmul.f32 0.5, %v4155_v21 }
0x116f   :  { %v4188_v50 = vmul.f32 %v4183_v4, %v4155_v21 }
0x1171   :  { %v4193_v31 = vmul.f32 %v4188_v50, %v4155_v21 }
0x1173   :  { %v4198_v49 = vadd.f32 %v4193_v31, %v4155_v21 }
0x1175   :  { %v4203_v44 = vmul.f32 0.7978846, %v4198_v49 }
0x1177   :  { %5912 = vtanh.f32 %v4203_v44 }
0x1184   :  { %v5913_v41 = vpop.eup %5912 }
0x1185   :  { %v4213_v9 = vadd.f32 1.0, %v5913_v41 }
0x1187   :  { %v4218_v18 = vmul.f32 %v4213_v9, %v4178_v56 }
0x1189   :  { %5666 = vmatmul.mubr.msk.f32.vlgmr.msra.gmra.mxu1 %vm2162_vm13, %v4218_v18 }
0x118a   :  { %5668 = vmatprep.mubr.msk.f32.mxu1 %vm5937_vm0, %v5936_v0 }
0x1207   :  { %v4159_v59 = vpop.f32.mrf.mxu0 }
0x1208   :  { %v4160_v30 = vadd.f32 %v4653_v2, %v4159_v59 }
0x1209   :  { %v5639_v7 = vpop.f32.mrf.mxu0 }
0x120a   :  { %v4184_v33 = vmul.f32 0.044715, %v4160_v30  ;;  %v4179_v8 = vmul.f32 0.5, %v4160_v30 }
0x120b   :  { %v4164_v52 = vpop.f32.mrf.mxu0 }
0x120c   :  { %v4189_v42 = vmul.f32 %v4184_v33, %v4160_v30  ;;  %v4165_v62 = vadd.f32 %v4653_v2, %v4164_v52  ;;  %v4366_v52 = vld [vmem:[%s7848_s2 + $0x208] sm:$0xff] }
0x120d   :  { %v5642_v57 = vpop.f32.mrf.mxu0  ;;  %5681 = vmatpush3.msra.mxu0 %v4366_v52 }
0x120e   :  { %v4194_v14 = vmul.f32 %v4189_v42, %v4160_v30  ;;  %v4185_v17 = vmul.f32 0.044715, %v4165_v62  ;;  %v4180_v20 = vmul.f32 0.5, %v4165_v62  ;;  %5682 = vmatprep.subr.mxu0 %v5936_v0  ;;  %v4365_v42 = vld [vmem:[%s7848_s2 + $0x200] sm:$0xff]  ;;  %v4363_v57 = vld [vmem:[%s7848_s2 + $0x1f0] sm:$0xff] }
0x120f   :  { %v4169_v63 = vpop.f32.mrf.mxu0  ;;  %5683 = vmatpush3.msra.mxu0 %v4365_v42 }
0x1210   :  { %v4199_v15 = vadd.f32 %v4194_v14, %v4160_v30  ;;  %v4190_v60 = vmul.f32 %v4185_v17, %v4165_v62  ;;  %v4170_v25 = vadd.f32 %v4653_v2, %v4169_v63  ;;  %5684 = vmatprep.subr.mxu0 %v5936_v0 }
0x1211   :  { %v5645_v6 = vpop.f32.mrf.mxu0 }
0x1212   :  { %v4204_v34 = vmul.f32 0.7978846, %v4199_v15  ;;  %v4195_v45 = vmul.f32 %v4190_v60, %v4165_v62  ;;  %v4186_v16 = vmul.f32 0.044715, %v4170_v25  ;;  %v4181_v51 = vmul.f32 0.5, %v4170_v25 }
0x1213   :  { %v4174_v22 = vpop.f32.mrf.mxu0  ;;  %v4665_v60 = vld [vmem:[%s7850_s1 + $0x3c] ss:$0 sm:$0xff]  ;;  %v4666_v6 = vld [vmem:[%s7850_s1 + $0x3d] ss:$0 sm:$0xff] }
0x1214   :  { %5914 = vtanh.f32 %v4204_v34  ;;  %v4200_v23 = vadd.f32 %v4195_v45, %v4165_v62  ;;  %v4191_v1 = vmul.f32 %v4186_v16, %v4170_v25  ;;  %v4175_v55 = vadd.f32 %v4653_v2, %v4174_v22  ;;  %v4364_v62 = vld [vmem:[%s7848_s2 + $0x1f8] sm:$0xff] }
0x1215   :  { %v5648_v46 = vpop.f32.mrf.mxu0  ;;  %5685 = vmatpush3.msra.mxu0 %v4364_v62 }
0x1216   :  { %v4205_v11 = vmul.f32 0.7978846, %v4200_v23  ;;  %v4196_v47 = vmul.f32 %v4191_v1, %v4170_v25  ;;  %v4187_v12 = vmul.f32 0.044715, %v4175_v55  ;;  %v4182_v35 = vmul.f32 0.5, %v4175_v55  ;;  %5686 = vmatprep.subr.mxu0 %v5936_v0 }
0x1217   :  { %5687 = vmatpush3.msra.mxu0 %v4363_v57 }
0x1218   :  { %5916 = vtanh.f32 %v4205_v11  ;;  %v4201_v43 = vadd.f32 %v4196_v47, %v4170_v25  ;;  %v4192_v40 = vmul.f32 %v4187_v12, %v4175_v55 }
0x121a   :  { %v4206_v61 = vmul.f32 0.7978846, %v4201_v43  ;;  %v4197_v37 = vmul.f32 %v4192_v40, %v4175_v55 }
0x121c   :  { %5918 = vtanh.f32 %v4206_v61  ;;  %v4202_v39 = vadd.f32 %v4197_v37, %v4175_v55 }
0x121e   :  { %v4207_v32 = vmul.f32 0.7978846, %v4202_v39 }
0x1220   :  { %5920 = vtanh.f32 %v4207_v32 }
0x1221   :  { %v5915_v3 = vpop.eup %5914 }
0x1222   :  { %v4214_v38 = vadd.f32 1.0, %v5915_v3 }
0x1224   :  { %v4219_v26 = vmul.f32 %v4214_v38, %v4179_v8 }
0x1225   :  { %v5917_v29 = vpop.eup %5916 }
0x1226   :  { %5669 = vmatmul.mubr.msk.f32.gmra.mxu1 %vm2162_vm13, %v4219_v26  ;;  %v4215_v48 = vadd.f32 1.0, %v5917_v29 }
0x1227   :  { %5671 = vmatprep.mubr.msk.f32.mxu1 %vm5937_vm0, %v5936_v0 }
0x1228   :  { %v4220_v19 = vmul.f32 %v4215_v48, %v4180_v20 }
0x1229   :  { %v5919_v28 = vpop.eup %5918 }
0x122a   :  { %5672 = vmatmul.mubr.msk.f32.gmra.mxu1 %vm2162_vm13, %v4220_v19  ;;  %v4216_v24 = vadd.f32 1.0, %v5919_v28 }
0x122b   :  { %5674 = vmatprep.mubr.msk.f32.mxu1 %vm5937_vm0, %v5936_v0 }
0x122c   :  { %v4221_v10 = vmul.f32 %v4216_v24, %v4181_v51 }
0x122d   :  { %v5921_v54 = vpop.eup %5920 }
0x122e   :  { %5675 = vmatmul.mubr.msk.f32.gmra.mxu1 %vm2162_vm13, %v4221_v10  ;;  %v4217_v36 = vadd.f32 1.0, %v5921_v54 }
0x122f   :  { %5677 = vmatprep.mubr.msk.f32.mxu1 %vm5937_vm0, %v5936_v0  ;;  %v4667_v0 = vld [vmem:[%s7850_s1 + $0x3e] ss:$0 sm:$0xff] }
0x1230   :  { %v4222_v27 = vmul.f32 %v4217_v36, %v4182_v35 }
0x1232   :  { %5678 = vmatmul.mubr.msk.f32.gmra.mxu1 %vm2162_vm13, %v4222_v27 }
0x1249   :  { %v4312_v2 = vpop.f32.mrf.mxu1 }
0x124a   :  { %v4332_v5 = vadd.f32 %v4312_v2, %v7682_v13 }
0x124b   :  { %v5667_v21 = vpop.f32.mrf.mxu1 }
0x124c   :  { %v4337_v58 = vadd.f32 %v4664_v53, %v4332_v5 }
0x124e   :  { %v4340_v4 = vsel %vm204_vm2, %v4337_v58, 0.0 }
0x124f   :  { %4341 = vadd.xlane.f32.xlu0 %v4340_v4 }
0x12d8   :  { %v4342_v50 = vpop.xlane.xlu0 %4341 }
0x12d9   :  { %v4343_v31 = vmul.f32 0.03125, %v4342_v50 }
0x12db   :  { %v4344_v49 = vsub.f32 %v4337_v58, %v4343_v31 }
0x12dd   :  { %v4345_v44 = vmul.f32 %v4344_v49, %v4344_v49 }
0x12df   :  { %v4346_v41 = vsel %vm204_vm2, %v4345_v44, 0.0 }
0x12e0   :  { %4347 = vadd.xlane.f32.xlu1 %v4346_v41 }
0x12e6   :  { %v4317_v56 = vpop.f32.mrf.mxu1 }
0x12e8   :  { %v5670_v9 = vpop.f32.mrf.mxu1 }
0x12ea   :  { %v4321_v18 = vpop.f32.mrf.mxu1 }
0x12ec   :  { %v5673_v59 = vpop.f32.mrf.mxu1 }
0x12ee   :  { %v4325_v30 = vpop.f32.mrf.mxu1 }
0x12f0   :  { %v5676_v7 = vpop.f32.mrf.mxu1 }
0x12f2   :  { %v4329_v33 = vpop.f32.mrf.mxu1 }
0x12f4   :  { %v5679_v13 = vpop.f32.mrf.mxu1 }
0x1369   :  { %v4348_v14 = vpop.xlane.xlu1 %4347 }
0x136a   :  { %v4349_v17 = vmul.f32 0.03125, %v4348_v14 }
0x136c   :  { %v4350_v63 = vadd.f32 1e-05, %v4349_v17 }
0x136e   :  { %5922 = vrsqrt.f32 %v4350_v63 }
0x137b   :  { %v5923_v15 = vpop.eup %5922 }
0x137c   :  { %v4352_v25 = vmul.f32 %v5923_v15, %v4344_v49 }
0x137e   :  { %v4357_v34 = vmul.f32 %v4665_v60, %v4352_v25 }
0x1380   :  { %v4362_v45 = vadd.f32 %v4666_v6, %v4357_v34 }
0x1382   :  { %5689 = vmatmul.mubr.msk.f32.vlgmr.msra.gmra.mxu0 %vm204_vm2, %v4362_v45 }
0x1442   :  { %v4441_v16 = vpop.f32.mrf.mxu0 }
0x1443   :  { %v4442_v22 = vadd.f32 %v4667_v0, %v4441_v16 }
0x1444   :  { %v5690_v23 = vpop.f32.mrf.mxu0 }
0x1445   :  { %4445 = vst.msk [vmem:[%s7851_s3] sm:$0xff] %vm2162_vm13, %v4442_v22 }

</bundles_post_ra>
